<compile_context>
chip_gen: v7x
topology: tpu7x:2x2x1
jax: 0.10.0
libtpu: 0.0.40
codegen_flags: <defaults>
</compile_context>

<pallas_src>
import jax
import jax.numpy as jnp
from jax.experimental import pallas as pl
from jax.experimental.pallas import tpu as pltpu


# ----------------------------- Pallas kernels -----------------------------

def _gemm_affine_relu_kernel(x_ref, w_ref, scale_ref, bias_ref, o_ref, acc_ref):
    # (M, tk) @ (tk, tn) on the MXU, accumulated in f32 scratch across the K
    # grid axis; per-output-channel affine (folded conv-bias + BN) and ReLU
    # applied once on the last K step.
    k = pl.program_id(1)

    @pl.when(k == 0)
    def _():
        acc_ref[...] = jnp.zeros_like(acc_ref)

    acc_ref[...] += jnp.dot(x_ref[...], w_ref[...],
                            preferred_element_type=jnp.float32)

    @pl.when(k == pl.num_programs(1) - 1)
    def _():
        y = acc_ref[...] * scale_ref[...] + bias_ref[...]
        o_ref[...] = jnp.maximum(y, 0.0).astype(o_ref.dtype)


def _gemm_bias_tanh_kernel(x_ref, w_ref, b_ref, o_ref, acc_ref):
    k = pl.program_id(1)

    @pl.when(k == 0)
    def _():
        acc_ref[...] = jnp.zeros_like(acc_ref)

    acc_ref[...] += jnp.dot(x_ref[...], w_ref[...],
                            preferred_element_type=jnp.float32)

    @pl.when(k == pl.num_programs(1) - 1)
    def _():
        o_ref[...] = jnp.tanh(acc_ref[...] + b_ref[...]).astype(o_ref.dtype)


_COMPILER_PARAMS = pltpu.CompilerParams(
    dimension_semantics=("parallel", "arbitrary"),   # N tiles parallel, K reduce
    vmem_limit_bytes=32 * 1024 * 1024,               # headroom even on v7x (64 MiB VMEM)
)


def _pick_tk(K, target=1024):
    """Largest multiple of 128 that divides K and is <= target (else whole K)."""
    if K <= target:
        return K
    best = K
    for cand in range(128, target + 1, 128):
        if K % cand == 0:
            best = cand
    return best


def _pick_tn(N, target=256):
    if N <= target:
        return N
    for cand in range(target, 127, -128):
        if N % cand == 0:
            return cand
    return N


def gemm_affine_relu(x, w, scale, bias):
    """x:(M,K) bf16, w:(K,N) bf16, scale/bias:(1,N) f32 -> (M,N) bf16."""
    M, K = x.shape
    N = w.shape[1]
    tk = _pick_tk(K)
    tn = _pick_tn(N)
    return pl.pallas_call(
        _gemm_affine_relu_kernel,
        out_shape=jax.ShapeDtypeStruct((M, N), jnp.bfloat16),
        grid=(N // tn, K // tk),
        in_specs=[
            pl.BlockSpec((M, tk), lambda j, k: (0, k)),
            pl.BlockSpec((tk, tn), lambda j, k: (k, j)),
            pl.BlockSpec((1, tn), lambda j, k: (0, j)),
            pl.BlockSpec((1, tn), lambda j, k: (0, j)),
        ],
        out_specs=pl.BlockSpec((M, tn), lambda j, k: (0, j)),
        scratch_shapes=[pltpu.VMEM((M, tn), jnp.float32)],
        compiler_params=_COMPILER_PARAMS,
    )(x, w, scale, bias)


def gemm_bias_tanh(x, w, b):
    """x:(M,K) bf16, w:(K,N) bf16, b:(1,N) f32 -> (M,N) f32."""
    M, K = x.shape
    N = w.shape[1]
    tk = _pick_tk(K)
    tn = _pick_tn(N)
    return pl.pallas_call(
        _gemm_bias_tanh_kernel,
        out_shape=jax.ShapeDtypeStruct((M, N), jnp.float32),
        grid=(N // tn, K // tk),
        in_specs=[
            pl.BlockSpec((M, tk), lambda j, k: (0, k)),
            pl.BlockSpec((tk, tn), lambda j, k: (k, j)),
            pl.BlockSpec((1, tn), lambda j, k: (0, j)),
        ],
        out_specs=pl.BlockSpec((M, tn), lambda j, k: (0, j)),
        scratch_shapes=[pltpu.VMEM((M, tn), jnp.float32)],
        compiler_params=_COMPILER_PARAMS,
    )(x, w, b)


# --------------------------- JAX glue (im2col) ----------------------------

def im2col_nhwc(x, kh, kw, stride, pad):
    """x: (B, H, W, C) -> patches (B*OH*OW, kh*kw*C), plus OH, OW.

    Flattened feature order is (kh, kw, C); the conv weights are pre-permuted
    to the same order at prep time (see prepare_params).
    """
    B, H, W, C = x.shape
    xp = jnp.pad(x, ((0, 0), (pad, pad), (pad, pad), (0, 0)))
    OH = (H + 2 * pad - kh) // stride + 1
    OW = (W + 2 * pad - kw) // stride + 1
    cols = []
    for i in range(kh):
        for j in range(kw):
            cols.append(xp[:, i:i + stride * OH:stride,
                           j:j + stride * OW:stride, :])
    patches = jnp.stack(cols, axis=3)              # (B, OH, OW, kh*kw, C)
    return patches.reshape(B * OH * OW, kh * kw * C), OH, OW


# ------------------------------ the module --------------------------------

# (out_channels, kernel, stride, pad) for the four conv+BN+ReLU stages.
_CONV_CFG = [
    (512, 4, 2, 1),
    (256, 4, 2, 1),
    (128, 3, 1, 1),
    (64, 3, 1, 1),
]
_BN_EPS = 1e-5
_LINEAR_CHW = (64, 4, 3)   # (C, H, W) feeding the Linear (fixed by the arch)
_LINEAR_NPAD = 128         # pad the tiny output_dim to a full lane width


def init_raw_params(key, input_nc=512, output_dim=6):
    """Random parameters laid out like a PyTorch state_dict."""
    params = {"convs": []}
    in_c = input_nc
    for out_c, k, _, _ in _CONV_CFG:
        key, kw_, kb_, kg_, kbe_, km_, kv_ = jax.random.split(key, 7)
        params["convs"].append({
            "w": 0.05 * jax.random.normal(kw_, (out_c, in_c, k, k), jnp.float32),
            "b": 0.05 * jax.random.normal(kb_, (out_c,), jnp.float32),
            "gamma": jax.random.uniform(kg_, (out_c,), jnp.float32, 0.5, 1.5),
            "beta": 0.1 * jax.random.normal(kbe_, (out_c,), jnp.float32),
            "mean": 0.1 * jax.random.normal(km_, (out_c,), jnp.float32),
            "var": jax.random.uniform(kv_, (out_c,), jnp.float32, 0.5, 1.5),
        })
        in_c = out_c
    key, kw_, kb_ = jax.random.split(key, 3)
    c, h, w = _LINEAR_CHW
    params["linear"] = {
        "w": 0.05 * jax.random.normal(kw_, (output_dim, c * h * w), jnp.float32),
        "b": 0.05 * jax.random.normal(kb_, (output_dim,), jnp.float32),
    }
    return params


def prepare_params(raw):
    """One-time (outside the forward) conversion of PyTorch-layout params into
    the kernel-friendly inference layout:
      * conv weight (OC, C, KH, KW) -> (KH*KW*C, OC) bf16 (matches im2col_nhwc)
      * BN running stats + conv bias folded into per-channel scale/bias (f32)
      * Linear columns permuted from NCHW-flatten to NHWC-flatten order,
        transposed to (K, N) and N-padded to 128, bf16.
    """
    prep = {"convs": []}
    for layer in raw["convs"]:
        w = layer["w"]                                   # (OC, C, kh, kw)
        oc, c, kh, kw = w.shape
        w2d = w.transpose(2, 3, 1, 0).reshape(kh * kw * c, oc)
        inv_std = 1.0 / jnp.sqrt(layer["var"] + _BN_EPS)
        scale = layer["gamma"] * inv_std                 # (OC,)
        bias = layer["beta"] + scale * (layer["b"] - layer["mean"])
        prep["convs"].append({
            "w": w2d.astype(jnp.bfloat16),
            "scale": scale[None, :].astype(jnp.float32),
            "bias": bias[None, :].astype(jnp.float32),
        })
    wl, bl = raw["linear"]["w"], raw["linear"]["b"]      # (OD, C*H*W), (OD,)
    out_dim = wl.shape[0]
    c, h, w = _LINEAR_CHW
    # column index c*H*W + h*W + w (NCHW flatten) -> row index h*W*C + w*C + c
    w2d = wl.reshape(out_dim, c, h, w).transpose(2, 3, 1, 0).reshape(h * w * c, out_dim)
    w2d = jnp.pad(w2d, ((0, 0), (0, _LINEAR_NPAD - out_dim)))
    bl_p = jnp.pad(bl, (0, _LINEAR_NPAD - out_dim))
    prep["linear"] = {
        "w": w2d.astype(jnp.bfloat16),
        "b": bl_p[None, :].astype(jnp.float32),
    }
    return prep


def feature_regression_forward(x, prep, output_dim=6):
    """x: (B, Cin, H, W) NCHW (PyTorch layout). Requires H=16, W=12 so the
    conv stack ends at 64x4x3, matching Linear(64*4*3, output_dim)."""
    B = x.shape[0]
    h = jnp.transpose(x, (0, 2, 3, 1)).astype(jnp.bfloat16)   # NHWC once, bf16
    for (out_c, k, s, p), layer in zip(_CONV_CFG, prep["convs"]):
        patches, OH, OW = im2col_nhwc(h, k, k, s, p)           # (B*OH*OW, k*k*C)
        out = gemm_affine_relu(patches, layer["w"], layer["scale"], layer["bias"])
        h = out.reshape(B, OH, OW, out_c)                      # stays NHWC (bf16)
    flat = h.reshape(B, -1)          # NHWC flatten; linear cols pre-permuted
    lin = prep["linear"]
    y = gemm_bias_tanh(flat, lin["w"], lin["b"])               # (B, 128) f32
    return y[:, :output_dim]


# --------------------------- pure-jnp reference ----------------------------

def _reference_forward(x, prep, output_dim=6):
    """Same math with plain jnp (validates the Pallas plumbing)."""
    B = x.shape[0]
    h = jnp.transpose(x, (0, 2, 3, 1)).astype(jnp.bfloat16)
    for (out_c, k, s, p), layer in zip(_CONV_CFG, prep["convs"]):
        patches, OH, OW = im2col_nhwc(h, k, k, s, p)
        acc = jnp.dot(patches, layer["w"], preferred_element_type=jnp.float32)
        out = jnp.maximum(acc * layer["scale"] + layer["bias"], 0.0)
        h = out.astype(jnp.bfloat16).reshape(B, OH, OW, out_c)
    flat = h.reshape(B, -1)
    lin = prep["linear"]
    acc = jnp.dot(flat, lin["w"], preferred_element_type=jnp.float32)
    y = jnp.tanh(acc + lin["b"])
    return y[:, :output_dim]


if __name__ == "__main__":
    key = jax.random.PRNGKey(0)
    key, pkey, xkey = jax.random.split(key, 3)

    # Small but shape-consistent: H=16, W=12 is forced by Linear(64*4*3, 6)
    # after two stride-2 convs. input_nc kept small (module exposes it).
    B, CIN, H, W = 2, 64, 16, 12
    raw = init_raw_params(pkey, input_nc=CIN, output_dim=6)
    prep = prepare_params(raw)          # one-time weight folding (not per call)
    x = jax.random.normal(xkey, (B, CIN, H, W), jnp.float32)

    fwd = jax.jit(feature_regression_forward)
    y = jax.block_until_ready(fwd(x, prep))
    assert y.shape == (B, 6), y.shape
    assert bool(jnp.all(jnp.isfinite(y))), "non-finite output"

    y_ref = jax.block_until_ready(jax.jit(_reference_forward)(x, prep))
    assert bool(jnp.allclose(y, y_ref, atol=1e-2, rtol=1e-2)), "mismatch vs jnp reference"

    print("KERNEL_OK")
</pallas_src>

<mosaic_0001>
module attributes {stable_mosaic.version = 11 : i64} {
  func.func @_gemm_affine_relu_kernel(%arg0: i32, %arg1: i32, %arg2: memref<96x1024xbf16, #tpu.memory_space<vmem>>, %arg3: memref<1024x256xbf16, #tpu.memory_space<vmem>>, %arg4: memref<1x256xf32, #tpu.memory_space<vmem>>, %arg5: memref<1x256xf32, #tpu.memory_space<vmem>>, %arg6: memref<96x256xbf16, #tpu.memory_space<vmem>>, %arg7: memref<96x256xf32, #tpu.memory_space<vmem>>) attributes {dimension_semantics = [#tpu.dimension_semantics<parallel>, #tpu.dimension_semantics<arbitrary>], iteration_bounds = array<i64: 2, 1>, scalar_prefetch = 0 : i64, scratch_operands = 1 : i64, tpu.core_type = #tpu.core_type<tc>, window_params = [{transform_indices = @transform_0, window_bounds = array<i64: 96, 1024>}, {transform_indices = @transform_1, window_bounds = array<i64: 1024, 256>}, {transform_indices = @transform_2, window_bounds = array<i64: 1, 256>}, {transform_indices = @transform_3, window_bounds = array<i64: 1, 256>}, {transform_indices = @transform_4, window_bounds = array<i64: 96, 256>}]} {
    %c0_i32 = arith.constant 0 : i32
    %0 = arith.cmpi eq, %arg1, %c0_i32 : i32
    %1 = arith.extui %0 : i1 to i32
    %c0_i32_0 = arith.constant 0 : i32
    %2 = arith.cmpi ne, %1, %c0_i32_0 : i32
    scf.if %2 {
      %cst_10 = arith.constant 0.000000e+00 : f32
      %12 = vector.broadcast %cst_10 : f32 to vector<96x256xf32>
      %c0_11 = arith.constant 0 : index
      %c0_12 = arith.constant 0 : index
      %13 = vector.load %arg7[%c0_11, %c0_12] : memref<96x256xf32, #tpu.memory_space<vmem>>, vector<96x256xf32>
      tpu.vector_store %arg7[%c0_11, %c0_12], %12 {strides = array<i32>} : memref<96x256xf32, #tpu.memory_space<vmem>>, vector<96x256xf32>,
    } else {
    }
    %c0 = arith.constant 0 : index
    %c0_1 = arith.constant 0 : index
    %3 = vector.load %arg7[%c0, %c0_1] : memref<96x256xf32, #tpu.memory_space<vmem>>, vector<96x256xf32>
    %c0_2 = arith.constant 0 : index
    %c0_3 = arith.constant 0 : index
    %4 = vector.load %arg2[%c0_2, %c0_3] : memref<96x1024xbf16, #tpu.memory_space<vmem>>, vector<96x1024xbf16>
    %c0_4 = arith.constant 0 : index
    %c0_5 = arith.constant 0 : index
    %5 = vector.load %arg3[%c0_4, %c0_5] : memref<1024x256xbf16, #tpu.memory_space<vmem>>, vector<1024x256xbf16>
    %cst = arith.constant dense<0.000000e+00> : vector<96x256xf32>
    %6 = tpu.matmul %4, %5, %cst {dimension_numbers = #tpu.dot_dimension_numbers<[1], [0], [0], [1], [0, 0, 1, 1], [], []>} : vector<96x1024xbf16>, vector<1024x256xbf16>, vector<96x256xf32> -> vector<96x256xf32>
    %7 = arith.addf %3, %6 : vector<96x256xf32>
    %c0_6 = arith.constant 0 : index
    %c0_7 = arith.constant 0 : index
    %8 = vector.load %arg7[%c0_6, %c0_7] : memref<96x256xf32, #tpu.memory_space<vmem>>, vector<96x256xf32>
    tpu.vector_store %arg7[%c0_6, %c0_7], %7 {strides = array<i32>} : memref<96x256xf32, #tpu.memory_space<vmem>>, vector<96x256xf32>,
    %c0_i32_8 = arith.constant 0 : i32
    %9 = arith.cmpi eq, %arg1, %c0_i32_8 : i32
    %10 = arith.extui %9 : i1 to i32
    %c0_i32_9 = arith.constant 0 : i32
    %11 = arith.cmpi ne, %10, %c0_i32_9 : i32
    scf.if %11 {
      %c0_10 = arith.constant 0 : index
      %c0_11 = arith.constant 0 : index
      %12 = vector.load %arg7[%c0_10, %c0_11] : memref<96x256xf32, #tpu.memory_space<vmem>>, vector<96x256xf32>
      %c0_12 = arith.constant 0 : index
      %c0_13 = arith.constant 0 : index
      %13 = vector.load %arg4[%c0_12, %c0_13] : memref<1x256xf32, #tpu.memory_space<vmem>>, vector<1x256xf32>
      %14 = vector.broadcast %13 : vector<1x256xf32> to vector<96x256xf32>
      %15 = arith.mulf %12, %14 : vector<96x256xf32>
      %c0_14 = arith.constant 0 : index
      %c0_15 = arith.constant 0 : index
      %16 = vector.load %arg5[%c0_14, %c0_15] : memref<1x256xf32, #tpu.memory_space<vmem>>, vector<1x256xf32>
      %17 = vector.broadcast %16 : vector<1x256xf32> to vector<96x256xf32>
      %18 = arith.addf %15, %17 : vector<96x256xf32>
      %cst_16 = arith.constant 0.000000e+00 : f32
      %19 = vector.broadcast %cst_16 : f32 to vector<96x256xf32>
      %20 = arith.maximumf %18, %19 : vector<96x256xf32>
      %21 = arith.truncf %20 : vector<96x256xf32> to vector<96x256xbf16>
      %c0_17 = arith.constant 0 : index
      %c0_18 = arith.constant 0 : index
      %22 = vector.load %arg6[%c0_17, %c0_18] : memref<96x256xbf16, #tpu.memory_space<vmem>>, vector<96x256xbf16>
      tpu.vector_store %arg6[%c0_17, %c0_18], %21 {strides = array<i32>} : memref<96x256xbf16, #tpu.memory_space<vmem>>, vector<96x256xbf16>,
    } else {
    }
    return
  }
  func.func @transform_0(%arg0: i32, %arg1: i32) -> (i32, i32) {
    %c0_i32 = arith.constant 0 : i32
    %c0_i32_0 = arith.constant 0 : i32
    return %c0_i32, %arg1 : i32, i32
  }
  func.func @transform_1(%arg0: i32, %arg1: i32) -> (i32, i32) {
    %c0_i32 = arith.constant 0 : i32
    return %arg1, %arg0 : i32, i32
  }
  func.func @transform_2(%arg0: i32, %arg1: i32) -> (i32, i32) {
    %c0_i32 = arith.constant 0 : i32
    %c0_i32_0 = arith.constant 0 : i32
    return %c0_i32, %arg0 : i32, i32
  }
  func.func @transform_3(%arg0: i32, %arg1: i32) -> (i32, i32) {
    %c0_i32 = arith.constant 0 : i32
    %c0_i32_0 = arith.constant 0 : i32
    return %c0_i32, %arg0 : i32, i32
  }
  func.func @transform_4(%arg0: i32, %arg1: i32) -> (i32, i32) {
    %c0_i32 = arith.constant 0 : i32
    %c0_i32_0 = arith.constant 0 : i32
    return %c0_i32, %arg0 : i32, i32
  }
}

module attributes {stable_mosaic.version = 11 : i64} {
  func.func @_gemm_affine_relu_kernel(%arg0: i32, %arg1: i32, %arg2: memref<24x1024xbf16, #tpu.memory_space<vmem>>, %arg3: memref<1024x256xbf16, #tpu.memory_space<vmem>>, %arg4: memref<1x256xf32, #tpu.memory_space<vmem>>, %arg5: memref<1x256xf32, #tpu.memory_space<vmem>>, %arg6: memref<24x256xbf16, #tpu.memory_space<vmem>>, %arg7: memref<24x256xf32, #tpu.memory_space<vmem>>) attributes {dimension_semantics = [#tpu.dimension_semantics<parallel>, #tpu.dimension_semantics<arbitrary>], iteration_bounds = array<i64: 1, 8>, scalar_prefetch = 0 : i64, scratch_operands = 1 : i64, tpu.core_type = #tpu.core_type<tc>, window_params = [{transform_indices = @transform_0, window_bounds = array<i64: 24, 1024>}, {transform_indices = @transform_1, window_bounds = array<i64: 1024, 256>}, {transform_indices = @transform_2, window_bounds = array<i64: 1, 256>}, {transform_indices = @transform_3, window_bounds = array<i64: 1, 256>}, {transform_indices = @transform_4, window_bounds = array<i64: 24, 256>}]} {
    %c0_i32 = arith.constant 0 : i32
    %0 = arith.cmpi eq, %arg1, %c0_i32 : i32
    %1 = arith.extui %0 : i1 to i32
    %c0_i32_0 = arith.constant 0 : i32
    %2 = arith.cmpi ne, %1, %c0_i32_0 : i32
    scf.if %2 {
      %cst_9 = arith.constant 0.000000e+00 : f32
      %12 = vector.broadcast %cst_9 : f32 to vector<24x256xf32>
      %c0_10 = arith.constant 0 : index
      %c0_11 = arith.constant 0 : index
      %13 = vector.load %arg7[%c0_10, %c0_11] : memref<24x256xf32, #tpu.memory_space<vmem>>, vector<24x256xf32>
      tpu.vector_store %arg7[%c0_10, %c0_11], %12 {strides = array<i32>} : memref<24x256xf32, #tpu.memory_space<vmem>>, vector<24x256xf32>,
    } else {
    }
    %c0 = arith.constant 0 : index
    %c0_1 = arith.constant 0 : index
    %3 = vector.load %arg7[%c0, %c0_1] : memref<24x256xf32, #tpu.memory_space<vmem>>, vector<24x256xf32>
    %c0_2 = arith.constant 0 : index
    %c0_3 = arith.constant 0 : index
    %4 = vector.load %arg2[%c0_2, %c0_3] : memref<24x1024xbf16, #tpu.memory_space<vmem>>, vector<24x1024xbf16>
    %c0_4 = arith.constant 0 : index
    %c0_5 = arith.constant 0 : index
    %5 = vector.load %arg3[%c0_4, %c0_5] : memref<1024x256xbf16, #tpu.memory_space<vmem>>, vector<1024x256xbf16>
    %cst = arith.constant dense<0.000000e+00> : vector<24x256xf32>
    %6 = tpu.matmul %4, %5, %cst {dimension_numbers = #tpu.dot_dimension_numbers<[1], [0], [0], [1], [0, 0, 1, 1], [], []>} : vector<24x1024xbf16>, vector<1024x256xbf16>, vector<24x256xf32> -> vector<24x256xf32>
    %7 = arith.addf %3, %6 : vector<24x256xf32>
    %c0_6 = arith.constant 0 : index
    %c0_7 = arith.constant 0 : index
    %8 = vector.load %arg7[%c0_6, %c0_7] : memref<24x256xf32, #tpu.memory_space<vmem>>, vector<24x256xf32>
    tpu.vector_store %arg7[%c0_6, %c0_7], %7 {strides = array<i32>} : memref<24x256xf32, #tpu.memory_space<vmem>>, vector<24x256xf32>,
    %c7_i32 = arith.constant 7 : i32
    %9 = arith.cmpi eq, %arg1, %c7_i32 : i32
    %10 = arith.extui %9 : i1 to i32
    %c0_i32_8 = arith.constant 0 : i32
    %11 = arith.cmpi ne, %10, %c0_i32_8 : i32
    scf.if %11 {
      %c0_9 = arith.constant 0 : index
      %c0_10 = arith.constant 0 : index
      %12 = vector.load %arg7[%c0_9, %c0_10] : memref<24x256xf32, #tpu.memory_space<vmem>>, vector<24x256xf32>
      %c0_11 = arith.constant 0 : index
      %c0_12 = arith.constant 0 : index
      %13 = vector.load %arg4[%c0_11, %c0_12] : memref<1x256xf32, #tpu.memory_space<vmem>>, vector<1x256xf32>
      %14 = vector.broadcast %13 : vector<1x256xf32> to vector<24x256xf32>
      %15 = arith.mulf %12, %14 : vector<24x256xf32>
      %c0_13 = arith.constant 0 : index
      %c0_14 = arith.constant 0 : index
      %16 = vector.load %arg5[%c0_13, %c0_14] : memref<1x256xf32, #tpu.memory_space<vmem>>, vector<1x256xf32>
      %17 = vector.broadcast %16 : vector<1x256xf32> to vector<24x256xf32>
      %18 = arith.addf %15, %17 : vector<24x256xf32>
      %cst_15 = arith.constant 0.000000e+00 : f32
      %19 = vector.broadcast %cst_15 : f32 to vector<24x256xf32>
      %20 = arith.maximumf %18, %19 : vector<24x256xf32>
      %21 = arith.truncf %20 : vector<24x256xf32> to vector<24x256xbf16>
      %c0_16 = arith.constant 0 : index
      %c0_17 = arith.constant 0 : index
      %22 = vector.load %arg6[%c0_16, %c0_17] : memref<24x256xbf16, #tpu.memory_space<vmem>>, vector<24x256xbf16>
      tpu.vector_store %arg6[%c0_16, %c0_17], %21 {strides = array<i32>} : memref<24x256xbf16, #tpu.memory_space<vmem>>, vector<24x256xbf16>,
    } else {
    }
    return
  }
  func.func @transform_0(%arg0: i32, %arg1: i32) -> (i32, i32) {
    %c0_i32 = arith.constant 0 : i32
    %c0_i32_0 = arith.constant 0 : i32
    return %c0_i32, %arg1 : i32, i32
  }
  func.func @transform_1(%arg0: i32, %arg1: i32) -> (i32, i32) {
    %c0_i32 = arith.constant 0 : i32
    return %arg1, %arg0 : i32, i32
  }
  func.func @transform_2(%arg0: i32, %arg1: i32) -> (i32, i32) {
    %c0_i32 = arith.constant 0 : i32
    %c0_i32_0 = arith.constant 0 : i32
    return %c0_i32, %arg0 : i32, i32
  }
  func.func @transform_3(%arg0: i32, %arg1: i32) -> (i32, i32) {
    %c0_i32 = arith.constant 0 : i32
    %c0_i32_0 = arith.constant 0 : i32
    return %c0_i32, %arg0 : i32, i32
  }
  func.func @transform_4(%arg0: i32, %arg1: i32) -> (i32, i32) {
    %c0_i32 = arith.constant 0 : i32
    %c0_i32_0 = arith.constant 0 : i32
    return %c0_i32, %arg0 : i32, i32
  }
}

module attributes {stable_mosaic.version = 11 : i64} {
  func.func @_gemm_affine_relu_kernel(%arg0: i32, %arg1: i32, %arg2: memref<24x768xbf16, #tpu.memory_space<vmem>>, %arg3: memref<768x128xbf16, #tpu.memory_space<vmem>>, %arg4: memref<1x128xf32, #tpu.memory_space<vmem>>, %arg5: memref<1x128xf32, #tpu.memory_space<vmem>>, %arg6: memref<24x128xbf16, #tpu.memory_space<vmem>>, %arg7: memref<24x128xf32, #tpu.memory_space<vmem>>) attributes {dimension_semantics = [#tpu.dimension_semantics<parallel>, #tpu.dimension_semantics<arbitrary>], iteration_bounds = array<i64: 1, 3>, scalar_prefetch = 0 : i64, scratch_operands = 1 : i64, tpu.core_type = #tpu.core_type<tc>, window_params = [{transform_indices = @transform_0, window_bounds = array<i64: 24, 768>}, {transform_indices = @transform_1, window_bounds = array<i64: 768, 128>}, {transform_indices = @transform_2, window_bounds = array<i64: 1, 128>}, {transform_indices = @transform_3, window_bounds = array<i64: 1, 128>}, {transform_indices = @transform_4, window_bounds = array<i64: 24, 128>}]} {
    %c0_i32 = arith.constant 0 : i32
    %0 = arith.cmpi eq, %arg1, %c0_i32 : i32
    %1 = arith.extui %0 : i1 to i32
    %c0_i32_0 = arith.constant 0 : i32
    %2 = arith.cmpi ne, %1, %c0_i32_0 : i32
    scf.if %2 {
      %cst_9 = arith.constant 0.000000e+00 : f32
      %12 = vector.broadcast %cst_9 : f32 to vector<24x128xf32>
      %c0_10 = arith.constant 0 : index
      %c0_11 = arith.constant 0 : index
      %13 = vector.load %arg7[%c0_10, %c0_11] : memref<24x128xf32, #tpu.memory_space<vmem>>, vector<24x128xf32>
      tpu.vector_store %arg7[%c0_10, %c0_11], %12 {strides = array<i32>} : memref<24x128xf32, #tpu.memory_space<vmem>>, vector<24x128xf32>,
    } else {
    }
    %c0 = arith.constant 0 : index
    %c0_1 = arith.constant 0 : index
    %3 = vector.load %arg7[%c0, %c0_1] : memref<24x128xf32, #tpu.memory_space<vmem>>, vector<24x128xf32>
    %c0_2 = arith.constant 0 : index
    %c0_3 = arith.constant 0 : index
    %4 = vector.load %arg2[%c0_2, %c0_3] : memref<24x768xbf16, #tpu.memory_space<vmem>>, vector<24x768xbf16>
    %c0_4 = arith.constant 0 : index
    %c0_5 = arith.constant 0 : index
    %5 = vector.load %arg3[%c0_4, %c0_5] : memref<768x128xbf16, #tpu.memory_space<vmem>>, vector<768x128xbf16>
    %cst = arith.constant dense<0.000000e+00> : vector<24x128xf32>
    %6 = tpu.matmul %4, %5, %cst {dimension_numbers = #tpu.dot_dimension_numbers<[1], [0], [0], [1], [0, 0, 1, 1], [], []>} : vector<24x768xbf16>, vector<768x128xbf16>, vector<24x128xf32> -> vector<24x128xf32>
    %7 = arith.addf %3, %6 : vector<24x128xf32>
    %c0_6 = arith.constant 0 : index
    %c0_7 = arith.constant 0 : index
    %8 = vector.load %arg7[%c0_6, %c0_7] : memref<24x128xf32, #tpu.memory_space<vmem>>, vector<24x128xf32>
    tpu.vector_store %arg7[%c0_6, %c0_7], %7 {strides = array<i32>} : memref<24x128xf32, #tpu.memory_space<vmem>>, vector<24x128xf32>,
    %c2_i32 = arith.constant 2 : i32
    %9 = arith.cmpi eq, %arg1, %c2_i32 : i32
    %10 = arith.extui %9 : i1 to i32
    %c0_i32_8 = arith.constant 0 : i32
    %11 = arith.cmpi ne, %10, %c0_i32_8 : i32
    scf.if %11 {
      %c0_9 = arith.constant 0 : index
      %c0_10 = arith.constant 0 : index
      %12 = vector.load %arg7[%c0_9, %c0_10] : memref<24x128xf32, #tpu.memory_space<vmem>>, vector<24x128xf32>
      %c0_11 = arith.constant 0 : index
      %c0_12 = arith.constant 0 : index
      %13 = vector.load %arg4[%c0_11, %c0_12] : memref<1x128xf32, #tpu.memory_space<vmem>>, vector<1x128xf32>
      %14 = vector.broadcast %13 : vector<1x128xf32> to vector<24x128xf32>
      %15 = arith.mulf %12, %14 : vector<24x128xf32>
      %c0_13 = arith.constant 0 : index
      %c0_14 = arith.constant 0 : index
      %16 = vector.load %arg5[%c0_13, %c0_14] : memref<1x128xf32, #tpu.memory_space<vmem>>, vector<1x128xf32>
      %17 = vector.broadcast %16 : vector<1x128xf32> to vector<24x128xf32>
      %18 = arith.addf %15, %17 : vector<24x128xf32>
      %cst_15 = arith.constant 0.000000e+00 : f32
      %19 = vector.broadcast %cst_15 : f32 to vector<24x128xf32>
      %20 = arith.maximumf %18, %19 : vector<24x128xf32>
      %21 = arith.truncf %20 : vector<24x128xf32> to vector<24x128xbf16>
      %c0_16 = arith.constant 0 : index
      %c0_17 = arith.constant 0 : index
      %22 = vector.load %arg6[%c0_16, %c0_17] : memref<24x128xbf16, #tpu.memory_space<vmem>>, vector<24x128xbf16>
      tpu.vector_store %arg6[%c0_16, %c0_17], %21 {strides = array<i32>} : memref<24x128xbf16, #tpu.memory_space<vmem>>, vector<24x128xbf16>,
    } else {
    }
    return
  }
  func.func @transform_0(%arg0: i32, %arg1: i32) -> (i32, i32) {
    %c0_i32 = arith.constant 0 : i32
    %c0_i32_0 = arith.constant 0 : i32
    return %c0_i32, %arg1 : i32, i32
  }
  func.func @transform_1(%arg0: i32, %arg1: i32) -> (i32, i32) {
    %c0_i32 = arith.constant 0 : i32
    return %arg1, %arg0 : i32, i32
  }
  func.func @transform_2(%arg0: i32, %arg1: i32) -> (i32, i32) {
    %c0_i32 = arith.constant 0 : i32
    %c0_i32_0 = arith.constant 0 : i32
    return %c0_i32, %arg0 : i32, i32
  }
  func.func @transform_3(%arg0: i32, %arg1: i32) -> (i32, i32) {
    %c0_i32 = arith.constant 0 : i32
    %c0_i32_0 = arith.constant 0 : i32
    return %c0_i32, %arg0 : i32, i32
  }
  func.func @transform_4(%arg0: i32, %arg1: i32) -> (i32, i32) {
    %c0_i32 = arith.constant 0 : i32
    %c0_i32_0 = arith.constant 0 : i32
    return %c0_i32, %arg0 : i32, i32
  }
}

module attributes {stable_mosaic.version = 11 : i64} {
  func.func @_gemm_affine_relu_kernel(%arg0: i32, %arg1: i32, %arg2: memref<24x384xbf16, #tpu.memory_space<vmem>>, %arg3: memref<384x64xbf16, #tpu.memory_space<vmem>>, %arg4: memref<1x64xf32, #tpu.memory_space<vmem>>, %arg5: memref<1x64xf32, #tpu.memory_space<vmem>>, %arg6: memref<24x64xbf16, #tpu.memory_space<vmem>>, %arg7: memref<24x64xf32, #tpu.memory_space<vmem>>) attributes {dimension_semantics = [#tpu.dimension_semantics<parallel>, #tpu.dimension_semantics<arbitrary>], iteration_bounds = array<i64: 1, 3>, scalar_prefetch = 0 : i64, scratch_operands = 1 : i64, tpu.core_type = #tpu.core_type<tc>, window_params = [{transform_indices = @transform_0, window_bounds = array<i64: 24, 384>}, {transform_indices = @transform_1, window_bounds = array<i64: 384, 64>}, {transform_indices = @transform_2, window_bounds = array<i64: 1, 64>}, {transform_indices = @transform_3, window_bounds = array<i64: 1, 64>}, {transform_indices = @transform_4, window_bounds = array<i64: 24, 64>}]} {
    %c0_i32 = arith.constant 0 : i32
    %0 = arith.cmpi eq, %arg1, %c0_i32 : i32
    %1 = arith.extui %0 : i1 to i32
    %c0_i32_0 = arith.constant 0 : i32
    %2 = arith.cmpi ne, %1, %c0_i32_0 : i32
    scf.if %2 {
      %cst_9 = arith.constant 0.000000e+00 : f32
      %12 = vector.broadcast %cst_9 : f32 to vector<24x64xf32>
      %c0_10 = arith.constant 0 : index
      %c0_11 = arith.constant 0 : index
      %13 = vector.load %arg7[%c0_10, %c0_11] : memref<24x64xf32, #tpu.memory_space<vmem>>, vector<24x64xf32>
      tpu.vector_store %arg7[%c0_10, %c0_11], %12 {strides = array<i32>} : memref<24x64xf32, #tpu.memory_space<vmem>>, vector<24x64xf32>,
    } else {
    }
    %c0 = arith.constant 0 : index
    %c0_1 = arith.constant 0 : index
    %3 = vector.load %arg7[%c0, %c0_1] : memref<24x64xf32, #tpu.memory_space<vmem>>, vector<24x64xf32>
    %c0_2 = arith.constant 0 : index
    %c0_3 = arith.constant 0 : index
    %4 = vector.load %arg2[%c0_2, %c0_3] : memref<24x384xbf16, #tpu.memory_space<vmem>>, vector<24x384xbf16>
    %c0_4 = arith.constant 0 : index
    %c0_5 = arith.constant 0 : index
    %5 = vector.load %arg3[%c0_4, %c0_5] : memref<384x64xbf16, #tpu.memory_space<vmem>>, vector<384x64xbf16>
    %cst = arith.constant dense<0.000000e+00> : vector<24x64xf32>
    %6 = tpu.matmul %4, %5, %cst {dimension_numbers = #tpu.dot_dimension_numbers<[1], [0], [0], [1], [0, 0, 1, 1], [], []>} : vector<24x384xbf16>, vector<384x64xbf16>, vector<24x64xf32> -> vector<24x64xf32>
    %7 = arith.addf %3, %6 : vector<24x64xf32>
    %c0_6 = arith.constant 0 : index
    %c0_7 = arith.constant 0 : index
    %8 = vector.load %arg7[%c0_6, %c0_7] : memref<24x64xf32, #tpu.memory_space<vmem>>, vector<24x64xf32>
    tpu.vector_store %arg7[%c0_6, %c0_7], %7 {strides = array<i32>} : memref<24x64xf32, #tpu.memory_space<vmem>>, vector<24x64xf32>,
    %c2_i32 = arith.constant 2 : i32
    %9 = arith.cmpi eq, %arg1, %c2_i32 : i32
    %10 = arith.extui %9 : i1 to i32
    %c0_i32_8 = arith.constant 0 : i32
    %11 = arith.cmpi ne, %10, %c0_i32_8 : i32
    scf.if %11 {
      %c0_9 = arith.constant 0 : index
      %c0_10 = arith.constant 0 : index
      %12 = vector.load %arg7[%c0_9, %c0_10] : memref<24x64xf32, #tpu.memory_space<vmem>>, vector<24x64xf32>
      %c0_11 = arith.constant 0 : index
      %c0_12 = arith.constant 0 : index
      %13 = vector.load %arg4[%c0_11, %c0_12] : memref<1x64xf32, #tpu.memory_space<vmem>>, vector<1x64xf32>
      %14 = vector.broadcast %13 : vector<1x64xf32> to vector<24x64xf32>
      %15 = arith.mulf %12, %14 : vector<24x64xf32>
      %c0_13 = arith.constant 0 : index
      %c0_14 = arith.constant 0 : index
      %16 = vector.load %arg5[%c0_13, %c0_14] : memref<1x64xf32, #tpu.memory_space<vmem>>, vector<1x64xf32>
      %17 = vector.broadcast %16 : vector<1x64xf32> to vector<24x64xf32>
      %18 = arith.addf %15, %17 : vector<24x64xf32>
      %cst_15 = arith.constant 0.000000e+00 : f32
      %19 = vector.broadcast %cst_15 : f32 to vector<24x64xf32>
      %20 = arith.maximumf %18, %19 : vector<24x64xf32>
      %21 = arith.truncf %20 : vector<24x64xf32> to vector<24x64xbf16>
      %c0_16 = arith.constant 0 : index
      %c0_17 = arith.constant 0 : index
      %22 = vector.load %arg6[%c0_16, %c0_17] : memref<24x64xbf16, #tpu.memory_space<vmem>>, vector<24x64xbf16>
      tpu.vector_store %arg6[%c0_16, %c0_17], %21 {strides = array<i32>} : memref<24x64xbf16, #tpu.memory_space<vmem>>, vector<24x64xbf16>,
    } else {
    }
    return
  }
  func.func @transform_0(%arg0: i32, %arg1: i32) -> (i32, i32) {
    %c0_i32 = arith.constant 0 : i32
    %c0_i32_0 = arith.constant 0 : i32
    return %c0_i32, %arg1 : i32, i32
  }
  func.func @transform_1(%arg0: i32, %arg1: i32) -> (i32, i32) {
    %c0_i32 = arith.constant 0 : i32
    return %arg1, %arg0 : i32, i32
  }
  func.func @transform_2(%arg0: i32, %arg1: i32) -> (i32, i32) {
    %c0_i32 = arith.constant 0 : i32
    %c0_i32_0 = arith.constant 0 : i32
    return %c0_i32, %arg0 : i32, i32
  }
  func.func @transform_3(%arg0: i32, %arg1: i32) -> (i32, i32) {
    %c0_i32 = arith.constant 0 : i32
    %c0_i32_0 = arith.constant 0 : i32
    return %c0_i32, %arg0 : i32, i32
  }
  func.func @transform_4(%arg0: i32, %arg1: i32) -> (i32, i32) {
    %c0_i32 = arith.constant 0 : i32
    %c0_i32_0 = arith.constant 0 : i32
    return %c0_i32, %arg0 : i32, i32
  }
}

module attributes {stable_mosaic.version = 11 : i64} {
  func.func @_gemm_bias_tanh_kernel(%arg0: i32, %arg1: i32, %arg2: memref<2x768xbf16, #tpu.memory_space<vmem>>, %arg3: memref<768x128xbf16, #tpu.memory_space<vmem>>, %arg4: memref<1x128xf32, #tpu.memory_space<vmem>>, %arg5: memref<2x128xf32, #tpu.memory_space<vmem>>, %arg6: memref<2x128xf32, #tpu.memory_space<vmem>>) attributes {dimension_semantics = [#tpu.dimension_semantics<parallel>, #tpu.dimension_semantics<arbitrary>], iteration_bounds = array<i64: 1, 1>, scalar_prefetch = 0 : i64, scratch_operands = 1 : i64, tpu.core_type = #tpu.core_type<tc>, window_params = [{transform_indices = @transform_0, window_bounds = array<i64: 2, 768>}, {transform_indices = @transform_1, window_bounds = array<i64: 768, 128>}, {transform_indices = @transform_2, window_bounds = array<i64: 1, 128>}, {transform_indices = @transform_3, window_bounds = array<i64: 2, 128>}]} {
    %c0_i32 = arith.constant 0 : i32
    %0 = arith.cmpi eq, %arg1, %c0_i32 : i32
    %1 = arith.extui %0 : i1 to i32
    %c0_i32_0 = arith.constant 0 : i32
    %2 = arith.cmpi ne, %1, %c0_i32_0 : i32
    scf.if %2 {
      %cst_10 = arith.constant 0.000000e+00 : f32
      %12 = vector.broadcast %cst_10 : f32 to vector<2x128xf32>
      %c0_11 = arith.constant 0 : index
      %c0_12 = arith.constant 0 : index
      %13 = vector.load %arg6[%c0_11, %c0_12] : memref<2x128xf32, #tpu.memory_space<vmem>>, vector<2x128xf32>
      tpu.vector_store %arg6[%c0_11, %c0_12], %12 {strides = array<i32>} : memref<2x128xf32, #tpu.memory_space<vmem>>, vector<2x128xf32>,
    } else {
    }
    %c0 = arith.constant 0 : index
    %c0_1 = arith.constant 0 : index
    %3 = vector.load %arg6[%c0, %c0_1] : memref<2x128xf32, #tpu.memory_space<vmem>>, vector<2x128xf32>
    %c0_2 = arith.constant 0 : index
    %c0_3 = arith.constant 0 : index
    %4 = vector.load %arg2[%c0_2, %c0_3] : memref<2x768xbf16, #tpu.memory_space<vmem>>, vector<2x768xbf16>
    %c0_4 = arith.constant 0 : index
    %c0_5 = arith.constant 0 : index
    %5 = vector.load %arg3[%c0_4, %c0_5] : memref<768x128xbf16, #tpu.memory_space<vmem>>, vector<768x128xbf16>
    %cst = arith.constant dense<0.000000e+00> : vector<2x128xf32>
    %6 = tpu.matmul %4, %5, %cst {dimension_numbers = #tpu.dot_dimension_numbers<[1], [0], [0], [1], [0, 0, 1, 1], [], []>} : vector<2x768xbf16>, vector<768x128xbf16>, vector<2x128xf32> -> vector<2x128xf32>
    %7 = arith.addf %3, %6 : vector<2x128xf32>
    %c0_6 = arith.constant 0 : index
    %c0_7 = arith.constant 0 : index
    %8 = vector.load %arg6[%c0_6, %c0_7] : memref<2x128xf32, #tpu.memory_space<vmem>>, vector<2x128xf32>
    tpu.vector_store %arg6[%c0_6, %c0_7], %7 {strides = array<i32>} : memref<2x128xf32, #tpu.memory_space<vmem>>, vector<2x128xf32>,
    %c0_i32_8 = arith.constant 0 : i32
    %9 = arith.cmpi eq, %arg1, %c0_i32_8 : i32
    %10 = arith.extui %9 : i1 to i32
    %c0_i32_9 = arith.constant 0 : i32
    %11 = arith.cmpi ne, %10, %c0_i32_9 : i32
    scf.if %11 {
      %c0_10 = arith.constant 0 : index
      %c0_11 = arith.constant 0 : index
      %12 = vector.load %arg6[%c0_10, %c0_11] : memref<2x128xf32, #tpu.memory_space<vmem>>, vector<2x128xf32>
      %c0_12 = arith.constant 0 : index
      %c0_13 = arith.constant 0 : index
      %13 = vector.load %arg4[%c0_12, %c0_13] : memref<1x128xf32, #tpu.memory_space<vmem>>, vector<1x128xf32>
      %14 = vector.broadcast %13 : vector<1x128xf32> to vector<2x128xf32>
      %15 = arith.addf %12, %14 : vector<2x128xf32>
      %16 = math.tanh %15 : vector<2x128xf32>
      %c0_14 = arith.constant 0 : index
      %c0_15 = arith.constant 0 : index
      %17 = vector.load %arg5[%c0_14, %c0_15] : memref<2x128xf32, #tpu.memory_space<vmem>>, vector<2x128xf32>
      tpu.vector_store %arg5[%c0_14, %c0_15], %16 {strides = array<i32>} : memref<2x128xf32, #tpu.memory_space<vmem>>, vector<2x128xf32>,
    } else {
    }
    return
  }
  func.func @transform_0(%arg0: i32, %arg1: i32) -> (i32, i32) {
    %c0_i32 = arith.constant 0 : i32
    %c0_i32_0 = arith.constant 0 : i32
    return %c0_i32, %arg1 : i32, i32
  }
  func.func @transform_1(%arg0: i32, %arg1: i32) -> (i32, i32) {
    %c0_i32 = arith.constant 0 : i32
    return %arg1, %arg0 : i32, i32
  }
  func.func @transform_2(%arg0: i32, %arg1: i32) -> (i32, i32) {
    %c0_i32 = arith.constant 0 : i32
    %c0_i32_0 = arith.constant 0 : i32
    return %c0_i32, %arg0 : i32, i32
  }
  func.func @transform_3(%arg0: i32, %arg1: i32) -> (i32, i32) {
    %c0_i32 = arith.constant 0 : i32
    %c0_i32_0 = arith.constant 0 : i32
    return %c0_i32, %arg0 : i32, i32
  }
}

</mosaic_0001>

<bundles_post_ra>
// kernel: feature_regression_forward.5
= control target key start
LH: loop header
LB: loop body
LE: loop exit
PB: predicated region body
PF: predicated region fallthrough
CT: control target
= control target key end

     0   :  { %9 = vsyncpa [#allocation5], 0  ;;  %s4288_s0 = inlined_call_operand.vmem [shape: bf16[96,1024], index: 0, kind: input, shape index: {}]   ;;  %s4289_s1 = inlined_call_operand.vmem [shape: bf16[1024,512], index: 1, kind: input, shape index: {}]   ;;  %s4290_s2 = inlined_call_operand.hbm [shape: f32[1,512], index: 2, kind: input, shape index: {}]   ;;  %s4291_s3 = inlined_call_operand.hbm [shape: f32[1,512], index: 3, kind: input, shape index: {}]   ;;  %s4292_s4 = inlined_call_operand.vmem [shape: bf16[96,512], index: 4, kind: output, shape index: {}]  }
   0x1   :  { %11 = vsyncpa [#allocation5 + $0x1], 0 }
   0x2   :  { %12 = vsyncpa [#allocation7], 0 }
   0x3   :  { %14 = vsyncpa [#allocation7 + $0x1], 0  ;;  %s3487_s15 = smov 0   ;;  %s3489_s16 = smov 0  }
   0x4   :  { %s3491_s17 = smov 0   ;;  %s3493_s18 = smov 0  }
   0x5   :  { %s3495_s19 = smov 0   ;;  %s3497_s20 = smov 0  }
   0x6 LB: > { %s2805_s21 = sadd.s32 4294967295, %s3458_s20   ;;  %s32_s22 = sadd.s32 1, %s3454_s19  ;;  %s3458_s20 = sphi %s3497_s20, %s20_s20   ;;  %s3454_s19 = sphi %s3495_s19, %s4303_s19   ;;  %s3450_s18 = sphi %s3493_s18, %s4302_s18   ;;  %s3446_s17 = sphi %s3491_s17, %s4301_s17   ;;  %s3442_s16 = sphi %s3489_s16, %s4300_s16   ;;  %s3438_s15 = sphi %s3487_s15, %s4299_s15  }
   0x7   : > { %p34_p0 = scmp.ge.s32.totalorder %s32_s22, 2  ;;  %s67_s23 = sadd.s32 1, %s3446_s17 }
   0x8   : > { %p74_p1 = scmp.ne.s32.totalorder %s3446_s17, %s3442_s16  ;;  %p75_p2 = scmp.eq.s32.totalorder %s3458_s20, 0 }
   0x9   : > { %s4305_s22 = smov (%p34_p0, %s32_s22), 0  ;;  %p106_p4 = scmp.ne.s32.totalorder %s3442_s16, %s3438_s15 }
   0xa   : > { %p3523_p3 = por %p75_p2, %p74_p1  ;;  %s63_s25 = ssub.s32 %s3454_s19, %s4305_s22 }
   0xb   : > { %p107_p5 = scmp.eq.s32.totalorder %s2805_s21, 0  ;;  %p65_p6 = scmp.eq.s32.totalorder %s63_s25, 0 }
   0xc   : > { %p156_p7 = scmp.eq.s32.totalorder %s2805_s21, 1  ;;  %p2809_p10 = scmp.ge.s32.totalorder %s3458_s20, 2 }
   0xd   : > { %p3530_p8 = por %p107_p5, %p106_p4 }
   0xe   : > { %s3535_s27 = scalar_select %p65_p6, %s3446_s17, %s67_s23  }
   0xf   : > { %s4295_s26 = scalar_select %p3530_p8, 1, 0 }
  0x10   : > { %p3537_p9 = por %p156_p7, %p74_p1  ;;  %187 = sbr.rel (%p2809_p10) target bundleno = 140 (0x8c), region = 20 }
  0x12   : > { %s4296_s28 = scalar_select %p3537_p9, 1, 0 }
  0x17   : > { %190 = sbr.rel (!%p3523_p3) target bundleno = 91 (0x5b), region = 24  ;;  %s192_s29 = sand.u32 (%p3523_p3), 1, %s3446_s17  }
  0x18   : > { %s3015_s30 = sshll.u32 (%p3523_p3), %s3454_s19, 3  ;;  %s2810_s5 = sshll.u32 (%p3523_p3), %s192_s29, 10 }
  0x19   : > { %s3549_s8 = scalar_lea.vmem (%p3523_p3), %s4289_s1, %s3015_s30  ;;  %s3554_s9 = scalar_lea.vmem (%p3523_p3), [#allocation3], %s2810_s5 }
  0x1a   : > { %v482_v0 = vld [vmem:[%s3549_s8] sm:$0xff] (%p3523_p3)  ;;  %v484_v1 = vld [vmem:[%s3549_s8 + $0x10] sm:$0xff] (%p3523_p3) }
  0x1b   : > { %v486_v2 = vld [vmem:[%s3549_s8 + $0x20] sm:$0xff] (%p3523_p3)  ;;  %483 = vst [vmem:[%s3554_s9] sm:$0xff] (%p3523_p3), %v482_v0  ;;  %485 = vst [vmem:[%s3554_s9 + $0x8] sm:$0xff] (%p3523_p3), %v484_v1  ;;  %v488_v3 = vld [vmem:[%s3549_s8 + $0x30] sm:$0xff] (%p3523_p3) }
  0x1c   : > { %487 = vst [vmem:[%s3554_s9 + $0x10] sm:$0xff] (%p3523_p3), %v486_v2  ;;  %v490_v4 = vld [vmem:[%s3549_s8 + $0x40] sm:$0xff] (%p3523_p3)  ;;  %v492_v5 = vld [vmem:[%s3549_s8 + $0x50] sm:$0xff] (%p3523_p3)  ;;  %489 = vst [vmem:[%s3554_s9 + $0x18] sm:$0xff] (%p3523_p3), %v488_v3 }
  0x1d   : > { %491 = vst [vmem:[%s3554_s9 + $0x20] sm:$0xff] (%p3523_p3), %v490_v4  ;;  %493 = vst [vmem:[%s3554_s9 + $0x28] sm:$0xff] (%p3523_p3), %v492_v5  ;;  %v494_v6 = vld [vmem:[%s3549_s8 + $0x60] sm:$0xff] (%p3523_p3)  ;;  %v496_v7 = vld [vmem:[%s3549_s8 + $0x70] sm:$0xff] (%p3523_p3) }
  0x1e   : > { %v498_v8 = vld [vmem:[%s3549_s8 + $0x80] sm:$0xff]  ;;  %495 = vst [vmem:[%s3554_s9 + $0x30] sm:$0xff] %v494_v6  ;;  %497 = vst [vmem:[%s3554_s9 + $0x38] sm:$0xff] %v496_v7  ;;  %v500_v9 = vld [vmem:[%s3549_s8 + $0x90] sm:$0xff] }
  0x1f   : > { %499 = vst [vmem:[%s3554_s9 + $0x40] sm:$0xff] %v498_v8  ;;  %v502_v10 = vld [vmem:[%s3549_s8 + $0xa0] sm:$0xff]  ;;  %v504_v11 = vld [vmem:[%s3549_s8 + $0xb0] sm:$0xff]  ;;  %501 = vst [vmem:[%s3554_s9 + $0x48] sm:$0xff] %v500_v9 }
  0x20   : > { %503 = vst [vmem:[%s3554_s9 + $0x50] sm:$0xff] %v502_v10  ;;  %505 = vst [vmem:[%s3554_s9 + $0x58] sm:$0xff] %v504_v11  ;;  %v506_v12 = vld [vmem:[%s3549_s8 + $0xc0] sm:$0xff]  ;;  %v508_v13 = vld [vmem:[%s3549_s8 + $0xd0] sm:$0xff] }
  0x21   : > { %v510_v14 = vld [vmem:[%s3549_s8 + $0xe0] sm:$0xff]  ;;  %507 = vst [vmem:[%s3554_s9 + $0x60] sm:$0xff] %v506_v12  ;;  %509 = vst [vmem:[%s3554_s9 + $0x68] sm:$0xff] %v508_v13  ;;  %v512_v15 = vld [vmem:[%s3549_s8 + $0xf0] sm:$0xff] }
  0x22   : > { %511 = vst [vmem:[%s3554_s9 + $0x70] sm:$0xff] %v510_v14  ;;  %v514_v16 = vld [vmem:[%s3549_s8 + $0x100] sm:$0xff]  ;;  %v516_v17 = vld [vmem:[%s3549_s8 + $0x110] sm:$0xff]  ;;  %513 = vst [vmem:[%s3554_s9 + $0x78] sm:$0xff] %v512_v15 }
  0x23   : > { %515 = vst [vmem:[%s3554_s9 + $0x80] sm:$0xff] %v514_v16  ;;  %517 = vst [vmem:[%s3554_s9 + $0x88] sm:$0xff] %v516_v17  ;;  %v518_v18 = vld [vmem:[%s3549_s8 + $0x120] sm:$0xff]  ;;  %v520_v19 = vld [vmem:[%s3549_s8 + $0x130] sm:$0xff] }
  0x24   : > { %v522_v20 = vld [vmem:[%s3549_s8 + $0x140] sm:$0xff]  ;;  %519 = vst [vmem:[%s3554_s9 + $0x90] sm:$0xff] %v518_v18  ;;  %521 = vst [vmem:[%s3554_s9 + $0x98] sm:$0xff] %v520_v19  ;;  %v524_v21 = vld [vmem:[%s3549_s8 + $0x150] sm:$0xff] }
  0x25   : > { %523 = vst [vmem:[%s3554_s9 + $0xa0] sm:$0xff] %v522_v20  ;;  %v526_v22 = vld [vmem:[%s3549_s8 + $0x160] sm:$0xff]  ;;  %v528_v23 = vld [vmem:[%s3549_s8 + $0x170] sm:$0xff]  ;;  %525 = vst [vmem:[%s3554_s9 + $0xa8] sm:$0xff] %v524_v21 }
  0x26   : > { %527 = vst [vmem:[%s3554_s9 + $0xb0] sm:$0xff] %v526_v22  ;;  %529 = vst [vmem:[%s3554_s9 + $0xb8] sm:$0xff] %v528_v23  ;;  %v530_v24 = vld [vmem:[%s3549_s8 + $0x180] sm:$0xff]  ;;  %v532_v25 = vld [vmem:[%s3549_s8 + $0x190] sm:$0xff] }
  0x27   : > { %v534_v26 = vld [vmem:[%s3549_s8 + $0x1a0] sm:$0xff]  ;;  %531 = vst [vmem:[%s3554_s9 + $0xc0] sm:$0xff] %v530_v24  ;;  %533 = vst [vmem:[%s3554_s9 + $0xc8] sm:$0xff] %v532_v25  ;;  %v536_v27 = vld [vmem:[%s3549_s8 + $0x1b0] sm:$0xff] }
  0x28   : > { %535 = vst [vmem:[%s3554_s9 + $0xd0] sm:$0xff] %v534_v26  ;;  %v538_v28 = vld [vmem:[%s3549_s8 + $0x1c0] sm:$0xff]  ;;  %v540_v29 = vld [vmem:[%s3549_s8 + $0x1d0] sm:$0xff]  ;;  %537 = vst [vmem:[%s3554_s9 + $0xd8] sm:$0xff] %v536_v27 }
  0x29   : > { %539 = vst [vmem:[%s3554_s9 + $0xe0] sm:$0xff] %v538_v28  ;;  %541 = vst [vmem:[%s3554_s9 + $0xe8] sm:$0xff] %v540_v29  ;;  %v542_v30 = vld [vmem:[%s3549_s8 + $0x1e0] sm:$0xff]  ;;  %v544_v31 = vld [vmem:[%s3549_s8 + $0x1f0] sm:$0xff] }
  0x2a   : > { %v546_v32 = vld [vmem:[%s3549_s8 + $0x200] sm:$0xff]  ;;  %543 = vst [vmem:[%s3554_s9 + $0xf0] sm:$0xff] %v542_v30  ;;  %545 = vst [vmem:[%s3554_s9 + $0xf8] sm:$0xff] %v544_v31  ;;  %v548_v33 = vld [vmem:[%s3549_s8 + $0x210] sm:$0xff] }
  0x2b   : > { %547 = vst [vmem:[%s3554_s9 + $0x100] sm:$0xff] %v546_v32  ;;  %v550_v34 = vld [vmem:[%s3549_s8 + $0x220] sm:$0xff]  ;;  %v552_v35 = vld [vmem:[%s3549_s8 + $0x230] sm:$0xff]  ;;  %549 = vst [vmem:[%s3554_s9 + $0x108] sm:$0xff] %v548_v33 }
  0x2c   : > { %551 = vst [vmem:[%s3554_s9 + $0x110] sm:$0xff] %v550_v34  ;;  %553 = vst [vmem:[%s3554_s9 + $0x118] sm:$0xff] %v552_v35  ;;  %v554_v36 = vld [vmem:[%s3549_s8 + $0x240] sm:$0xff]  ;;  %v556_v37 = vld [vmem:[%s3549_s8 + $0x250] sm:$0xff] }
  0x2d   : > { %v558_v38 = vld [vmem:[%s3549_s8 + $0x260] sm:$0xff]  ;;  %555 = vst [vmem:[%s3554_s9 + $0x120] sm:$0xff] %v554_v36  ;;  %557 = vst [vmem:[%s3554_s9 + $0x128] sm:$0xff] %v556_v37  ;;  %v560_v39 = vld [vmem:[%s3549_s8 + $0x270] sm:$0xff] }
  0x2e   : > { %559 = vst [vmem:[%s3554_s9 + $0x130] sm:$0xff] %v558_v38  ;;  %v562_v40 = vld [vmem:[%s3549_s8 + $0x280] sm:$0xff]  ;;  %v564_v41 = vld [vmem:[%s3549_s8 + $0x290] sm:$0xff]  ;;  %561 = vst [vmem:[%s3554_s9 + $0x138] sm:$0xff] %v560_v39 }
  0x2f   : > { %563 = vst [vmem:[%s3554_s9 + $0x140] sm:$0xff] %v562_v40  ;;  %565 = vst [vmem:[%s3554_s9 + $0x148] sm:$0xff] %v564_v41  ;;  %v566_v42 = vld [vmem:[%s3549_s8 + $0x2a0] sm:$0xff]  ;;  %v568_v43 = vld [vmem:[%s3549_s8 + $0x2b0] sm:$0xff] }
  0x30   : > { %v570_v44 = vld [vmem:[%s3549_s8 + $0x2c0] sm:$0xff]  ;;  %567 = vst [vmem:[%s3554_s9 + $0x150] sm:$0xff] %v566_v42  ;;  %569 = vst [vmem:[%s3554_s9 + $0x158] sm:$0xff] %v568_v43  ;;  %v572_v45 = vld [vmem:[%s3549_s8 + $0x2d0] sm:$0xff] }
  0x31   : > { %571 = vst [vmem:[%s3554_s9 + $0x160] sm:$0xff] %v570_v44  ;;  %v574_v46 = vld [vmem:[%s3549_s8 + $0x2e0] sm:$0xff]  ;;  %v576_v47 = vld [vmem:[%s3549_s8 + $0x2f0] sm:$0xff]  ;;  %573 = vst [vmem:[%s3554_s9 + $0x168] sm:$0xff] %v572_v45 }
  0x32   : > { %575 = vst [vmem:[%s3554_s9 + $0x170] sm:$0xff] %v574_v46  ;;  %577 = vst [vmem:[%s3554_s9 + $0x178] sm:$0xff] %v576_v47  ;;  %v578_v48 = vld [vmem:[%s3549_s8 + $0x300] sm:$0xff]  ;;  %v580_v49 = vld [vmem:[%s3549_s8 + $0x310] sm:$0xff] }
  0x33   : > { %v582_v50 = vld [vmem:[%s3549_s8 + $0x320] sm:$0xff]  ;;  %579 = vst [vmem:[%s3554_s9 + $0x180] sm:$0xff] %v578_v48  ;;  %581 = vst [vmem:[%s3554_s9 + $0x188] sm:$0xff] %v580_v49  ;;  %v584_v51 = vld [vmem:[%s3549_s8 + $0x330] sm:$0xff] }
  0x34   : > { %583 = vst [vmem:[%s3554_s9 + $0x190] sm:$0xff] %v582_v50  ;;  %v586_v52 = vld [vmem:[%s3549_s8 + $0x340] sm:$0xff]  ;;  %v588_v53 = vld [vmem:[%s3549_s8 + $0x350] sm:$0xff]  ;;  %585 = vst [vmem:[%s3554_s9 + $0x198] sm:$0xff] %v584_v51 }
  0x35   : > { %587 = vst [vmem:[%s3554_s9 + $0x1a0] sm:$0xff] %v586_v52  ;;  %589 = vst [vmem:[%s3554_s9 + $0x1a8] sm:$0xff] %v588_v53  ;;  %v590_v54 = vld [vmem:[%s3549_s8 + $0x360] sm:$0xff]  ;;  %v592_v55 = vld [vmem:[%s3549_s8 + $0x370] sm:$0xff] }
  0x36   : > { %v594_v56 = vld [vmem:[%s3549_s8 + $0x380] sm:$0xff]  ;;  %591 = vst [vmem:[%s3554_s9 + $0x1b0] sm:$0xff] %v590_v54  ;;  %593 = vst [vmem:[%s3554_s9 + $0x1b8] sm:$0xff] %v592_v55  ;;  %v596_v57 = vld [vmem:[%s3549_s8 + $0x390] sm:$0xff] }
  0x37   : > { %595 = vst [vmem:[%s3554_s9 + $0x1c0] sm:$0xff] %v594_v56  ;;  %v598_v58 = vld [vmem:[%s3549_s8 + $0x3a0] sm:$0xff]  ;;  %v600_v59 = vld [vmem:[%s3549_s8 + $0x3b0] sm:$0xff]  ;;  %597 = vst [vmem:[%s3554_s9 + $0x1c8] sm:$0xff] %v596_v57 }
  0x38   : > { %599 = vst [vmem:[%s3554_s9 + $0x1d0] sm:$0xff] %v598_v58  ;;  %601 = vst [vmem:[%s3554_s9 + $0x1d8] sm:$0xff] %v600_v59  ;;  %v602_v60 = vld [vmem:[%s3549_s8 + $0x3c0] sm:$0xff]  ;;  %v604_v61 = vld [vmem:[%s3549_s8 + $0x3d0] sm:$0xff] }
  0x39   : > { %v606_v62 = vld [vmem:[%s3549_s8 + $0x3e0] sm:$0xff]  ;;  %603 = vst [vmem:[%s3554_s9 + $0x1e0] sm:$0xff] %v602_v60  ;;  %605 = vst [vmem:[%s3554_s9 + $0x1e8] sm:$0xff] %v604_v61  ;;  %v608_v63 = vld [vmem:[%s3549_s8 + $0x3f0] sm:$0xff] }
  0x3a   : > { %607 = vst [vmem:[%s3554_s9 + $0x1f0] sm:$0xff] %v606_v62  ;;  %v610_v0 = vld [vmem:[%s3549_s8 + $0x400] sm:$0xff]  ;;  %v612_v1 = vld [vmem:[%s3549_s8 + $0x410] sm:$0xff]  ;;  %609 = vst [vmem:[%s3554_s9 + $0x1f8] sm:$0xff] %v608_v63 }
  0x3b   : > { %611 = vst [vmem:[%s3554_s9 + $0x200] sm:$0xff] %v610_v0  ;;  %613 = vst [vmem:[%s3554_s9 + $0x208] sm:$0xff] %v612_v1  ;;  %v614_v2 = vld [vmem:[%s3549_s8 + $0x420] sm:$0xff]  ;;  %v616_v3 = vld [vmem:[%s3549_s8 + $0x430] sm:$0xff] }
  0x3c   : > { %v618_v4 = vld [vmem:[%s3549_s8 + $0x440] sm:$0xff]  ;;  %615 = vst [vmem:[%s3554_s9 + $0x210] sm:$0xff] %v614_v2  ;;  %617 = vst [vmem:[%s3554_s9 + $0x218] sm:$0xff] %v616_v3  ;;  %v620_v5 = vld [vmem:[%s3549_s8 + $0x450] sm:$0xff] }
  0x3d   : > { %619 = vst [vmem:[%s3554_s9 + $0x220] sm:$0xff] %v618_v4  ;;  %v622_v6 = vld [vmem:[%s3549_s8 + $0x460] sm:$0xff]  ;;  %v624_v7 = vld [vmem:[%s3549_s8 + $0x470] sm:$0xff]  ;;  %621 = vst [vmem:[%s3554_s9 + $0x228] sm:$0xff] %v620_v5 }
  0x3e   : > { %623 = vst [vmem:[%s3554_s9 + $0x230] sm:$0xff] %v622_v6  ;;  %625 = vst [vmem:[%s3554_s9 + $0x238] sm:$0xff] %v624_v7  ;;  %v626_v8 = vld [vmem:[%s3549_s8 + $0x480] sm:$0xff]  ;;  %v628_v9 = vld [vmem:[%s3549_s8 + $0x490] sm:$0xff] }
  0x3f   : > { %v630_v10 = vld [vmem:[%s3549_s8 + $0x4a0] sm:$0xff]  ;;  %627 = vst [vmem:[%s3554_s9 + $0x240] sm:$0xff] %v626_v8  ;;  %629 = vst [vmem:[%s3554_s9 + $0x248] sm:$0xff] %v628_v9  ;;  %v632_v11 = vld [vmem:[%s3549_s8 + $0x4b0] sm:$0xff] }
  0x40   : > { %631 = vst [vmem:[%s3554_s9 + $0x250] sm:$0xff] %v630_v10  ;;  %v634_v12 = vld [vmem:[%s3549_s8 + $0x4c0] sm:$0xff]  ;;  %v636_v13 = vld [vmem:[%s3549_s8 + $0x4d0] sm:$0xff]  ;;  %633 = vst [vmem:[%s3554_s9 + $0x258] sm:$0xff] %v632_v11 }
  0x41   : > { %635 = vst [vmem:[%s3554_s9 + $0x260] sm:$0xff] %v634_v12  ;;  %637 = vst [vmem:[%s3554_s9 + $0x268] sm:$0xff] %v636_v13  ;;  %v638_v14 = vld [vmem:[%s3549_s8 + $0x4e0] sm:$0xff]  ;;  %v640_v15 = vld [vmem:[%s3549_s8 + $0x4f0] sm:$0xff] }
  0x42   : > { %v642_v16 = vld [vmem:[%s3549_s8 + $0x500] sm:$0xff]  ;;  %639 = vst [vmem:[%s3554_s9 + $0x270] sm:$0xff] %v638_v14  ;;  %641 = vst [vmem:[%s3554_s9 + $0x278] sm:$0xff] %v640_v15  ;;  %v644_v17 = vld [vmem:[%s3549_s8 + $0x510] sm:$0xff] }
  0x43   : > { %643 = vst [vmem:[%s3554_s9 + $0x280] sm:$0xff] %v642_v16  ;;  %v646_v18 = vld [vmem:[%s3549_s8 + $0x520] sm:$0xff]  ;;  %v648_v19 = vld [vmem:[%s3549_s8 + $0x530] sm:$0xff]  ;;  %645 = vst [vmem:[%s3554_s9 + $0x288] sm:$0xff] %v644_v17 }
  0x44   : > { %647 = vst [vmem:[%s3554_s9 + $0x290] sm:$0xff] %v646_v18  ;;  %649 = vst [vmem:[%s3554_s9 + $0x298] sm:$0xff] %v648_v19  ;;  %v650_v20 = vld [vmem:[%s3549_s8 + $0x540] sm:$0xff]  ;;  %v652_v21 = vld [vmem:[%s3549_s8 + $0x550] sm:$0xff] }
  0x45   : > { %v654_v22 = vld [vmem:[%s3549_s8 + $0x560] sm:$0xff]  ;;  %651 = vst [vmem:[%s3554_s9 + $0x2a0] sm:$0xff] %v650_v20  ;;  %653 = vst [vmem:[%s3554_s9 + $0x2a8] sm:$0xff] %v652_v21  ;;  %v656_v23 = vld [vmem:[%s3549_s8 + $0x570] sm:$0xff] }
  0x46   : > { %655 = vst [vmem:[%s3554_s9 + $0x2b0] sm:$0xff] %v654_v22  ;;  %v658_v24 = vld [vmem:[%s3549_s8 + $0x580] sm:$0xff]  ;;  %v660_v25 = vld [vmem:[%s3549_s8 + $0x590] sm:$0xff]  ;;  %657 = vst [vmem:[%s3554_s9 + $0x2b8] sm:$0xff] %v656_v23 }
  0x47   : > { %659 = vst [vmem:[%s3554_s9 + $0x2c0] sm:$0xff] %v658_v24  ;;  %661 = vst [vmem:[%s3554_s9 + $0x2c8] sm:$0xff] %v660_v25  ;;  %v662_v26 = vld [vmem:[%s3549_s8 + $0x5a0] sm:$0xff]  ;;  %v664_v27 = vld [vmem:[%s3549_s8 + $0x5b0] sm:$0xff] }
  0x48   : > { %v666_v28 = vld [vmem:[%s3549_s8 + $0x5c0] sm:$0xff]  ;;  %663 = vst [vmem:[%s3554_s9 + $0x2d0] sm:$0xff] %v662_v26  ;;  %665 = vst [vmem:[%s3554_s9 + $0x2d8] sm:$0xff] %v664_v27  ;;  %v668_v29 = vld [vmem:[%s3549_s8 + $0x5d0] sm:$0xff] }
  0x49   : > { %667 = vst [vmem:[%s3554_s9 + $0x2e0] sm:$0xff] %v666_v28  ;;  %v670_v30 = vld [vmem:[%s3549_s8 + $0x5e0] sm:$0xff]  ;;  %v672_v31 = vld [vmem:[%s3549_s8 + $0x5f0] sm:$0xff]  ;;  %669 = vst [vmem:[%s3554_s9 + $0x2e8] sm:$0xff] %v668_v29 }
  0x4a   : > { %671 = vst [vmem:[%s3554_s9 + $0x2f0] sm:$0xff] %v670_v30  ;;  %673 = vst [vmem:[%s3554_s9 + $0x2f8] sm:$0xff] %v672_v31  ;;  %v674_v32 = vld [vmem:[%s3549_s8 + $0x600] sm:$0xff]  ;;  %v676_v33 = vld [vmem:[%s3549_s8 + $0x610] sm:$0xff] }
  0x4b   : > { %v678_v34 = vld [vmem:[%s3549_s8 + $0x620] sm:$0xff]  ;;  %675 = vst [vmem:[%s3554_s9 + $0x300] sm:$0xff] %v674_v32  ;;  %677 = vst [vmem:[%s3554_s9 + $0x308] sm:$0xff] %v676_v33  ;;  %v680_v35 = vld [vmem:[%s3549_s8 + $0x630] sm:$0xff] }
  0x4c   : > { %679 = vst [vmem:[%s3554_s9 + $0x310] sm:$0xff] %v678_v34  ;;  %v682_v36 = vld [vmem:[%s3549_s8 + $0x640] sm:$0xff]  ;;  %v684_v37 = vld [vmem:[%s3549_s8 + $0x650] sm:$0xff]  ;;  %681 = vst [vmem:[%s3554_s9 + $0x318] sm:$0xff] %v680_v35 }
  0x4d   : > { %683 = vst [vmem:[%s3554_s9 + $0x320] sm:$0xff] %v682_v36  ;;  %685 = vst [vmem:[%s3554_s9 + $0x328] sm:$0xff] %v684_v37  ;;  %v686_v38 = vld [vmem:[%s3549_s8 + $0x660] sm:$0xff]  ;;  %v688_v39 = vld [vmem:[%s3549_s8 + $0x670] sm:$0xff] }
  0x4e   : > { %v690_v40 = vld [vmem:[%s3549_s8 + $0x680] sm:$0xff]  ;;  %687 = vst [vmem:[%s3554_s9 + $0x330] sm:$0xff] %v686_v38  ;;  %689 = vst [vmem:[%s3554_s9 + $0x338] sm:$0xff] %v688_v39  ;;  %v692_v41 = vld [vmem:[%s3549_s8 + $0x690] sm:$0xff] }
  0x4f   : > { %691 = vst [vmem:[%s3554_s9 + $0x340] sm:$0xff] %v690_v40  ;;  %v694_v42 = vld [vmem:[%s3549_s8 + $0x6a0] sm:$0xff]  ;;  %v696_v43 = vld [vmem:[%s3549_s8 + $0x6b0] sm:$0xff]  ;;  %693 = vst [vmem:[%s3554_s9 + $0x348] sm:$0xff] %v692_v41 }
  0x50   : > { %695 = vst [vmem:[%s3554_s9 + $0x350] sm:$0xff] %v694_v42  ;;  %697 = vst [vmem:[%s3554_s9 + $0x358] sm:$0xff] %v696_v43  ;;  %v698_v44 = vld [vmem:[%s3549_s8 + $0x6c0] sm:$0xff]  ;;  %v700_v45 = vld [vmem:[%s3549_s8 + $0x6d0] sm:$0xff] }
  0x51   : > { %v702_v46 = vld [vmem:[%s3549_s8 + $0x6e0] sm:$0xff]  ;;  %699 = vst [vmem:[%s3554_s9 + $0x360] sm:$0xff] %v698_v44  ;;  %701 = vst [vmem:[%s3554_s9 + $0x368] sm:$0xff] %v700_v45  ;;  %v704_v47 = vld [vmem:[%s3549_s8 + $0x6f0] sm:$0xff] }
  0x52   : > { %703 = vst [vmem:[%s3554_s9 + $0x370] sm:$0xff] %v702_v46  ;;  %v706_v48 = vld [vmem:[%s3549_s8 + $0x700] sm:$0xff]  ;;  %v708_v49 = vld [vmem:[%s3549_s8 + $0x710] sm:$0xff]  ;;  %705 = vst [vmem:[%s3554_s9 + $0x378] sm:$0xff] %v704_v47 }
  0x53   : > { %707 = vst [vmem:[%s3554_s9 + $0x380] sm:$0xff] %v706_v48  ;;  %709 = vst [vmem:[%s3554_s9 + $0x388] sm:$0xff] %v708_v49  ;;  %v710_v50 = vld [vmem:[%s3549_s8 + $0x720] sm:$0xff]  ;;  %v712_v51 = vld [vmem:[%s3549_s8 + $0x730] sm:$0xff] }
  0x54   : > { %v714_v52 = vld [vmem:[%s3549_s8 + $0x740] sm:$0xff]  ;;  %711 = vst [vmem:[%s3554_s9 + $0x390] sm:$0xff] %v710_v50  ;;  %713 = vst [vmem:[%s3554_s9 + $0x398] sm:$0xff] %v712_v51  ;;  %v716_v53 = vld [vmem:[%s3549_s8 + $0x750] sm:$0xff] }
  0x55   : > { %715 = vst [vmem:[%s3554_s9 + $0x3a0] sm:$0xff] %v714_v52  ;;  %v718_v54 = vld [vmem:[%s3549_s8 + $0x760] sm:$0xff]  ;;  %v720_v55 = vld [vmem:[%s3549_s8 + $0x770] sm:$0xff]  ;;  %717 = vst [vmem:[%s3554_s9 + $0x3a8] sm:$0xff] %v716_v53 }
  0x56   : > { %719 = vst [vmem:[%s3554_s9 + $0x3b0] sm:$0xff] %v718_v54  ;;  %721 = vst [vmem:[%s3554_s9 + $0x3b8] sm:$0xff] %v720_v55  ;;  %v722_v56 = vld [vmem:[%s3549_s8 + $0x780] sm:$0xff]  ;;  %v724_v57 = vld [vmem:[%s3549_s8 + $0x790] sm:$0xff] }
  0x57   : > { %v726_v58 = vld [vmem:[%s3549_s8 + $0x7a0] sm:$0xff]  ;;  %723 = vst [vmem:[%s3554_s9 + $0x3c0] sm:$0xff] %v722_v56  ;;  %725 = vst [vmem:[%s3554_s9 + $0x3c8] sm:$0xff] %v724_v57  ;;  %v728_v59 = vld [vmem:[%s3549_s8 + $0x7b0] sm:$0xff] }
  0x58   : > { %727 = vst [vmem:[%s3554_s9 + $0x3d0] sm:$0xff] %v726_v58  ;;  %v730_v60 = vld [vmem:[%s3549_s8 + $0x7c0] sm:$0xff]  ;;  %v732_v61 = vld [vmem:[%s3549_s8 + $0x7d0] sm:$0xff]  ;;  %729 = vst [vmem:[%s3554_s9 + $0x3d8] sm:$0xff] %v728_v59 }
  0x59   : > { %731 = vst [vmem:[%s3554_s9 + $0x3e0] sm:$0xff] %v730_v60  ;;  %733 = vst [vmem:[%s3554_s9 + $0x3e8] sm:$0xff] %v732_v61  ;;  %v734_v62 = vld [vmem:[%s3549_s8 + $0x7e0] sm:$0xff]  ;;  %v736_v63 = vld [vmem:[%s3549_s8 + $0x7f0] sm:$0xff] }
  0x5a   : > { %735 = vst [vmem:[%s3554_s9 + $0x3f0] sm:$0xff] %v734_v62  ;;  %737 = vst [vmem:[%s3554_s9 + $0x3f8] sm:$0xff] %v736_v63 }
  0x5b PF: > { %s3810_s10 = sand.u32 1, %s3446_s17   ;;  %s3016_s11 = sshll.u32 %s3454_s19, 5 }
  0x5c   : > { %s2813_s12 = sshll.u32 %s3810_s10, 1  ;;  %s3819_s15 = scalar_lea.hbm %s4290_s2, %s3016_s11 }
  0x5d   : > { %s748_s21 = scalar_lea.vmem [#allocation4], %s2813_s12  ;;  %s745_s25 = scalar_lea.sflag [#allocation5], %s3810_s10 }
  0x5e   : > { %s756_s23 = sshll.u32 %s748_s21, 4  ;;  %s3348_s29 = scalar_lea.hbm %s3819_s15, 32  ;;  %s757_s23 = int_to_ptr.vmem [resolvable:$true] %s756_s23 }
  0x5f   : > { %p3349_p11 = scmp.ne.s32.totalorder %s3819_s15, %s3348_s29  ;;  %s3352_s6 = scalar_lea.hbm %s4290_s2, 64 }
  0x60   : > { %p3353_p0 = scmp.lt.u32.totalorder %s3819_s15, %s4290_s2  ;;  %p3354_p1 = scmp.lt.u32.totalorder %s3352_s6, %s3348_s29 }
  0x61   : > { %p3350_p12 = pnand %p3349_p11, %p3523_p3  ;;  %p3356_p4 = scmp.lt.u32.totalorder %s3348_s29, %s3819_s15 }
  0x62   : > { %p3355_p2 = por %p3354_p1, %p3353_p0 }
  0x63   : > { %p3351_p13 = pneg %p3350_p12 }
  0x64   : > { %p3357_p5 = por %p3356_p4, %p3355_p2 }
  0x66   : > { %p3358_p6 = pnand %p3357_p5, %p3351_p13 }
  0x68   : > { %3361 = shalt.err (!%p3358_p6)
}
  0x69   : > { %s3362_s9 = scalar_lea.vmem %s757_s23, 32  ;;  %s3460_s13 = smov [#allocation4]  }
  0x6a   : > { %p3363_p7 = scmp.ne.s32.totalorder %s757_s23, %s3362_s9  ;;  %s3366_s14 = sshll.u32 %s3460_s13, 4  ;;  %s3367_s14 = int_to_ptr.vmem [resolvable:$false] %s3366_s14 }
  0x6b   : > { %s3368_s21 = scalar_lea.vmem %s3367_s14, 64  ;;  %p3369_p12 = scmp.lt.s32.totalorder %s757_s23, %s3367_s14 }
  0x6c   : > { %p3364_p10 = pnand %p3363_p7, %p3523_p3  ;;  %p3370_p9 = scmp.lt.s32.totalorder %s3368_s21, %s3362_s9 }
  0x6e   : > { %p3365_p11 = pneg %p3364_p10  ;;  %p3371_p8 = por %p3370_p9, %p3369_p12 }
  0x70   : > { %p3372_p0 = pnand %p3371_p8, %p3365_p11 }
  0x72   : > { %3375 = shalt.err (!%p3372_p0)
}
  0x73   : > { %3104 = dma.hbm_to_vmem [thread:$0]  (%p3523_p3), %s3819_s15, 32, %s757_s23, %s745_s25  }
  0x74   : > { %s3846_s5 = scalar_lea.hbm %s4291_s3, %s3016_s11  ;;  %s767_s6 = scalar_lea.vmem [#allocation6], %s2813_s12 }
  0x75   : > { %s775_s7 = sshll.u32 %s767_s6, 4  ;;  %s764_s8 = scalar_lea.sflag [#allocation7], %s3810_s10  ;;  %s776_s7 = int_to_ptr.vmem [resolvable:$true] %s775_s7 }
  0x76   : > { %s3376_s9 = scalar_lea.hbm %s3846_s5, 32  ;;  %s3380_s25 = scalar_lea.hbm %s4291_s3, 64 }
  0x77   : > { %p3377_p8 = scmp.ne.s32.totalorder %s3846_s5, %s3376_s9  ;;  %p3381_p1 = scmp.lt.u32.totalorder %s3846_s5, %s4291_s3 }
  0x78   : > { %p3382_p2 = scmp.lt.u32.totalorder %s3380_s25, %s3376_s9  ;;  %p3384_p5 = scmp.lt.u32.totalorder %s3376_s9, %s3846_s5 }
  0x79   : > { %p3378_p9 = pnand %p3377_p8, %p3523_p3 }
  0x7a   : > { %p3383_p4 = por %p3382_p2, %p3381_p1 }
  0x7b   : > { %p3379_p13 = pneg %p3378_p9 }
  0x7c   : > { %p3385_p6 = por %p3384_p5, %p3383_p4 }
  0x7e   : > { %p3386_p7 = pnand %p3385_p6, %p3379_p13 }
  0x80   : > { %3389 = shalt.err (!%p3386_p7)
}
  0x81   : > { %s3390_s10 = scalar_lea.vmem %s776_s7, 32  ;;  %s3461_s12 = smov [#allocation6]  }
  0x82   : > { %p3391_p10 = scmp.ne.s32.totalorder %s776_s7, %s3390_s10  ;;  %s3394_s14 = sshll.u32 %s3461_s12, 4  ;;  %s3395_s14 = int_to_ptr.vmem [resolvable:$false] %s3394_s14 }
  0x83   : > { %s3396_s21 = scalar_lea.vmem %s3395_s14, 64  ;;  %p3397_p0 = scmp.lt.s32.totalorder %s776_s7, %s3395_s14 }
  0x84   : > { %p3392_p11 = pnand %p3391_p10, %p3523_p3  ;;  %p3398_p8 = scmp.lt.s32.totalorder %s3396_s21, %s3390_s10 }
  0x86   : > { %p3393_p12 = pneg %p3392_p11  ;;  %p3399_p9 = por %p3398_p8, %p3397_p0 }
  0x88   : > { %p3400_p1 = pnand %p3399_p9, %p3393_p12 }
  0x8a   : > { %3403 = shalt.err (!%p3400_p1)
}
  0x8b   : > { %3105 = dma.hbm_to_vmem [thread:$0]  (%p3523_p3), %s3846_s5, 32, %s776_s7, %s764_s8  }
  0x8c PF: > { %p2819_p13 = scmp.ge.s32.totalorder %s3458_s20, 1  ;;  %p780_p2 = scmp.lt.s32.totalorder %s3458_s20, 3 }
  0x8e   : > { %p781_p4 = pnand %p2819_p13, %p780_p2 }
  0x8f   : > { %s3871_s29 = sand.u32 (!%p781_p4), 1, %s3442_s16   ;;  %p4297_p3 = scmp.ne.s32.totalorder (!%p781_p4), %s4295_s26, 0 }
  0x90   : > { %784 = sbr.rel (%p781_p4) target bundleno = 558 (0x22e), region = 70  ;;  %s2820_s30 = sshll.u32 (!%p781_p4), %s3871_s29, 10 }
  0x91   : > { %s2821_s6 = sshll.u32 (!%p781_p4), %s3871_s29, 1  ;;  %s3875_s9 = scalar_lea.vmem (!%p781_p4), [#allocation3], %s2820_s30 }
  0x92   : > { %s794_s24 = scalar_lea.sflag (!%p781_p4), [#allocation5], %s3871_s29  ;;  %s3878_s5 = scalar_lea.vmem (!%p781_p4), [#allocation4], %s2821_s6 }
  0x97   : > { %3429 = dma.done.wait (%p4297_p3), %s794_s24, 32  }
  0x98   : > { %3431 = vsyncadd (%p4297_p3), %s794_s24, 4294967264  ;;  %s803_s7 = scalar_lea.sflag [#allocation7], %s3871_s29  ;;  %s3885_s8 = scalar_lea.vmem [#allocation6], %s2821_s6 }
  0x99   : > { %3433 = dma.done.wait (%p4297_p3), %s803_s7, 32  }
  0x9a   : > { %3435 = vsyncadd (%p4297_p3), %s803_s7, 4294967264  ;;  %v3156_v0 = vld [vmem:[%s3875_s9 + $0x4] ss:$8 sps:$4 sm:$0xff]   ;;  %v3160_v2 = vld [vmem:[%s3875_s9] ss:$8 sps:$4 sm:$0xff]   ;;  %p4298_p5 = scmp.ne.s32.totalorder %s4296_s28, 0 }
  0x9b   : > { %v3158_v1 = vld [vmem:[%s3875_s9 + $0x204] ss:$8 sps:$4 sm:$0xff]   ;;  %1963 = vmatprep.subr.bf16.mxu1 %v3156_v0  ;;  %v3161_v3 = vld [vmem:[%s3875_s9 + $0x200] ss:$8 sps:$4 sm:$0xff]   ;;  %v3162_v4 = vld [vmem:[%s3875_s9 + $0x14] ss:$8 sps:$4 sm:$0xff]  }
  0x9c   : > { %2149 = vmatprep.subr.bf16.mxu0 %v3158_v1  ;;  %1964 = vmatpush1.bf16.msra.mxu1 %v3160_v2  ;;  %v3164_v5 = vld [vmem:[%s3875_s9 + $0x214] ss:$8 sps:$4 sm:$0xff]   ;;  %v3166_v6 = vld [vmem:[%s3875_s9 + $0x10] ss:$8 sps:$4 sm:$0xff]   ;;  %v3168_v8 = vld [vmem:[%s3875_s9 + $0x24] ss:$8 sps:$4 sm:$0xff]  }
  0x9d   : > { %2150 = vmatpush1.bf16.msra.mxu0 %v3161_v3  ;;  %1965 = vmatprep.subr.bf16.mxu1 %v3162_v4  ;;  %v3167_v7 = vld [vmem:[%s3875_s9 + $0x210] ss:$8 sps:$4 sm:$0xff]   ;;  %v3170_v9 = vld [vmem:[%s3875_s9 + $0x224] ss:$8 sps:$4 sm:$0xff]   ;;  %v3172_v10 = vld [vmem:[%s3875_s9 + $0x20] ss:$8 sps:$4 sm:$0xff]  }
  0x9e   : > { %2151 = vmatprep.subr.bf16.mxu0 %v3164_v5  ;;  %v3173_v11 = vld [vmem:[%s3875_s9 + $0x220] ss:$8 sps:$4 sm:$0xff]   ;;  %v3174_v12 = vld [vmem:[%s3875_s9 + $0x34] ss:$8 sps:$4 sm:$0xff]   ;;  %v3178_v14 = vld [vmem:[%s3875_s9 + $0x30] ss:$8 sps:$4 sm:$0xff]  }
  0x9f   : > { %v3176_v13 = vld [vmem:[%s3875_s9 + $0x234] ss:$8 sps:$4 sm:$0xff]   ;;  %v3179_v15 = vld [vmem:[%s3875_s9 + $0x230] ss:$8 sps:$4 sm:$0xff]   ;;  %v3180_v16 = vld [vmem:[%s3875_s9 + $0x44] ss:$8 sps:$4 sm:$0xff]  }
  0xa0   : > { %1966 = vmatpush1.bf16.msra.mxu1 %v3166_v6  ;;  %v3182_v17 = vld [vmem:[%s3875_s9 + $0x244] ss:$8 sps:$4 sm:$0xff]   ;;  %v3184_v18 = vld [vmem:[%s3875_s9 + $0x40] ss:$8 sps:$4 sm:$0xff]   ;;  %v3186_v20 = vld [vmem:[%s3875_s9 + $0x54] ss:$8 sps:$4 sm:$0xff]  }
  0xa1   : > { %2152 = vmatpush1.bf16.msra.mxu0 %v3167_v7  ;;  %1967 = vmatprep.subr.bf16.mxu1 %v3168_v8  ;;  %v3185_v19 = vld [vmem:[%s3875_s9 + $0x240] ss:$8 sps:$4 sm:$0xff]   ;;  %v3188_v21 = vld [vmem:[%s3875_s9 + $0x254] ss:$8 sps:$4 sm:$0xff]   ;;  %v3190_v22 = vld [vmem:[%s3875_s9 + $0x50] ss:$8 sps:$4 sm:$0xff]  }
  0xa2   : > { %2153 = vmatprep.subr.bf16.mxu0 %v3170_v9  ;;  %v3191_v23 = vld [vmem:[%s3875_s9 + $0x250] ss:$8 sps:$4 sm:$0xff]   ;;  %v3192_v24 = vld [vmem:[%s3875_s9 + $0x64] ss:$8 sps:$4 sm:$0xff]   ;;  %v3196_v26 = vld [vmem:[%s3875_s9 + $0x60] ss:$8 sps:$4 sm:$0xff]  }
  0xa3   : > { %v3194_v25 = vld [vmem:[%s3875_s9 + $0x264] ss:$8 sps:$4 sm:$0xff]   ;;  %v3197_v27 = vld [vmem:[%s3875_s9 + $0x260] ss:$8 sps:$4 sm:$0xff]   ;;  %v3198_v28 = vld [vmem:[%s3875_s9 + $0x74] ss:$8 sps:$4 sm:$0xff]  }
  0xa4   : > { %1968 = vmatpush1.bf16.msra.mxu1 %v3172_v10  ;;  %v3200_v29 = vld [vmem:[%s3875_s9 + $0x274] ss:$8 sps:$4 sm:$0xff]   ;;  %v3202_v30 = vld [vmem:[%s3875_s9 + $0x70] ss:$8 sps:$4 sm:$0xff]   ;;  %v3204_v32 = vld [vmem:[%s3875_s9 + $0x84] ss:$8 sps:$4 sm:$0xff]  }
  0xa5   : > { %2154 = vmatpush1.bf16.msra.mxu0 %v3173_v11  ;;  %1969 = vmatprep.subr.bf16.mxu1 %v3174_v12  ;;  %v3203_v31 = vld [vmem:[%s3875_s9 + $0x270] ss:$8 sps:$4 sm:$0xff]   ;;  %v3206_v33 = vld [vmem:[%s3875_s9 + $0x284] ss:$8 sps:$4 sm:$0xff]   ;;  %v3208_v34 = vld [vmem:[%s3875_s9 + $0x80] ss:$8 sps:$4 sm:$0xff]  }
  0xa6   : > { %2155 = vmatprep.subr.bf16.mxu0 %v3176_v13  ;;  %v3209_v35 = vld [vmem:[%s3875_s9 + $0x280] ss:$8 sps:$4 sm:$0xff]   ;;  %v3210_v36 = vld [vmem:[%s3875_s9 + $0x94] ss:$8 sps:$4 sm:$0xff]   ;;  %v3214_v38 = vld [vmem:[%s3875_s9 + $0x90] ss:$8 sps:$4 sm:$0xff]  }
  0xa7   : > { %v3212_v37 = vld [vmem:[%s3875_s9 + $0x294] ss:$8 sps:$4 sm:$0xff]   ;;  %v3215_v39 = vld [vmem:[%s3875_s9 + $0x290] ss:$8 sps:$4 sm:$0xff]   ;;  %v3216_v40 = vld [vmem:[%s3875_s9 + $0xa4] ss:$8 sps:$4 sm:$0xff]  }
  0xa8   : > { %1970 = vmatpush1.bf16.msra.mxu1 %v3178_v14  ;;  %v3218_v41 = vld [vmem:[%s3875_s9 + $0x2a4] ss:$8 sps:$4 sm:$0xff]   ;;  %v3220_v42 = vld [vmem:[%s3875_s9 + $0xa0] ss:$8 sps:$4 sm:$0xff]   ;;  %v3222_v44 = vld [vmem:[%s3875_s9 + $0xb4] ss:$8 sps:$4 sm:$0xff]  }
  0xa9   : > { %2156 = vmatpush1.bf16.msra.mxu0 %v3179_v15  ;;  %1971 = vmatprep.subr.bf16.mxu1 %v3180_v16  ;;  %v3221_v43 = vld [vmem:[%s3875_s9 + $0x2a0] ss:$8 sps:$4 sm:$0xff]   ;;  %v3224_v45 = vld [vmem:[%s3875_s9 + $0x2b4] ss:$8 sps:$4 sm:$0xff]   ;;  %v3226_v46 = vld [vmem:[%s3875_s9 + $0xb0] ss:$8 sps:$4 sm:$0xff]  }
  0xaa   : > { %2157 = vmatprep.subr.bf16.mxu0 %v3182_v17  ;;  %v3227_v47 = vld [vmem:[%s3875_s9 + $0x2b0] ss:$8 sps:$4 sm:$0xff]   ;;  %v907_v48 = vld [vmem:[%s4288_s0] sm:$0xff]  ;;  %v3234_v58 = vld [vmem:[%s3875_s9 + $0xd4] ss:$8 sps:$4 sm:$0xff]  }
  0xab   : > { %v911_v49 = vld [vmem:[%s4288_s0 + $0x20] sm:$0xff]  ;;  %v909_v53 = vld [vmem:[%s4288_s0 + $0x10] sm:$0xff] }
  0xac   : > { %1972 = vmatpush1.bf16.msra.mxu1 %v3184_v18  ;;  %v3228_v50 = vld [vmem:[%s3875_s9 + $0xc4] ss:$8 sps:$4 sm:$0xff]   ;;  %v2824_v52 = vcombine.high %v907_v48, %v911_v49  ;;  %v913_v54 = vld [vmem:[%s4288_s0 + $0x30] sm:$0xff]  ;;  %v3232_v56 = vld [vmem:[%s3875_s9 + $0xc0] ss:$8 sps:$4 sm:$0xff]   ;;  %v2823_v12 = vcombine.low %v907_v48, %v911_v49 }
  0xad   : > { %2158 = vmatpush1.bf16.msra.mxu0 %v3185_v19  ;;  %1973 = vmatprep.subr.bf16.mxu1 %v3186_v20  ;;  %v3230_v51 = vld [vmem:[%s3875_s9 + $0x2c4] ss:$8 sps:$4 sm:$0xff]   ;;  %v2828_v55 = vcombine.high %v909_v53, %v913_v54  ;;  %v3233_v57 = vld [vmem:[%s3875_s9 + $0x2c0] ss:$8 sps:$4 sm:$0xff]   ;;  %v3236_v59 = vld [vmem:[%s3875_s9 + $0x2d4] ss:$8 sps:$4 sm:$0xff]   ;;  %v2827_v13 = vcombine.low %v909_v53, %v913_v54 }
  0xae   : > { %2159 = vmatprep.subr.bf16.mxu0 %v3188_v21  ;;  %1995 = vmatprep.mubr.bf16.mxu1 %v2824_v52  ;;  %v3238_v60 = vld [vmem:[%s3875_s9 + $0xd0] ss:$8 sps:$4 sm:$0xff]   ;;  %v3240_v62 = vld [vmem:[%s3875_s9 + $0xe4] ss:$8 sps:$4 sm:$0xff]   ;;  %v3244_v0 = vld [vmem:[%s3875_s9 + $0xe0] ss:$8 sps:$4 sm:$0xff]  }
  0xaf   : > { %2181 = vmatprep.mubr.bf16.mxu0 %v2828_v55  ;;  %v3239_v61 = vld [vmem:[%s3875_s9 + $0x2d0] ss:$8 sps:$4 sm:$0xff]   ;;  %v3242_v63 = vld [vmem:[%s3875_s9 + $0x2e4] ss:$8 sps:$4 sm:$0xff]   ;;  %v3245_v1 = vld [vmem:[%s3875_s9 + $0x2e0] ss:$8 sps:$4 sm:$0xff]  }
  0xb0   : > { %1974 = vmatpush1.bf16.msra.mxu1 %v3190_v22  ;;  %v3246_v2 = vld [vmem:[%s3875_s9 + $0xf4] ss:$8 sps:$4 sm:$0xff]   ;;  %v3250_v4 = vld [vmem:[%s3875_s9 + $0xf0] ss:$8 sps:$4 sm:$0xff]   ;;  %v3254_v6 = vld [vmem:[%s3875_s9 + $0x104] ss:$8 sps:$4 sm:$0xff]  }
  0xb1   : > { %2160 = vmatpush1.bf16.msra.mxu0 %v3191_v23  ;;  %1975 = vmatprep.subr.bf16.mxu1 %v3192_v24  ;;  %v3248_v3 = vld [vmem:[%s3875_s9 + $0x2f4] ss:$8 sps:$4 sm:$0xff]   ;;  %v3251_v5 = vld [vmem:[%s3875_s9 + $0x2f0] ss:$8 sps:$4 sm:$0xff]   ;;  %v3257_v7 = vld [vmem:[%s3875_s9 + $0x304] ss:$8 sps:$4 sm:$0xff]  }
  0xb2   : > { %2161 = vmatprep.subr.bf16.mxu0 %v3194_v25  ;;  %v3252_v8 = vld [vmem:[%s3875_s9 + $0x100] ss:$8 sps:$4 sm:$0xff]   ;;  %v917_v14 = vld [vmem:[%s4288_s0 + $0x50] sm:$0xff]  ;;  %v3266_v22 = vld [vmem:[%s3875_s9 + $0x124] ss:$8 sps:$4 sm:$0xff]  }
  0xb3   : > { %v3255_v9 = vld [vmem:[%s3875_s9 + $0x300] ss:$8 sps:$4 sm:$0xff]   ;;  %v921_v15 = vld [vmem:[%s4288_s0 + $0x70] sm:$0xff]  ;;  %v3269_v23 = vld [vmem:[%s3875_s9 + $0x324] ss:$8 sps:$4 sm:$0xff]  }
  0xb4   : > { %1976 = vmatpush1.bf16.msra.mxu1 %v3196_v26  ;;  %v915_v10 = vld [vmem:[%s4288_s0 + $0x40] sm:$0xff]  ;;  %v3260_v16 = vld [vmem:[%s3875_s9 + $0x114] ss:$8 sps:$4 sm:$0xff]   ;;  %v2836_v19 = vcombine.high %v917_v14, %v921_v15  ;;  %v3258_v20 = vld [vmem:[%s3875_s9 + $0x110] ss:$8 sps:$4 sm:$0xff]  }
  0xb5   : > { %2162 = vmatpush1.bf16.msra.mxu0 %v3197_v27  ;;  %1977 = vmatprep.subr.bf16.mxu1 %v3198_v28  ;;  %v919_v11 = vld [vmem:[%s4288_s0 + $0x60] sm:$0xff]  ;;  %v3263_v17 = vld [vmem:[%s3875_s9 + $0x314] ss:$8 sps:$4 sm:$0xff]   ;;  %v3261_v21 = vld [vmem:[%s3875_s9 + $0x310] ss:$8 sps:$4 sm:$0xff]   ;;  %v2835_v28 = vcombine.low %v917_v14, %v921_v15 }
  0xb6   : > { %2163 = vmatprep.subr.bf16.mxu0 %v3200_v29  ;;  %v2832_v18 = vcombine.high %v915_v10, %v919_v11  ;;  %v3264_v24 = vld [vmem:[%s3875_s9 + $0x120] ss:$8 sps:$4 sm:$0xff]   ;;  %v2831_v27 = vcombine.low %v915_v10, %v919_v11  ;;  %v925_v29 = vld [vmem:[%s4288_s0 + $0x90] sm:$0xff]  ;;  %v3290_v54 = vld [vmem:[%s3875_s9 + $0x164] ss:$8 sps:$4 sm:$0xff]  }
  0xb7   : > { %v923_v25 = vld [vmem:[%s4288_s0 + $0x80] sm:$0xff]  ;;  %v3284_v48 = vld [vmem:[%s3875_s9 + $0x154] ss:$8 sps:$4 sm:$0xff]   ;;  %v3282_v52 = vld [vmem:[%s3875_s9 + $0x150] ss:$8 sps:$4 sm:$0xff]  }
  0xb8   : > { %1978 = vmatpush1.bf16.msra.mxu1 %v3202_v30  ;;  %v927_v26 = vld [vmem:[%s4288_s0 + $0xa0] sm:$0xff]  ;;  %v929_v30 = vld [vmem:[%s4288_s0 + $0xb0] sm:$0xff] }
  0xb9   : > { %2164 = vmatpush1.bf16.msra.mxu0 %v3203_v31  ;;  %1979 = vmatprep.subr.bf16.mxu1 %v3204_v32  ;;  %v3267_v31 = vld [vmem:[%s3875_s9 + $0x320] ss:$8 sps:$4 sm:$0xff]   ;;  %v3272_v32 = vld [vmem:[%s3875_s9 + $0x134] ss:$8 sps:$4 sm:$0xff]   ;;  %v3285_v53 = vld [vmem:[%s3875_s9 + $0x350] ss:$8 sps:$4 sm:$0xff]  }
  0xba   : > { %2165 = vmatprep.subr.bf16.mxu0 %v3206_v33  ;;  %v3275_v33 = vld [vmem:[%s3875_s9 + $0x334] ss:$8 sps:$4 sm:$0xff]   ;;  %v3293_v55 = vld [vmem:[%s3875_s9 + $0x364] ss:$8 sps:$4 sm:$0xff]   ;;  %v3300_v14 = vld [vmem:[%s3875_s9 + $0x180] ss:$8 sps:$4 sm:$0xff]  }
  0xbb   : > { %v3287_v49 = vld [vmem:[%s3875_s9 + $0x354] ss:$8 sps:$4 sm:$0xff]   ;;  %v951_v11 = vld [vmem:[%s4288_s0 + $0x160] sm:$0xff] }
  0xbc   : > { %1980 = vmatpush1.bf16.msra.mxu1 %v3208_v34  ;;  %v2840_v34 = vcombine.high %v923_v25, %v927_v26  ;;  %v3303_v15 = vld [vmem:[%s3875_s9 + $0x380] ss:$8 sps:$4 sm:$0xff]  }
  0xbd   : > { %2166 = vmatpush1.bf16.msra.mxu0 %v3209_v35  ;;  %1981 = vmatprep.subr.bf16.mxu1 %v3210_v36  ;;  %v2844_v35 = vcombine.high %v925_v29, %v929_v30  ;;  %v3270_v36 = vld [vmem:[%s3875_s9 + $0x130] ss:$8 sps:$4 sm:$0xff]  }
  0xbe   : > { %2167 = vmatprep.subr.bf16.mxu0 %v3212_v37  ;;  %v3273_v37 = vld [vmem:[%s3875_s9 + $0x330] ss:$8 sps:$4 sm:$0xff]  }
  0xc0   : > { %1982 = vmatpush1.bf16.msra.mxu1 %v3214_v38  ;;  %v3278_v38 = vld [vmem:[%s3875_s9 + $0x144] ss:$8 sps:$4 sm:$0xff]  }
  0xc1   : > { %2168 = vmatpush1.bf16.msra.mxu0 %v3215_v39  ;;  %1983 = vmatprep.subr.bf16.mxu1 %v3216_v40  ;;  %v3281_v39 = vld [vmem:[%s3875_s9 + $0x344] ss:$8 sps:$4 sm:$0xff]  }
  0xc2   : > { %2169 = vmatprep.subr.bf16.mxu0 %v3218_v41  ;;  %v931_v40 = vld [vmem:[%s4288_s0 + $0xc0] sm:$0xff] }
  0xc3   : > { %v935_v41 = vld [vmem:[%s4288_s0 + $0xe0] sm:$0xff] }
  0xc4   : > { %1984 = vmatpush1.bf16.msra.mxu1 %v3220_v42  ;;  %v2839_v42 = vcombine.low %v923_v25, %v927_v26 }
  0xc5   : > { %2170 = vmatpush1.bf16.msra.mxu0 %v3221_v43  ;;  %1985 = vmatprep.subr.bf16.mxu1 %v3222_v44  ;;  %v2843_v43 = vcombine.low %v925_v29, %v929_v30  ;;  %v933_v44 = vld [vmem:[%s4288_s0 + $0xd0] sm:$0xff]  ;;  %v4087_v29 = vld [vmem:[%s4288_s0 + $0x38] sm:$0xff]  ;;  %v3312_v30 = vld [vmem:[%s3875_s9 + $0x1a0] ss:$8 sps:$4 sm:$0xff]  }
  0xc6   : > { %2171 = vmatprep.subr.bf16.mxu0 %v3224_v45  ;;  %v937_v45 = vld [vmem:[%s4288_s0 + $0xf0] sm:$0xff] }
  0xc8   : > { %1986 = vmatpush1.bf16.msra.mxu1 %v3226_v46  ;;  %v3276_v46 = vld [vmem:[%s3875_s9 + $0x140] ss:$8 sps:$4 sm:$0xff]  }
  0xc9   : > { %2172 = vmatpush1.bf16.msra.mxu0 %v3227_v47  ;;  %1987 = vmatprep.subr.bf16.mxu1 %v3228_v50  ;;  %v3279_v47 = vld [vmem:[%s3875_s9 + $0x340] ss:$8 sps:$4 sm:$0xff]   ;;  %v2848_v50 = vcombine.high %v931_v40, %v935_v41 }
  0xca   : > { %2173 = vmatprep.subr.bf16.mxu0 %v3230_v51  ;;  %v2852_v51 = vcombine.high %v933_v44, %v937_v45 }
  0xcc   : > { %1988 = vmatpush1.bf16.msra.mxu1 %v3232_v56  ;;  %v3288_v56 = vld [vmem:[%s3875_s9 + $0x160] ss:$8 sps:$4 sm:$0xff]  }
  0xcd   : > { %2174 = vmatpush1.bf16.msra.mxu0 %v3233_v57  ;;  %1989 = vmatprep.subr.bf16.mxu1 %v3234_v58  ;;  %v3291_v57 = vld [vmem:[%s3875_s9 + $0x360] ss:$8 sps:$4 sm:$0xff]  }
  0xce   : > { %2175 = vmatprep.subr.bf16.mxu0 %v3236_v59  ;;  %v939_v58 = vld [vmem:[%s4288_s0 + $0x100] sm:$0xff]  ;;  %v2847_v59 = vcombine.low %v931_v40, %v935_v41 }
  0xcf   : > { %v3324_v40 = vld [vmem:[%s3875_s9 + $0x1c0] ss:$8 sps:$4 sm:$0xff]  }
  0xd0   : > { %1990 = vmatpush1.bf16.msra.mxu1 %v3238_v60  ;;  %v2851_v60 = vcombine.low %v933_v44, %v937_v45  ;;  %v3327_v41 = vld [vmem:[%s3875_s9 + $0x3c0] ss:$8 sps:$4 sm:$0xff]   ;;  %v3330_v44 = vld [vmem:[%s3875_s9 + $0x1d0] ss:$8 sps:$4 sm:$0xff]  }
  0xd1   : > { %2176 = vmatpush1.bf16.msra.mxu0 %v3239_v61  ;;  %1991 = vmatprep.subr.bf16.mxu1 %v3240_v62  ;;  %v943_v61 = vld [vmem:[%s4288_s0 + $0x120] sm:$0xff]  ;;  %v941_v62 = vld [vmem:[%s4288_s0 + $0x110] sm:$0xff] }
  0xd2   : > { %2177 = vmatprep.subr.bf16.mxu0 %v3242_v63  ;;  %v945_v63 = vld [vmem:[%s4288_s0 + $0x130] sm:$0xff] }
  0xd3   : > { %v2859_v10 = vcombine.low %v941_v62, %v945_v63  ;;  %v3333_v45 = vld [vmem:[%s3875_s9 + $0x3d0] ss:$8 sps:$4 sm:$0xff]  }
  0xd4   : > { %1992 = vmatpush1.bf16.msra.mxu1 %v3244_v0  ;;  %v3296_v0 = vld [vmem:[%s3875_s9 + $0x174] ss:$8 sps:$4 sm:$0xff]  }
  0xd5   : > { %2178 = vmatpush1.bf16.msra.mxu0 %v3245_v1  ;;  %1993 = vmatprep.subr.bf16.mxu1 %v3246_v2  ;;  %v3299_v1 = vld [vmem:[%s3875_s9 + $0x374] ss:$8 sps:$4 sm:$0xff]   ;;  %v2856_v2 = vcombine.high %v939_v58, %v943_v61 }
  0xd6   : > { %2179 = vmatprep.subr.bf16.mxu0 %v3248_v3  ;;  %v2860_v3 = vcombine.high %v941_v62, %v945_v63  ;;  %v924_v62 = vld [vmem:[%s4288_s0 + $0x88] sm:$0xff] }
  0xd7   : > { %v928_v63 = vld [vmem:[%s4288_s0 + $0xa8] sm:$0xff] }
  0xd8   : > { %1994 = vmatpush1.bf16.msra.mxu1 %v3250_v4  ;;  %v3294_v4 = vld [vmem:[%s3875_s9 + $0x170] ss:$8 sps:$4 sm:$0xff]  }
  0xd9   : > { %2180 = vmatpush1.bf16.msra.mxu0 %v3251_v5  ;;  %2056 = vmatprep.subr.bf16.mxu1 %v3254_v6  ;;  %v3297_v5 = vld [vmem:[%s3875_s9 + $0x370] ss:$8 sps:$4 sm:$0xff]   ;;  %v3302_v6 = vld [vmem:[%s3875_s9 + $0x184] ss:$8 sps:$4 sm:$0xff]  }
  0xda   : > { %2242 = vmatprep.subr.bf16.mxu0 %v3257_v7  ;;  %v3305_v7 = vld [vmem:[%s3875_s9 + $0x384] ss:$8 sps:$4 sm:$0xff]  }
  0xdb   : > { %1996 = vmatmul.mubr.bf16.vlgmr.msra.gmra.mrb[0].mxu1 %v2823_v12  ;;  %v949_v12 = vld [vmem:[%s4288_s0 + $0x150] sm:$0xff] }
  0xdc   : > { %2182 = vmatmul.mubr.bf16.vlgmr.msra.gmra.mrb[0].mxu0 %v2827_v13  ;;  %2057 = vmatpush1.bf16.msra.mxu1 %v3252_v8  ;;  %v947_v8 = vld [vmem:[%s4288_s0 + $0x140] sm:$0xff]  ;;  %v953_v13 = vld [vmem:[%s4288_s0 + $0x170] sm:$0xff] }
  0xdd   : > { %2243 = vmatpush1.bf16.msra.mxu0 %v3255_v9  ;;  %2058 = vmatprep.subr.bf16.mxu1 %v3260_v16  ;;  %v2855_v9 = vcombine.low %v939_v58, %v943_v61  ;;  %v3308_v16 = vld [vmem:[%s3875_s9 + $0x194] ss:$8 sps:$4 sm:$0xff]   ;;  %v2863_v25 = vcombine.low %v947_v8, %v951_v11  ;;  %v2867_v26 = vcombine.low %v949_v12, %v953_v13 }
  0xde   : > { %2244 = vmatprep.subr.bf16.mxu0 %v3263_v17  ;;  %2005 = vmatprep.mubr.bf16.mxu1 %v2832_v18  ;;  %v3311_v17 = vld [vmem:[%s3875_s9 + $0x394] ss:$8 sps:$4 sm:$0xff]   ;;  %v2864_v18 = vcombine.high %v947_v8, %v951_v11 }
  0xdf   : > { %2191 = vmatprep.mubr.bf16.mxu0 %v2836_v19  ;;  %v2868_v19 = vcombine.high %v949_v12, %v953_v13  ;;  %v934_v8 = vld [vmem:[%s4288_s0 + $0xd8] sm:$0xff] }
  0xe0   : > { %2059 = vmatpush1.bf16.msra.mxu1 %v3258_v20  ;;  %v3306_v20 = vld [vmem:[%s3875_s9 + $0x190] ss:$8 sps:$4 sm:$0xff]  }
  0xe1   : > { %2245 = vmatpush1.bf16.msra.mxu0 %v3261_v21  ;;  %2060 = vmatprep.subr.bf16.mxu1 %v3266_v22  ;;  %v3309_v21 = vld [vmem:[%s3875_s9 + $0x390] ss:$8 sps:$4 sm:$0xff]   ;;  %v3314_v22 = vld [vmem:[%s3875_s9 + $0x1a4] ss:$8 sps:$4 sm:$0xff]  }
  0xe2   : > { %2246 = vmatprep.subr.bf16.mxu0 %v3269_v23  ;;  %v3317_v23 = vld [vmem:[%s3875_s9 + $0x3a4] ss:$8 sps:$4 sm:$0xff]  }
  0xe3   : > { %2006 = vmatmul.mubr.bf16.gmra.mrb[4].mxu1 %v2831_v27  ;;  %v4077_v27 = vld [vmem:[%s4288_s0 + $0x28] sm:$0xff] }
  0xe4   : > { %2192 = vmatmul.mubr.bf16.gmra.mrb[4].mxu0 %v2835_v28  ;;  %2061 = vmatpush1.bf16.msra.mxu1 %v3264_v24  ;;  %v4072_v24 = vld [vmem:[%s4288_s0 + $0x8] sm:$0xff]  ;;  %v4082_v28 = vld [vmem:[%s4288_s0 + $0x18] sm:$0xff] }
  0xe5   : > { %2247 = vmatpush1.bf16.msra.mxu0 %v3267_v31  ;;  %2062 = vmatprep.subr.bf16.mxu1 %v3272_v32  ;;  %v3315_v31 = vld [vmem:[%s3875_s9 + $0x3a0] ss:$8 sps:$4 sm:$0xff]   ;;  %v3320_v32 = vld [vmem:[%s3875_s9 + $0x1b4] ss:$8 sps:$4 sm:$0xff]   ;;  %v2825_v58 = vcombine.low %v4072_v24, %v4077_v27 }
  0xe6   : > { %2248 = vmatprep.subr.bf16.mxu0 %v3275_v33  ;;  %2015 = vmatprep.mubr.bf16.mxu1 %v2840_v34  ;;  %v3323_v33 = vld [vmem:[%s3875_s9 + $0x3b4] ss:$8 sps:$4 sm:$0xff]   ;;  %v2826_v34 = vcombine.high %v4072_v24, %v4077_v27 }
  0xe7   : > { %2201 = vmatprep.mubr.bf16.mxu0 %v2844_v35  ;;  %v2830_v35 = vcombine.high %v4082_v28, %v4087_v29  ;;  %v950_v24 = vld [vmem:[%s4288_s0 + $0x158] sm:$0xff] }
  0xe8   : > { %2063 = vmatpush1.bf16.msra.mxu1 %v3270_v36  ;;  %v3318_v36 = vld [vmem:[%s3875_s9 + $0x1b0] ss:$8 sps:$4 sm:$0xff]  }
  0xe9   : > { %2249 = vmatpush1.bf16.msra.mxu0 %v3273_v37  ;;  %2064 = vmatprep.subr.bf16.mxu1 %v3278_v38  ;;  %v3321_v37 = vld [vmem:[%s3875_s9 + $0x3b0] ss:$8 sps:$4 sm:$0xff]   ;;  %v3326_v38 = vld [vmem:[%s3875_s9 + $0x1c4] ss:$8 sps:$4 sm:$0xff]  }
  0xea   : > { %2250 = vmatprep.subr.bf16.mxu0 %v3281_v39  ;;  %v3329_v39 = vld [vmem:[%s3875_s9 + $0x3c4] ss:$8 sps:$4 sm:$0xff]  }
  0xeb   : > { %2016 = vmatmul.mubr.bf16.gmra.mrb[8].mxu1 %v2839_v42  ;;  %v3332_v42 = vld [vmem:[%s3875_s9 + $0x1d4] ss:$8 sps:$4 sm:$0xff]  }
  0xec   : > { %2202 = vmatmul.mubr.bf16.gmra.mrb[8].mxu0 %v2843_v43  ;;  %2065 = vmatpush1.bf16.msra.mxu1 %v3276_v46  ;;  %v3335_v43 = vld [vmem:[%s3875_s9 + $0x3d4] ss:$8 sps:$4 sm:$0xff]   ;;  %v3338_v46 = vld [vmem:[%s3875_s9 + $0x1e4] ss:$8 sps:$4 sm:$0xff]  }
  0xed   : > { %2251 = vmatpush1.bf16.msra.mxu0 %v3279_v47  ;;  %2066 = vmatprep.subr.bf16.mxu1 %v3284_v48  ;;  %v3341_v47 = vld [vmem:[%s3875_s9 + $0x3e4] ss:$8 sps:$4 sm:$0xff]   ;;  %v3336_v48 = vld [vmem:[%s3875_s9 + $0x1e0] ss:$8 sps:$4 sm:$0xff]  }
  0xee   : > { %2252 = vmatprep.subr.bf16.mxu0 %v3287_v49  ;;  %2025 = vmatprep.mubr.bf16.mxu1 %v2848_v50  ;;  %v3339_v49 = vld [vmem:[%s3875_s9 + $0x3e0] ss:$8 sps:$4 sm:$0xff]   ;;  %v3344_v50 = vld [vmem:[%s3875_s9 + $0x1f4] ss:$8 sps:$4 sm:$0xff]  }
  0xef   : > { %2211 = vmatprep.mubr.bf16.mxu0 %v2852_v51  ;;  %v3347_v51 = vld [vmem:[%s3875_s9 + $0x3f4] ss:$8 sps:$4 sm:$0xff]  }
  0xf0   : > { %2067 = vmatpush1.bf16.msra.mxu1 %v3282_v52  ;;  %v3342_v52 = vld [vmem:[%s3875_s9 + $0x1f0] ss:$8 sps:$4 sm:$0xff]  }
  0xf1   : > { %2253 = vmatpush1.bf16.msra.mxu0 %v3285_v53  ;;  %2068 = vmatprep.subr.bf16.mxu1 %v3290_v54  ;;  %v3345_v53 = vld [vmem:[%s3875_s9 + $0x3f0] ss:$8 sps:$4 sm:$0xff]   ;;  %v916_v54 = vld [vmem:[%s4288_s0 + $0x48] sm:$0xff] }
  0xf2   : > { %2254 = vmatprep.subr.bf16.mxu0 %v3293_v55  ;;  %v920_v55 = vld [vmem:[%s4288_s0 + $0x68] sm:$0xff] }
  0xf3   : > { %2026 = vmatmul.mubr.bf16.gmra.mrb[12].mxu1 %v2847_v59  ;;  %v2829_v59 = vcombine.low %v4082_v28, %v4087_v29 }
  0xf4   : > { %2212 = vmatmul.mubr.bf16.gmra.mrb[12].mxu0 %v2851_v60  ;;  %2069 = vmatpush1.bf16.msra.mxu1 %v3288_v56  ;;  %v918_v56 = vld [vmem:[%s4288_s0 + $0x58] sm:$0xff]  ;;  %v2834_v60 = vcombine.high %v916_v54, %v920_v55 }
  0xf5   : > { %2255 = vmatpush1.bf16.msra.mxu0 %v3291_v57  ;;  %2070 = vmatprep.subr.bf16.mxu1 %v3296_v0  ;;  %v922_v57 = vld [vmem:[%s4288_s0 + $0x78] sm:$0xff] }
  0xf6   : > { %2256 = vmatprep.subr.bf16.mxu0 %v3299_v1  ;;  %2035 = vmatprep.mubr.bf16.mxu1 %v2856_v2  ;;  %v2838_v61 = vcombine.high %v918_v56, %v922_v57  ;;  %v926_v0 = vld [vmem:[%s4288_s0 + $0x98] sm:$0xff]  ;;  %v2833_v2 = vcombine.low %v916_v54, %v920_v55 }
  0xf7   : > { %2221 = vmatprep.mubr.bf16.mxu0 %v2860_v3  ;;  %v930_v1 = vld [vmem:[%s4288_s0 + $0xb8] sm:$0xff]  ;;  %v2837_v3 = vcombine.low %v918_v56, %v922_v57 }
  0xf8   : > { %2071 = vmatpush1.bf16.msra.mxu1 %v3294_v4  ;;  %v2842_v4 = vcombine.high %v924_v62, %v928_v63  ;;  %v2845_v11 = vcombine.low %v926_v0, %v930_v1 }
  0xf9   : > { %2257 = vmatpush1.bf16.msra.mxu0 %v3297_v5  ;;  %2072 = vmatprep.subr.bf16.mxu1 %v3302_v6  ;;  %v2846_v5 = vcombine.high %v926_v0, %v930_v1  ;;  %v932_v6 = vld [vmem:[%s4288_s0 + $0xc8] sm:$0xff] }
  0xfa   : > { %2258 = vmatprep.subr.bf16.mxu0 %v3305_v7  ;;  %v936_v7 = vld [vmem:[%s4288_s0 + $0xe8] sm:$0xff] }
  0xfb   : > { %2036 = vmatmul.mubr.bf16.gmra.mrb[16].mxu1 %v2855_v9  ;;  %v938_v9 = vld [vmem:[%s4288_s0 + $0xf8] sm:$0xff]  ;;  %v2850_v12 = vcombine.high %v932_v6, %v936_v7 }
  0xfc   : > { %2222 = vmatmul.mubr.bf16.gmra.mrb[16].mxu0 %v2859_v10  ;;  %2073 = vmatpush1.bf16.msra.mxu1 %v3300_v14  ;;  %v2841_v10 = vcombine.low %v924_v62, %v928_v63  ;;  %v2854_v13 = vcombine.high %v934_v8, %v938_v9  ;;  %v940_v14 = vld [vmem:[%s4288_s0 + $0x108] sm:$0xff] }
  0xfd   : > { %2259 = vmatpush1.bf16.msra.mxu0 %v3303_v15  ;;  %2074 = vmatprep.subr.bf16.mxu1 %v3308_v16  ;;  %v944_v15 = vld [vmem:[%s4288_s0 + $0x128] sm:$0xff]  ;;  %v942_v16 = vld [vmem:[%s4288_s0 + $0x118] sm:$0xff] }
  0xfe   : > { %2260 = vmatprep.subr.bf16.mxu0 %v3311_v17  ;;  %2045 = vmatprep.mubr.bf16.mxu1 %v2864_v18  ;;  %v946_v17 = vld [vmem:[%s4288_s0 + $0x138] sm:$0xff]  ;;  %v2849_v18 = vcombine.low %v932_v6, %v936_v7 }
  0xff   : > { %2231 = vmatprep.mubr.bf16.mxu0 %v2868_v19  ;;  %v2853_v19 = vcombine.low %v934_v8, %v938_v9  ;;  %v2861_v27 = vcombine.low %v942_v16, %v946_v17 }
 0x100   : > { %2075 = vmatpush1.bf16.msra.mxu1 %v3306_v20  ;;  %v2858_v20 = vcombine.high %v940_v14, %v944_v15 }
 0x101   : > { %2261 = vmatpush1.bf16.msra.mxu0 %v3309_v21  ;;  %2076 = vmatprep.subr.bf16.mxu1 %v3314_v22  ;;  %v2862_v21 = vcombine.high %v942_v16, %v946_v17  ;;  %v948_v22 = vld [vmem:[%s4288_s0 + $0x148] sm:$0xff] }
 0x102   : > { %2262 = vmatprep.subr.bf16.mxu0 %v3317_v23  ;;  %v952_v23 = vld [vmem:[%s4288_s0 + $0x168] sm:$0xff] }
 0x103   : > { %2046 = vmatmul.mubr.bf16.gmra.mrb[20].mxu1 %v2863_v25  ;;  %v954_v25 = vld [vmem:[%s4288_s0 + $0x178] sm:$0xff]  ;;  %v2866_v28 = vcombine.high %v948_v22, %v952_v23 }
 0x104   : > { %2232 = vmatmul.mubr.bf16.gmra.mrb[20].mxu0 %v2867_v26  ;;  %2077 = vmatpush1.bf16.msra.mxu1 %v3312_v30  ;;  %v2857_v26 = vcombine.low %v940_v14, %v944_v15  ;;  %v2870_v29 = vcombine.high %v950_v24, %v954_v25  ;;  %v2865_v30 = vcombine.low %v948_v22, %v952_v23 }
 0x105   : > { %2263 = vmatpush1.bf16.msra.mxu0 %v3315_v31  ;;  %2078 = vmatprep.subr.bf16.mxu1 %v3320_v32  ;;  %v2869_v31 = vcombine.low %v950_v24, %v954_v25  ;;  %v2412_v32 = vlaneseq }
 0x106   : > { %2264 = vmatprep.subr.bf16.mxu0 %v3323_v33  ;;  %2088 = vmatprep.mubr.bf16.mxu1 %v2826_v34 }
 0x107   : > { %2274 = vmatprep.mubr.bf16.mxu0 %v2830_v35  ;;  %v2413_v33 = vshrl.u32 %v2412_v32, 7  ;;  %v2410_v35 = vld [vmem:[%s3878_s5] sm:$0x3]  ;;  %s3103_s5 = smul.u32 96, %s3871_s29 }
 0x108   : > { %2079 = vmatpush1.bf16.msra.mxu1 %v3318_v36 }
 0x109   : > { %2265 = vmatpush1.bf16.msra.mxu0 %v3321_v37  ;;  %2080 = vmatprep.subr.bf16.mxu1 %v3326_v38  ;;  %v2414_v34 = vsub.s32 0, %v2413_v33  ;;  %v2418_v36 = vsub.s32 1, %v2413_v33  ;;  %v2446_v37 = vld [vmem:[%s3885_s8] sm:$0x3]  ;;  %s4199_s29 = scalar_lea.vmem [#allocation8], %s3103_s5  ;;  %s3030_s8 = sshll.u32 (%p4298_p5), %s3450_s18, 3 }
 0x10a   : > { %2266 = vmatprep.subr.bf16.mxu0 %v3329_v39  ;;  %s2599_s6 = scalar_lea.vmem (%p4298_p5), %s4292_s4, %s3030_s8 }
 0x10b   : > { %v4181_v38 = vrot.slane %v2410_v35, %v2414_v34 }
 0x10c   : > { %2081 = vmatpush1.bf16.msra.mxu1 %v3324_v40 }
 0x10d   : > { %2267 = vmatpush1.bf16.msra.mxu0 %v3327_v41  ;;  %2082 = vmatprep.subr.bf16.mxu1 %v3332_v42  ;;  %v4183_v41 = vrot.slane %v2410_v35, %v2418_v36 }
 0x10e   : > { %2268 = vmatprep.subr.bf16.mxu0 %v3335_v43  ;;  %v4185_v43 = vrot.slane %v2446_v37, %v2414_v34 }
 0x110   : > { %2083 = vmatpush1.bf16.msra.mxu1 %v3330_v44 }
 0x111   : > { %2269 = vmatpush1.bf16.msra.mxu0 %v3333_v45  ;;  %2084 = vmatprep.subr.bf16.mxu1 %v3338_v46 }
 0x112   : > { %2270 = vmatprep.subr.bf16.mxu0 %v3341_v47  ;;  %v4187_v47 = vrot.slane %v2446_v37, %v2418_v36 }
 0x114   : > { %2085 = vmatpush1.bf16.msra.mxu1 %v3336_v48 }
 0x115   : > { %2271 = vmatpush1.bf16.msra.mxu0 %v3339_v49  ;;  %2086 = vmatprep.subr.bf16.mxu1 %v3344_v50 }
 0x116   : > { %2272 = vmatprep.subr.bf16.mxu0 %v3347_v51 }
 0x118   : > { %2087 = vmatpush1.bf16.msra.mxu1 %v3342_v52 }
 0x119   : > { %2273 = vmatpush1.bf16.msra.mxu0 %v3345_v53 }
 0x11b   : > { %2089 = vmatmul.mubr.bf16.vlgmr.msra.gmra.mrb[0].mxu1 %v2825_v58 }
 0x11c   : > { %2275 = vmatmul.mubr.bf16.vlgmr.msra.gmra.mrb[0].mxu0 %v2829_v59  ;;  %2098 = vmatprep.mubr.bf16.mxu1 %v2834_v60 }
 0x11d   : > { %2284 = vmatprep.mubr.bf16.mxu0 %v2838_v61 }
 0x123   : > { %2099 = vmatmul.mubr.bf16.gmra.mrb[4].mxu1 %v2833_v2 }
 0x124   : > { %2285 = vmatmul.mubr.bf16.gmra.mrb[4].mxu0 %v2837_v3  ;;  %2108 = vmatprep.mubr.bf16.mxu1 %v2842_v4 }
 0x125   : > { %2294 = vmatprep.mubr.bf16.mxu0 %v2846_v5 }
 0x12b   : > { %2109 = vmatmul.mubr.bf16.gmra.mrb[8].mxu1 %v2841_v10 }
 0x12c   : > { %2295 = vmatmul.mubr.bf16.gmra.mrb[8].mxu0 %v2845_v11  ;;  %2118 = vmatprep.mubr.bf16.mxu1 %v2850_v12 }
 0x12d   : > { %2304 = vmatprep.mubr.bf16.mxu0 %v2854_v13 }
 0x133   : > { %2119 = vmatmul.mubr.bf16.gmra.mrb[12].mxu1 %v2849_v18 }
 0x134   : > { %2305 = vmatmul.mubr.bf16.gmra.mrb[12].mxu0 %v2853_v19  ;;  %2128 = vmatprep.mubr.bf16.mxu1 %v2858_v20 }
 0x135   : > { %2314 = vmatprep.mubr.bf16.mxu0 %v2862_v21 }
 0x13b   : > { %2129 = vmatmul.mubr.bf16.gmra.mrb[16].mxu1 %v2857_v26 }
 0x13c   : > { %2315 = vmatmul.mubr.bf16.gmra.mrb[16].mxu0 %v2861_v27  ;;  %2138 = vmatprep.mubr.bf16.mxu1 %v2866_v28 }
 0x13d   : > { %2324 = vmatprep.mubr.bf16.mxu0 %v2870_v29 }
 0x143   : > { %2139 = vmatmul.mubr.bf16.gmra.mrb[20].mxu1 %v2865_v30 }
 0x144   : > { %2325 = vmatmul.mubr.bf16.gmra.mrb[20].mxu0 %v2869_v31 }
 0x1ee   : > { %v2090_v39 = vpop.f32.mrb[0].mxu1 }
 0x1ef   : > { %v2276_v40 = vpop.f32.mrb[0].mxu0  ;;  %v2092_v44 = vpop.f32.mrb[1].mxu1 }
 0x1f0   : > { %v3031_v42 = vadd.f32 %v2276_v40, %v2090_v39  ;;  %v2278_v45 = vpop.f32.mrb[1].mxu0  ;;  %v2094_v48 = vpop.f32.mrb[2].mxu1 }
 0x1f1   : > { %v3032_v46 = vadd.f32 %v2278_v45, %v2092_v44  ;;  %v2280_v49 = vpop.f32.mrb[2].mxu0  ;;  %v2096_v52 = vpop.f32.mrb[3].mxu1 }
 0x1f2   : > { %v2422_v50 = vmul.f32 %v3031_v42, %v4181_v38  ;;  %v3033_v51 = vadd.f32 %v2280_v49, %v2094_v48  ;;  %v2282_v53 = vpop.f32.mrb[3].mxu0 }
 0x1f3   : > { %v2423_v54 = vmul.f32 %v3032_v46, %v4183_v41  ;;  %v3034_v55 = vadd.f32 %v2282_v53, %v2096_v52 }
 0x1f4   : > { %v2458_v56 = vadd.f32 %v4185_v43, %v2422_v50  ;;  %v2424_v57 = vmul.f32 %v3033_v51, %v4181_v38 }
 0x1f5   : > { %v2459_v58 = vadd.f32 %v4187_v47, %v2423_v54  ;;  %v2425_v59 = vmul.f32 %v3034_v55, %v4183_v41 }
 0x1f6   : > { %v2482_v60 = vmax.f32 %v2458_v56, 0.0  ;;  %v2460_v61 = vadd.f32 %v4185_v43, %v2424_v57  ;;  %v2100_v0 = vpop.f32.mrb[4].mxu1 }
 0x1f7   : > { %v2483_v62 = vmax.f32 %v2459_v58, 0.0  ;;  %v2461_v63 = vadd.f32 %v4187_v47, %v2425_v59  ;;  %v2286_v1 = vpop.f32.mrb[4].mxu0  ;;  %v2102_v4 = vpop.f32.mrb[5].mxu1 }
 0x1f8   : > { %v2484_v2 = vmax.f32 %v2460_v61, 0.0  ;;  %v3035_v3 = vadd.f32 %v2286_v1, %v2100_v0  ;;  %v2288_v5 = vpop.f32.mrb[5].mxu0  ;;  %v2104_v9 = vpop.f32.mrb[6].mxu1 }
 0x1f9   : > { %v3018_v6 = vpack.c.bf16 %v2483_v62, %v2482_v60  ;;  %v2485_v7 = vmax.f32 %v2461_v63, 0.0  ;;  %v3036_v8 = vadd.f32 %v2288_v5, %v2102_v4  ;;  %v2290_v10 = vpop.f32.mrb[6].mxu0  ;;  %v2106_v13 = vpop.f32.mrb[7].mxu1 }
 0x1fa   : > { %v2426_v11 = vmul.f32 %v3035_v3, %v4181_v38  ;;  %v3037_v12 = vadd.f32 %v2290_v10, %v2104_v9  ;;  %v2292_v14 = vpop.f32.mrb[7].mxu0 }
 0x1fb   : > { %2578 = vst [vmem:[%s4199_s29] sm:$0xff] %v3018_v6  ;;  %v3019_v15 = vpack.c.bf16 %v2485_v7, %v2484_v2  ;;  %v2427_v16 = vmul.f32 %v3036_v8, %v4183_v41  ;;  %v3038_v17 = vadd.f32 %v2292_v14, %v2106_v13 }
 0x1fc   : > { %v2462_v18 = vadd.f32 %v4185_v43, %v2426_v11  ;;  %v2428_v19 = vmul.f32 %v3037_v12, %v4181_v38 }
 0x1fd   : > { %2579 = vst [vmem:[%s4199_s29 + $0x8] sm:$0xff] %v3019_v15  ;;  %v2463_v20 = vadd.f32 %v4187_v47, %v2427_v16  ;;  %v2429_v21 = vmul.f32 %v3038_v17, %v4183_v41 }
 0x1fe   : > { %v2486_v22 = vmax.f32 %v2462_v18, 0.0  ;;  %v2464_v23 = vadd.f32 %v4185_v43, %v2428_v19  ;;  %v2110_v26 = vpop.f32.mrb[8].mxu1 }
 0x1ff   : > { %v2487_v24 = vmax.f32 %v2463_v20, 0.0  ;;  %v2465_v25 = vadd.f32 %v4187_v47, %v2429_v21  ;;  %v2296_v27 = vpop.f32.mrb[8].mxu0  ;;  %v2112_v30 = vpop.f32.mrb[9].mxu1 }
 0x200   : > { %v2488_v28 = vmax.f32 %v2464_v23, 0.0  ;;  %v3039_v29 = vadd.f32 %v2296_v27, %v2110_v26  ;;  %v2298_v31 = vpop.f32.mrb[9].mxu0  ;;  %v2114_v35 = vpop.f32.mrb[10].mxu1 }
 0x201   : > { %v3020_v32 = vpack.c.bf16 %v2487_v24, %v2486_v22  ;;  %v2489_v33 = vmax.f32 %v2465_v25, 0.0  ;;  %v3040_v34 = vadd.f32 %v2298_v31, %v2112_v30  ;;  %v2300_v36 = vpop.f32.mrb[10].mxu0  ;;  %v2116_v40 = vpop.f32.mrb[11].mxu1 }
 0x202   : > { %v2430_v37 = vmul.f32 %v3039_v29, %v4181_v38  ;;  %v3041_v39 = vadd.f32 %v2300_v36, %v2114_v35  ;;  %v2302_v42 = vpop.f32.mrb[11].mxu0 }
 0x203   : > { %2580 = vst [vmem:[%s4199_s29 + $0x10] sm:$0xff] %v3020_v32  ;;  %v3021_v44 = vpack.c.bf16 %v2489_v33, %v2488_v28  ;;  %v2431_v45 = vmul.f32 %v3040_v34, %v4183_v41  ;;  %v3042_v46 = vadd.f32 %v2302_v42, %v2116_v40 }
 0x204   : > { %v2466_v48 = vadd.f32 %v4185_v43, %v2430_v37  ;;  %v2432_v49 = vmul.f32 %v3041_v39, %v4181_v38 }
 0x205   : > { %2581 = vst [vmem:[%s4199_s29 + $0x18] sm:$0xff] %v3021_v44  ;;  %v2467_v50 = vadd.f32 %v4187_v47, %v2431_v45  ;;  %v2433_v51 = vmul.f32 %v3042_v46, %v4183_v41 }
 0x206   : > { %v2490_v52 = vmax.f32 %v2466_v48, 0.0  ;;  %v2468_v53 = vadd.f32 %v4185_v43, %v2432_v49  ;;  %v2120_v56 = vpop.f32.mrb[12].mxu1 }
 0x207   : > { %v2491_v54 = vmax.f32 %v2467_v50, 0.0  ;;  %v2469_v55 = vadd.f32 %v4187_v47, %v2433_v51  ;;  %v2306_v57 = vpop.f32.mrb[12].mxu0  ;;  %v2122_v60 = vpop.f32.mrb[13].mxu1 }
 0x208   : > { %v2492_v58 = vmax.f32 %v2468_v53, 0.0  ;;  %v3043_v59 = vadd.f32 %v2306_v57, %v2120_v56  ;;  %v2308_v61 = vpop.f32.mrb[13].mxu0  ;;  %v2124_v1 = vpop.f32.mrb[14].mxu1 }
 0x209   : > { %v3022_v62 = vpack.c.bf16 %v2491_v54, %v2490_v52  ;;  %v2493_v63 = vmax.f32 %v2469_v55, 0.0  ;;  %v3044_v0 = vadd.f32 %v2308_v61, %v2122_v60  ;;  %v2310_v2 = vpop.f32.mrb[14].mxu0  ;;  %v2126_v5 = vpop.f32.mrb[15].mxu1 }
 0x20a   : > { %v2434_v3 = vmul.f32 %v3043_v59, %v4181_v38  ;;  %v3045_v4 = vadd.f32 %v2310_v2, %v2124_v1  ;;  %v2312_v6 = vpop.f32.mrb[15].mxu0 }
 0x20b   : > { %2582 = vst [vmem:[%s4199_s29 + $0x20] sm:$0xff] %v3022_v62  ;;  %v3023_v7 = vpack.c.bf16 %v2493_v63, %v2492_v58  ;;  %v2435_v8 = vmul.f32 %v3044_v0, %v4183_v41  ;;  %v3046_v9 = vadd.f32 %v2312_v6, %v2126_v5 }
 0x20c   : > { %v2470_v10 = vadd.f32 %v4185_v43, %v2434_v3  ;;  %v2436_v11 = vmul.f32 %v3045_v4, %v4181_v38 }
 0x20d   : > { %2583 = vst [vmem:[%s4199_s29 + $0x28] sm:$0xff] %v3023_v7  ;;  %v2471_v12 = vadd.f32 %v4187_v47, %v2435_v8  ;;  %v2437_v13 = vmul.f32 %v3046_v9, %v4183_v41 }
 0x20e   : > { %v2494_v14 = vmax.f32 %v2470_v10, 0.0  ;;  %v2472_v15 = vadd.f32 %v4185_v43, %v2436_v11  ;;  %v2130_v18 = vpop.f32.mrb[16].mxu1 }
 0x20f   : > { %v2495_v16 = vmax.f32 %v2471_v12, 0.0  ;;  %v2473_v17 = vadd.f32 %v4187_v47, %v2437_v13  ;;  %v2316_v19 = vpop.f32.mrb[16].mxu0  ;;  %v2132_v22 = vpop.f32.mrb[17].mxu1 }
 0x210   : > { %v2496_v20 = vmax.f32 %v2472_v15, 0.0  ;;  %v3047_v21 = vadd.f32 %v2316_v19, %v2130_v18  ;;  %v2318_v23 = vpop.f32.mrb[17].mxu0  ;;  %v2134_v27 = vpop.f32.mrb[18].mxu1 }
 0x211   : > { %v3024_v24 = vpack.c.bf16 %v2495_v16, %v2494_v14  ;;  %v2497_v25 = vmax.f32 %v2473_v17, 0.0  ;;  %v3048_v26 = vadd.f32 %v2318_v23, %v2132_v22  ;;  %v2320_v28 = vpop.f32.mrb[18].mxu0  ;;  %v2136_v31 = vpop.f32.mrb[19].mxu1 }
 0x212   : > { %v2438_v29 = vmul.f32 %v3047_v21, %v4181_v38  ;;  %v3049_v30 = vadd.f32 %v2320_v28, %v2134_v27  ;;  %v2322_v32 = vpop.f32.mrb[19].mxu0  ;;  %v2657_v14 = vld [vmem:[%s4199_s29 + $0x20] sm:$0xff] (%p4298_p5) }
 0x213   : > { %2584 = vst [vmem:[%s4199_s29 + $0x30] sm:$0xff] %v3024_v24  ;;  %v3025_v33 = vpack.c.bf16 %v2497_v25, %v2496_v20  ;;  %v2439_v34 = vmul.f32 %v3048_v26, %v4183_v41  ;;  %v3050_v35 = vadd.f32 %v2322_v32, %v2136_v31  ;;  %2658 = vst [vmem:[%s2599_s6 + $0x40] sm:$0xff] (%p4298_p5), %v2657_v14 }
 0x214   : > { %v2474_v36 = vadd.f32 %v4185_v43, %v2438_v29  ;;  %v2440_v37 = vmul.f32 %v3049_v30, %v4181_v38  ;;  %v2659_v15 = vld [vmem:[%s4199_s29 + $0x28] sm:$0xff] (%p4298_p5) }
 0x215   : > { %2585 = vst [vmem:[%s4199_s29 + $0x38] sm:$0xff] %v3025_v33  ;;  %v2475_v39 = vadd.f32 %v4187_v47, %v2439_v34  ;;  %v2441_v40 = vmul.f32 %v3050_v35, %v4183_v41  ;;  %2660 = vst [vmem:[%s2599_s6 + $0x50] sm:$0xff] (%p4298_p5), %v2659_v15 }
 0x216   : > { %v2498_v42 = vmax.f32 %v2474_v36, 0.0  ;;  %v2476_v44 = vadd.f32 %v4185_v43, %v2440_v37  ;;  %v2140_v48 = vpop.f32.mrb[20].mxu1 }
 0x217   : > { %v2499_v45 = vmax.f32 %v2475_v39, 0.0  ;;  %v2477_v46 = vadd.f32 %v4187_v47, %v2441_v40  ;;  %v2326_v49 = vpop.f32.mrb[20].mxu0  ;;  %v2142_v52 = vpop.f32.mrb[21].mxu1 }
 0x218   : > { %v2500_v50 = vmax.f32 %v2476_v44, 0.0  ;;  %v3051_v51 = vadd.f32 %v2326_v49, %v2140_v48  ;;  %v2328_v53 = vpop.f32.mrb[21].mxu0  ;;  %v2144_v57 = vpop.f32.mrb[22].mxu1 }
 0x219   : > { %v3026_v54 = vpack.c.bf16 %v2499_v45, %v2498_v42  ;;  %v2501_v55 = vmax.f32 %v2477_v46, 0.0  ;;  %v3052_v56 = vadd.f32 %v2328_v53, %v2142_v52  ;;  %v2330_v58 = vpop.f32.mrb[22].mxu0  ;;  %v2146_v61 = vpop.f32.mrb[23].mxu1 }
 0x21a   : > { %v2442_v59 = vmul.f32 %v3051_v51, %v4181_v38  ;;  %v3053_v60 = vadd.f32 %v2330_v58, %v2144_v57  ;;  %v2332_v62 = vpop.f32.mrb[23].mxu0  ;;  %v2661_v16 = vld [vmem:[%s4199_s29 + $0x30] sm:$0xff] (%p4298_p5) }
 0x21b   : > { %2586 = vst [vmem:[%s4199_s29 + $0x40] sm:$0xff] %v3026_v54  ;;  %v3027_v63 = vpack.c.bf16 %v2501_v55, %v2500_v50  ;;  %v2443_v0 = vmul.f32 %v3052_v56, %v4183_v41  ;;  %v3054_v1 = vadd.f32 %v2332_v62, %v2146_v61  ;;  %2662 = vst [vmem:[%s2599_s6 + $0x60] sm:$0xff] (%p4298_p5), %v2661_v16 }
 0x21c   : > { %v2478_v2 = vadd.f32 %v4185_v43, %v2442_v59  ;;  %v2444_v3 = vmul.f32 %v3053_v60, %v4181_v38  ;;  %v2649_v38 = vld [vmem:[%s4199_s29] sm:$0xff] (%p4298_p5)  ;;  %v2663_v17 = vld [vmem:[%s4199_s29 + $0x38] sm:$0xff] (%p4298_p5) }
 0x21d   : > { %2587 = vst [vmem:[%s4199_s29 + $0x48] sm:$0xff] %v3027_v63  ;;  %v2479_v4 = vadd.f32 %v4187_v47, %v2443_v0  ;;  %v2445_v5 = vmul.f32 %v3054_v1, %v4183_v41  ;;  %v2651_v41 = vld [vmem:[%s4199_s29 + $0x8] sm:$0xff] (%p4298_p5)  ;;  %2650 = vst [vmem:[%s2599_s6] sm:$0xff] (%p4298_p5), %v2649_v38 }
 0x21e   : > { %v2502_v6 = vmax.f32 %v2478_v2, 0.0  ;;  %v2480_v7 = vadd.f32 %v4185_v43, %v2444_v3  ;;  %v2653_v43 = vld [vmem:[%s4199_s29 + $0x10] sm:$0xff] (%p4298_p5)  ;;  %2652 = vst [vmem:[%s2599_s6 + $0x10] sm:$0xff] (%p4298_p5), %v2651_v41  ;;  %2664 = vst [vmem:[%s2599_s6 + $0x70] sm:$0xff] (%p4298_p5), %v2663_v17 }
 0x21f   : > { %v2503_v8 = vmax.f32 %v2479_v4, 0.0  ;;  %v2481_v9 = vadd.f32 %v4187_v47, %v2445_v5  ;;  %2596 = sbr.rel (!%p4298_p5) target bundleno = 558 (0x22e), region = 94  ;;  %v2655_v47 = vld [vmem:[%s4199_s29 + $0x18] sm:$0xff] (%p4298_p5)  ;;  %2654 = vst [vmem:[%s2599_s6 + $0x20] sm:$0xff] (%p4298_p5), %v2653_v43 }
 0x220   : > { %v2504_v10 = vmax.f32 %v2480_v7, 0.0  ;;  %2656 = vst [vmem:[%s2599_s6 + $0x30] sm:$0xff] (%p4298_p5), %v2655_v47 }
 0x221   : > { %v3028_v11 = vpack.c.bf16 %v2503_v8, %v2502_v6  ;;  %v2505_v12 = vmax.f32 %v2481_v9, 0.0 }
 0x222   : > { %v2665_v18 = vld [vmem:[%s4199_s29 + $0x40] sm:$0xff] (%p4298_p5) }
 0x223   : > { %2588 = vst [vmem:[%s4199_s29 + $0x50] sm:$0xff] %v3028_v11  ;;  %v3029_v13 = vpack.c.bf16 %v2505_v12, %v2504_v10  ;;  %2666 = vst [vmem:[%s2599_s6 + $0x80] sm:$0xff] (%p4298_p5), %v2665_v18 }
 0x224   : > { %v2667_v19 = vld [vmem:[%s4199_s29 + $0x48] sm:$0xff] (%p4298_p5) }
 0x225   : > { %2589 = vst [vmem:[%s4199_s29 + $0x58] sm:$0xff] %v3029_v13  ;;  %2668 = vst [vmem:[%s2599_s6 + $0x90] sm:$0xff] (%p4298_p5), %v2667_v19 }
 0x22a   : > { %v2669_v20 = vld [vmem:[%s4199_s29 + $0x50] sm:$0xff] }
 0x22b   : > { %2670 = vst [vmem:[%s2599_s6 + $0xa0] sm:$0xff] %v2669_v20 }
 0x22c   : > { %v2671_v21 = vld [vmem:[%s4199_s29 + $0x58] sm:$0xff] }
 0x22d   : > { %2672 = vst [vmem:[%s2599_s6 + $0xb0] sm:$0xff] %v2671_v21 }
 0x22e PF: > { %s20_s20 = sadd.s32 1, %s3458_s20   ;;  %s4299_s15 = smov %s3442_s16 }
 0x22f   : > { %p17_p6 = scmp.ge.s32.totalorder %s20_s20, 4   ;;  %s4300_s16 = smov %s3446_s17 }
 0x230   : > { %s4301_s17 = smov %s3535_s27  ;;  %s4302_s18 = smov %s3454_s19 }
 0x231   : > { %s4303_s19 = smov %s4305_s22  ;;  %19 = sbr.rel (!%p17_p6) target bundleno = 6 (0x6), region = 184 }
 0x238   :  { %2688 = vsyncpa [#allocation5], 1 }
 0x239   :  { %2690 = vsyncpa [#allocation5 + $0x1], 1 }
 0x23a   :  { %2691 = vsyncpa [#allocation7], 1 }
 0x23b   :  { %2693 = vsyncpa [#allocation7 + $0x1], 1 }

// kernel: feature_regression_forward.6
= control target key start
LH: loop header
LB: loop body
LE: loop exit
PB: predicated region body
PF: predicated region fallthrough
CT: control target
= control target key end

     0   :  { %s2088_s15 = smov 0   ;;  %s2090_s16 = smov 0   ;;  %s2330_s0 = inlined_call_operand.vmem [shape: bf16[24,8192], index: 0, kind: input, shape index: {}]   ;;  %s2331_s1 = inlined_call_operand.vmem [shape: bf16[8192,256], index: 1, kind: input, shape index: {}]   ;;  %s2332_s2 = inlined_call_operand.vmem [shape: f32[1,256], index: 2, kind: input, shape index: {}]   ;;  %s2333_s3 = inlined_call_operand.vmem [shape: f32[1,256], index: 3, kind: input, shape index: {}]   ;;  %s2334_s4 = inlined_call_operand.vmem [shape: bf16[24,256], index: 4, kind: output, shape index: {}]  }
   0x1   :  { %s2092_s17 = smov 0   ;;  %s2094_s18 = smov 0  }
   0x2   :  { %s2096_s19 = smov 0  }
   0x3 LB: > { %s23_s20 = sadd.s32 1, %s2056_s18  ;;  %p40_p1 = scmp.ne.s32.totalorder %s2048_s16, %s2044_s15  ;;  %s2060_s19 = sphi %s2096_s19, %s14_s19   ;;  %s2056_s18 = sphi %s2094_s18, %s2338_s18   ;;  %s2052_s17 = sphi %s2092_s17, %s2337_s17   ;;  %s2048_s16 = sphi %s2090_s16, %s2336_s16   ;;  %s2044_s15 = sphi %s2088_s15, %s2335_s15  }
   0x4   : > { %p24_p0 = scmp.ge.s32.totalorder %s23_s20, 8  ;;  %p41_p2 = scmp.eq.s32.totalorder %s2060_s19, 0 }
   0x5   : > { %s33_s22 = sadd.s32 1, %s2048_s16  ;;  %p1602_p5 = scmp.ge.s32.totalorder %s2060_s19, 8 }
   0x6   : > { %s2340_s20 = smov (%p24_p0, %s23_s20), 0  ;;  %p42_p3 = por %p41_p2, %p40_p1 }
   0x7   : > { %s30_s21 = ssub.s32 %s2056_s18, %s2340_s20  ;;  %188 = sbr.rel (%p1602_p5) target bundleno = 25 (0x19), region = 24 }
   0x8   : > { %p31_p4 = scmp.eq.s32.totalorder %s30_s21, 0 }
   0xa   : > { %s2123_s23 = scalar_select %p31_p4, %s2048_s16, %s33_s22  }
   0xe   : > { %191 = sbr.rel (!%p42_p3) target bundleno = 25 (0x19), region = 28  ;;  %s193_s24 = sand.u32 (%p42_p3), 1, %s2048_s16  }
   0xf   : > { %s1762_s25 = sshll.u32 (%p42_p3), %s2056_s18, 5  ;;  %s1779_s26 = smul.u32 (%p42_p3), 96, %s193_s24 }
  0x10   : > { %s198_s29 = scalar_lea.vmem (%p42_p3), %s2330_s0, %s1762_s25 }
  0x11   : > { %v211_v0 = vld [vmem:[%s198_s29] sm:$0xff] (%p42_p3)  ;;  %v213_v1 = vld [vmem:[%s198_s29 + $0x8] sm:$0xff] (%p42_p3)  ;;  %v215_v2 = vld [vmem:[%s198_s29 + $0x10] sm:$0xff] (%p42_p3)  ;;  %s195_s30 = scalar_lea.vmem (%p42_p3), [#allocation3], %s1779_s26 }
  0x12   : > { %v217_v3 = vld [vmem:[%s198_s29 + $0x18] sm:$0xff] (%p42_p3)  ;;  %v219_v4 = vld [vmem:[%s198_s29 + $0x100] sm:$0xff] (%p42_p3)  ;;  %v221_v5 = vld [vmem:[%s198_s29 + $0x108] sm:$0xff] (%p42_p3)  ;;  %212 = vst [vmem:[%s195_s30] sm:$0xff] (%p42_p3), %v211_v0 }
  0x13   : > { %214 = vst [vmem:[%s195_s30 + $0x8] sm:$0xff] (%p42_p3), %v213_v1  ;;  %216 = vst [vmem:[%s195_s30 + $0x10] sm:$0xff] (%p42_p3), %v215_v2  ;;  %v223_v6 = vld [vmem:[%s198_s29 + $0x110] sm:$0xff] (%p42_p3)  ;;  %v225_v7 = vld [vmem:[%s198_s29 + $0x118] sm:$0xff] (%p42_p3) }
  0x14   : > { %218 = vst [vmem:[%s195_s30 + $0x18] sm:$0xff] (%p42_p3), %v217_v3  ;;  %220 = vst [vmem:[%s195_s30 + $0x20] sm:$0xff] (%p42_p3), %v219_v4  ;;  %v227_v8 = vld [vmem:[%s198_s29 + $0x200] sm:$0xff] (%p42_p3)  ;;  %v229_v9 = vld [vmem:[%s198_s29 + $0x208] sm:$0xff] (%p42_p3) }
  0x15   : > { %222 = vst [vmem:[%s195_s30 + $0x28] sm:$0xff] %v221_v5  ;;  %224 = vst [vmem:[%s195_s30 + $0x30] sm:$0xff] %v223_v6  ;;  %v231_v10 = vld [vmem:[%s198_s29 + $0x210] sm:$0xff]  ;;  %v233_v11 = vld [vmem:[%s198_s29 + $0x218] sm:$0xff] }
  0x16   : > { %226 = vst [vmem:[%s195_s30 + $0x38] sm:$0xff] %v225_v7  ;;  %228 = vst [vmem:[%s195_s30 + $0x40] sm:$0xff] %v227_v8 }
  0x17   : > { %230 = vst [vmem:[%s195_s30 + $0x48] sm:$0xff] %v229_v9  ;;  %232 = vst [vmem:[%s195_s30 + $0x50] sm:$0xff] %v231_v10 }
  0x18   : > { %234 = vst [vmem:[%s195_s30 + $0x58] sm:$0xff] %v233_v11 }
  0x19 PF: > { %p1605_p6 = scmp.ge.s32.totalorder %s2060_s19, 1  ;;  %p254_p7 = scmp.lt.s32.totalorder %s2060_s19, 9 }
  0x1b   : > { %p255_p8 = pnand %p1605_p6, %p254_p7 }
  0x1c   : > { %s261_s5 = sand.u32 (!%p255_p8), 1, %s2044_s15   ;;  %s1606_s6 = sshll.u32 (!%p255_p8), %s2052_s17, 7 }
  0x1d   : > { %258 = sbr.rel (%p255_p8) target bundleno = 418 (0x1a2), region = 55  ;;  %p307_p9 = scmp.lt.s32.totalorder (!%p255_p8), %s1606_s6, 1023 }
  0x1e   : > { %s1780_s7 = smul.u32 (!%p255_p8), 96, %s261_s5  ;;  %p1609_p10 = scmp.ne.s32.totalorder (!%p255_p8), %s2052_s17, 0 }
  0x20   : > { %s2140_s12 = scalar_lea.vmem (!%p255_p8), [#allocation3], %s1780_s7 }
  0x24   : > { %s2342_s6 = smov (!%p307_p9, %s1606_s6), 1023  ;;  %336 = sbr.rel (%p1609_p10) target bundleno = 43 (0x2b), region = 63 }
  0x25   : > { %s1763_s8 = sshll.u32 %s2342_s6, 3  ;;  %v2062_v12 = vmov (!%p1609_p10), 0.0  }
  0x26   : > { %s2138_s11 = scalar_lea.vmem %s2331_s1, %s1763_s8  ;;  %337 = vst [vmem:[#allocation2] sm:$0xff] (!%p1609_p10), %v2062_v12  ;;  %338 = vst [vmem:[#allocation2 + $0x8] sm:$0xff] (!%p1609_p10), %v2062_v12 }
  0x27   : > { %339 = vst [vmem:[#allocation2 + $0x10] sm:$0xff] (!%p1609_p10), %v2062_v12  ;;  %340 = vst [vmem:[#allocation2 + $0x18] sm:$0xff] (!%p1609_p10), %v2062_v12 }
  0x28   : > { %341 = vst [vmem:[#allocation2 + $0x20] sm:$0xff] (!%p1609_p10), %v2062_v12  ;;  %342 = vst [vmem:[#allocation2 + $0x28] sm:$0xff] (!%p1609_p10), %v2062_v12 }
  0x2b PF: > { %v1822_v13 = vld [vmem:[%s2138_s11 + $0x4] ss:$8 sps:$4 sm:$0xff]   ;;  %v1826_v15 = vld [vmem:[%s2138_s11] ss:$8 sps:$4 sm:$0xff]   ;;  %v1828_v17 = vld [vmem:[%s2138_s11 + $0x14] ss:$8 sps:$4 sm:$0xff]  }
  0x2c   : > { %v1824_v14 = vld [vmem:[%s2138_s11 + $0x204] ss:$8 sps:$4 sm:$0xff]   ;;  %1197 = vmatprep.subr.bf16.mxu1 %v1822_v13  ;;  %v1827_v16 = vld [vmem:[%s2138_s11 + $0x200] ss:$8 sps:$4 sm:$0xff]   ;;  %v1830_v18 = vld [vmem:[%s2138_s11 + $0x214] ss:$8 sps:$4 sm:$0xff]  }
  0x2d   : > { %1299 = vmatprep.subr.bf16.mxu0 %v1824_v14  ;;  %1198 = vmatpush1.bf16.msra.mxu1 %v1826_v15  ;;  %v1832_v19 = vld [vmem:[%s2138_s11 + $0x10] ss:$8 sps:$4 sm:$0xff]   ;;  %v1834_v21 = vld [vmem:[%s2138_s11 + $0x24] ss:$8 sps:$4 sm:$0xff]   ;;  %v1838_v23 = vld [vmem:[%s2138_s11 + $0x20] ss:$8 sps:$4 sm:$0xff]  }
  0x2e   : > { %1300 = vmatpush1.bf16.msra.mxu0 %v1827_v16  ;;  %1199 = vmatprep.subr.bf16.mxu1 %v1828_v17  ;;  %v1833_v20 = vld [vmem:[%s2138_s11 + $0x210] ss:$8 sps:$4 sm:$0xff]   ;;  %v1836_v22 = vld [vmem:[%s2138_s11 + $0x224] ss:$8 sps:$4 sm:$0xff]   ;;  %v1839_v24 = vld [vmem:[%s2138_s11 + $0x220] ss:$8 sps:$4 sm:$0xff]  }
  0x2f   : > { %1301 = vmatprep.subr.bf16.mxu0 %v1830_v18  ;;  %v1840_v25 = vld [vmem:[%s2138_s11 + $0x34] ss:$8 sps:$4 sm:$0xff]   ;;  %v1844_v27 = vld [vmem:[%s2138_s11 + $0x30] ss:$8 sps:$4 sm:$0xff]   ;;  %v1846_v29 = vld [vmem:[%s2138_s11 + $0x44] ss:$8 sps:$4 sm:$0xff]  }
  0x30   : > { %v1842_v26 = vld [vmem:[%s2138_s11 + $0x234] ss:$8 sps:$4 sm:$0xff]   ;;  %v1845_v28 = vld [vmem:[%s2138_s11 + $0x230] ss:$8 sps:$4 sm:$0xff]   ;;  %v1848_v30 = vld [vmem:[%s2138_s11 + $0x244] ss:$8 sps:$4 sm:$0xff]  }
  0x31   : > { %1200 = vmatpush1.bf16.msra.mxu1 %v1832_v19  ;;  %v1850_v31 = vld [vmem:[%s2138_s11 + $0x40] ss:$8 sps:$4 sm:$0xff]   ;;  %v1852_v33 = vld [vmem:[%s2138_s11 + $0x54] ss:$8 sps:$4 sm:$0xff]   ;;  %v1856_v35 = vld [vmem:[%s2138_s11 + $0x50] ss:$8 sps:$4 sm:$0xff]  }
  0x32   : > { %1302 = vmatpush1.bf16.msra.mxu0 %v1833_v20  ;;  %1201 = vmatprep.subr.bf16.mxu1 %v1834_v21  ;;  %v1851_v32 = vld [vmem:[%s2138_s11 + $0x240] ss:$8 sps:$4 sm:$0xff]   ;;  %v1854_v34 = vld [vmem:[%s2138_s11 + $0x254] ss:$8 sps:$4 sm:$0xff]   ;;  %v1857_v36 = vld [vmem:[%s2138_s11 + $0x250] ss:$8 sps:$4 sm:$0xff]  }
  0x33   : > { %1303 = vmatprep.subr.bf16.mxu0 %v1836_v22  ;;  %v1858_v37 = vld [vmem:[%s2138_s11 + $0x64] ss:$8 sps:$4 sm:$0xff]   ;;  %v1862_v39 = vld [vmem:[%s2138_s11 + $0x60] ss:$8 sps:$4 sm:$0xff]   ;;  %v1864_v41 = vld [vmem:[%s2138_s11 + $0x74] ss:$8 sps:$4 sm:$0xff]  }
  0x34   : > { %v1860_v38 = vld [vmem:[%s2138_s11 + $0x264] ss:$8 sps:$4 sm:$0xff]   ;;  %v1863_v40 = vld [vmem:[%s2138_s11 + $0x260] ss:$8 sps:$4 sm:$0xff]   ;;  %v1866_v42 = vld [vmem:[%s2138_s11 + $0x274] ss:$8 sps:$4 sm:$0xff]  }
  0x35   : > { %1202 = vmatpush1.bf16.msra.mxu1 %v1838_v23  ;;  %v1868_v43 = vld [vmem:[%s2138_s11 + $0x70] ss:$8 sps:$4 sm:$0xff]   ;;  %v1870_v45 = vld [vmem:[%s2138_s11 + $0x84] ss:$8 sps:$4 sm:$0xff]   ;;  %v1874_v47 = vld [vmem:[%s2138_s11 + $0x80] ss:$8 sps:$4 sm:$0xff]  }
  0x36   : > { %1304 = vmatpush1.bf16.msra.mxu0 %v1839_v24  ;;  %1203 = vmatprep.subr.bf16.mxu1 %v1840_v25  ;;  %v1869_v44 = vld [vmem:[%s2138_s11 + $0x270] ss:$8 sps:$4 sm:$0xff]   ;;  %v1872_v46 = vld [vmem:[%s2138_s11 + $0x284] ss:$8 sps:$4 sm:$0xff]   ;;  %v1875_v48 = vld [vmem:[%s2138_s11 + $0x280] ss:$8 sps:$4 sm:$0xff]  }
  0x37   : > { %1305 = vmatprep.subr.bf16.mxu0 %v1842_v26  ;;  %v1876_v49 = vld [vmem:[%s2138_s11 + $0x94] ss:$8 sps:$4 sm:$0xff]   ;;  %v1880_v51 = vld [vmem:[%s2138_s11 + $0x90] ss:$8 sps:$4 sm:$0xff]   ;;  %v1882_v53 = vld [vmem:[%s2138_s11 + $0xa4] ss:$8 sps:$4 sm:$0xff]  }
  0x38   : > { %v1878_v50 = vld [vmem:[%s2138_s11 + $0x294] ss:$8 sps:$4 sm:$0xff]   ;;  %v1881_v52 = vld [vmem:[%s2138_s11 + $0x290] ss:$8 sps:$4 sm:$0xff]   ;;  %v1884_v54 = vld [vmem:[%s2138_s11 + $0x2a4] ss:$8 sps:$4 sm:$0xff]  }
  0x39   : > { %1204 = vmatpush1.bf16.msra.mxu1 %v1844_v27  ;;  %v1886_v55 = vld [vmem:[%s2138_s11 + $0xa0] ss:$8 sps:$4 sm:$0xff]   ;;  %v1888_v57 = vld [vmem:[%s2138_s11 + $0xb4] ss:$8 sps:$4 sm:$0xff]   ;;  %v1892_v59 = vld [vmem:[%s2138_s11 + $0xb0] ss:$8 sps:$4 sm:$0xff]  }
  0x3a   : > { %1306 = vmatpush1.bf16.msra.mxu0 %v1845_v28  ;;  %1205 = vmatprep.subr.bf16.mxu1 %v1846_v29  ;;  %v1887_v56 = vld [vmem:[%s2138_s11 + $0x2a0] ss:$8 sps:$4 sm:$0xff]   ;;  %v1890_v58 = vld [vmem:[%s2138_s11 + $0x2b4] ss:$8 sps:$4 sm:$0xff]   ;;  %v1893_v60 = vld [vmem:[%s2138_s11 + $0x2b0] ss:$8 sps:$4 sm:$0xff]  }
  0x3b   : > { %1307 = vmatprep.subr.bf16.mxu0 %v1848_v30  ;;  %v349_v61 = vld [vmem:[%s2140_s12] sm:$0xff]  ;;  %v1894_v63 = vld [vmem:[%s2138_s11 + $0xc4] ss:$8 sps:$4 sm:$0xff]   ;;  %v1898_v5 = vld [vmem:[%s2138_s11 + $0xc0] ss:$8 sps:$4 sm:$0xff]   ;;  %p1754_p11 = scmp.ne.s32.totalorder %s2052_s17, 7 }
  0x3c   : > { %v353_v62 = vld [vmem:[%s2140_s12 + $0x20] sm:$0xff]  ;;  %v1896_v0 = vld [vmem:[%s2138_s11 + $0x2c4] ss:$8 sps:$4 sm:$0xff]   ;;  %v1899_v6 = vld [vmem:[%s2138_s11 + $0x2c0] ss:$8 sps:$4 sm:$0xff]  }
  0x3d   : > { %1206 = vmatpush1.bf16.msra.mxu1 %v1850_v31  ;;  %v1611_v1 = vcombine.high %v349_v61, %v353_v62  ;;  %v351_v2 = vld [vmem:[%s2140_s12 + $0x10] sm:$0xff]  ;;  %v1900_v7 = vld [vmem:[%s2138_s11 + $0xd4] ss:$8 sps:$4 sm:$0xff]   ;;  %v1904_v9 = vld [vmem:[%s2138_s11 + $0xd0] ss:$8 sps:$4 sm:$0xff]   ;;  %v1610_v21 = vcombine.low %v349_v61, %v353_v62 }
  0x3e   : > { %1308 = vmatpush1.bf16.msra.mxu0 %v1851_v32  ;;  %1207 = vmatprep.subr.bf16.mxu1 %v1852_v33  ;;  %v355_v3 = vld [vmem:[%s2140_s12 + $0x30] sm:$0xff]  ;;  %v1902_v8 = vld [vmem:[%s2138_s11 + $0x2d4] ss:$8 sps:$4 sm:$0xff]   ;;  %v1905_v10 = vld [vmem:[%s2138_s11 + $0x2d0] ss:$8 sps:$4 sm:$0xff]  }
  0x3f   : > { %1309 = vmatprep.subr.bf16.mxu0 %v1854_v34  ;;  %1229 = vmatprep.mubr.bf16.mxu1 %v1611_v1  ;;  %v1615_v4 = vcombine.high %v351_v2, %v355_v3  ;;  %v1906_v11 = vld [vmem:[%s2138_s11 + $0xe4] ss:$8 sps:$4 sm:$0xff]   ;;  %v1910_v13 = vld [vmem:[%s2138_s11 + $0xe0] ss:$8 sps:$4 sm:$0xff]   ;;  %v1912_v15 = vld [vmem:[%s2138_s11 + $0xf4] ss:$8 sps:$4 sm:$0xff]   ;;  %v1614_v23 = vcombine.low %v351_v2, %v355_v3 }
  0x40   : > { %v1908_v12 = vld [vmem:[%s2138_s11 + $0x2e4] ss:$8 sps:$4 sm:$0xff]   ;;  %v1911_v14 = vld [vmem:[%s2138_s11 + $0x2e0] ss:$8 sps:$4 sm:$0xff]   ;;  %v1914_v16 = vld [vmem:[%s2138_s11 + $0x2f4] ss:$8 sps:$4 sm:$0xff]  }
  0x41   : > { %1208 = vmatpush1.bf16.msra.mxu1 %v1856_v35  ;;  %1331 = vmatprep.mubr.bf16.mxu0 %v1615_v4  ;;  %v1916_v17 = vld [vmem:[%s2138_s11 + $0xf0] ss:$8 sps:$4 sm:$0xff]   ;;  %v1920_v19 = vld [vmem:[%s2138_s11 + $0x104] ss:$8 sps:$4 sm:$0xff]   ;;  %v1918_v22 = vld [vmem:[%s2138_s11 + $0x100] ss:$8 sps:$4 sm:$0xff]  }
  0x42   : > { %1310 = vmatpush1.bf16.msra.mxu0 %v1857_v36  ;;  %1209 = vmatprep.subr.bf16.mxu1 %v1858_v37  ;;  %v1917_v18 = vld [vmem:[%s2138_s11 + $0x2f0] ss:$8 sps:$4 sm:$0xff]   ;;  %v1923_v20 = vld [vmem:[%s2138_s11 + $0x304] ss:$8 sps:$4 sm:$0xff]   ;;  %v1921_v24 = vld [vmem:[%s2138_s11 + $0x300] ss:$8 sps:$4 sm:$0xff]  }
  0x43   : > { %1311 = vmatprep.subr.bf16.mxu0 %v1860_v38  ;;  %v1926_v25 = vld [vmem:[%s2138_s11 + $0x114] ss:$8 sps:$4 sm:$0xff]   ;;  %v1924_v27 = vld [vmem:[%s2138_s11 + $0x110] ss:$8 sps:$4 sm:$0xff]   ;;  %v1932_v29 = vld [vmem:[%s2138_s11 + $0x124] ss:$8 sps:$4 sm:$0xff]  }
  0x44   : > { %v1929_v26 = vld [vmem:[%s2138_s11 + $0x314] ss:$8 sps:$4 sm:$0xff]   ;;  %v1927_v28 = vld [vmem:[%s2138_s11 + $0x310] ss:$8 sps:$4 sm:$0xff]   ;;  %v1935_v30 = vld [vmem:[%s2138_s11 + $0x324] ss:$8 sps:$4 sm:$0xff]  }
  0x45   : > { %1210 = vmatpush1.bf16.msra.mxu1 %v1862_v39  ;;  %v1930_v31 = vld [vmem:[%s2138_s11 + $0x120] ss:$8 sps:$4 sm:$0xff]   ;;  %v1938_v33 = vld [vmem:[%s2138_s11 + $0x134] ss:$8 sps:$4 sm:$0xff]   ;;  %v1936_v35 = vld [vmem:[%s2138_s11 + $0x130] ss:$8 sps:$4 sm:$0xff]  }
  0x46   : > { %1312 = vmatpush1.bf16.msra.mxu0 %v1863_v40  ;;  %1211 = vmatprep.subr.bf16.mxu1 %v1864_v41  ;;  %v1933_v32 = vld [vmem:[%s2138_s11 + $0x320] ss:$8 sps:$4 sm:$0xff]   ;;  %v1941_v34 = vld [vmem:[%s2138_s11 + $0x334] ss:$8 sps:$4 sm:$0xff]   ;;  %v1939_v36 = vld [vmem:[%s2138_s11 + $0x330] ss:$8 sps:$4 sm:$0xff]  }
  0x47   : > { %1313 = vmatprep.subr.bf16.mxu0 %v1866_v42  ;;  %v1944_v37 = vld [vmem:[%s2138_s11 + $0x144] ss:$8 sps:$4 sm:$0xff]   ;;  %v357_v39 = vld [vmem:[%s2140_s12 + $0x40] sm:$0xff]  ;;  %v1942_v40 = vld [vmem:[%s2138_s11 + $0x140] ss:$8 sps:$4 sm:$0xff]  }
  0x48   : > { %v1947_v38 = vld [vmem:[%s2138_s11 + $0x344] ss:$8 sps:$4 sm:$0xff]   ;;  %v1619_v41 = vcombine.high %v357_v39, %v357_v39  ;;  %v1618_v42 = vcombine.low %v357_v39, %v357_v39  ;;  %v1965_v61 = vld [vmem:[%s2138_s11 + $0x374] ss:$8 sps:$4 sm:$0xff]   ;;  %v1966_v3 = vld [vmem:[%s2138_s11 + $0x180] ss:$8 sps:$4 sm:$0xff]  }
  0x49   : > { %1212 = vmatpush1.bf16.msra.mxu1 %v1868_v43  ;;  %v1945_v43 = vld [vmem:[%s2138_s11 + $0x340] ss:$8 sps:$4 sm:$0xff]   ;;  %v1968_v1 = vld [vmem:[%s2138_s11 + $0x184] ss:$8 sps:$4 sm:$0xff]  }
  0x4a   : > { %1314 = vmatpush1.bf16.msra.mxu0 %v1869_v44  ;;  %1213 = vmatprep.subr.bf16.mxu1 %v1870_v45  ;;  %v1950_v44 = vld [vmem:[%s2138_s11 + $0x154] ss:$8 sps:$4 sm:$0xff]   ;;  %v1971_v2 = vld [vmem:[%s2138_s11 + $0x384] ss:$8 sps:$4 sm:$0xff]   ;;  %v1969_v4 = vld [vmem:[%s2138_s11 + $0x380] ss:$8 sps:$4 sm:$0xff]  }
  0x4b   : > { %1315 = vmatprep.subr.bf16.mxu0 %v1872_v46  ;;  %v1953_v45 = vld [vmem:[%s2138_s11 + $0x354] ss:$8 sps:$4 sm:$0xff]   ;;  %v359_v46 = vld [vmem:[%s2140_s12 + $0x50] sm:$0xff] }
  0x4d   : > { %1214 = vmatpush1.bf16.msra.mxu1 %v1874_v47  ;;  %v1623_v47 = vcombine.high %v359_v46, %v359_v46 }
  0x4e   : > { %1316 = vmatpush1.bf16.msra.mxu0 %v1875_v48  ;;  %1215 = vmatprep.subr.bf16.mxu1 %v1876_v49  ;;  %v1622_v48 = vcombine.low %v359_v46, %v359_v46  ;;  %v1948_v49 = vld [vmem:[%s2138_s11 + $0x150] ss:$8 sps:$4 sm:$0xff]  }
  0x4f   : > { %1317 = vmatprep.subr.bf16.mxu0 %v1878_v50  ;;  %v1951_v50 = vld [vmem:[%s2138_s11 + $0x350] ss:$8 sps:$4 sm:$0xff]  }
  0x51   : > { %1216 = vmatpush1.bf16.msra.mxu1 %v1880_v51  ;;  %v1956_v51 = vld [vmem:[%s2138_s11 + $0x164] ss:$8 sps:$4 sm:$0xff]  }
  0x52   : > { %1318 = vmatpush1.bf16.msra.mxu0 %v1881_v52  ;;  %1217 = vmatprep.subr.bf16.mxu1 %v1882_v53  ;;  %v1959_v52 = vld [vmem:[%s2138_s11 + $0x364] ss:$8 sps:$4 sm:$0xff]   ;;  %v1954_v53 = vld [vmem:[%s2138_s11 + $0x160] ss:$8 sps:$4 sm:$0xff]  }
  0x53   : > { %1319 = vmatprep.subr.bf16.mxu0 %v1884_v54  ;;  %v2241_v54 = vld [vmem:[%s2140_s12 + $0x8] sm:$0xff] }
  0x55   : > { %1218 = vmatpush1.bf16.msra.mxu1 %v1886_v55  ;;  %v2244_v55 = vld [vmem:[%s2140_s12 + $0x28] sm:$0xff] }
  0x56   : > { %1320 = vmatpush1.bf16.msra.mxu0 %v1887_v56  ;;  %1219 = vmatprep.subr.bf16.mxu1 %v1888_v57  ;;  %v1957_v56 = vld [vmem:[%s2138_s11 + $0x360] ss:$8 sps:$4 sm:$0xff]   ;;  %v1613_v57 = vcombine.high %v2241_v54, %v2244_v55 }
  0x57   : > { %1321 = vmatprep.subr.bf16.mxu0 %v1890_v58  ;;  %v2250_v58 = vld [vmem:[%s2140_s12 + $0x18] sm:$0xff] }
  0x59   : > { %1220 = vmatpush1.bf16.msra.mxu1 %v1892_v59  ;;  %v2253_v59 = vld [vmem:[%s2140_s12 + $0x38] sm:$0xff] }
  0x5a   : > { %1322 = vmatpush1.bf16.msra.mxu0 %v1893_v60  ;;  %1221 = vmatprep.subr.bf16.mxu1 %v1894_v63  ;;  %v1962_v60 = vld [vmem:[%s2138_s11 + $0x174] ss:$8 sps:$4 sm:$0xff]   ;;  %v1617_v62 = vcombine.high %v2250_v58, %v2253_v59  ;;  %v1960_v63 = vld [vmem:[%s2138_s11 + $0x170] ss:$8 sps:$4 sm:$0xff]  }
  0x5b   : > { %1323 = vmatprep.subr.bf16.mxu0 %v1896_v0  ;;  %v1963_v0 = vld [vmem:[%s2138_s11 + $0x370] ss:$8 sps:$4 sm:$0xff]  }
  0x5d   : > { %1222 = vmatpush1.bf16.msra.mxu1 %v1898_v5  ;;  %v1974_v5 = vld [vmem:[%s2138_s11 + $0x194] ss:$8 sps:$4 sm:$0xff]  }
  0x5e   : > { %1324 = vmatpush1.bf16.msra.mxu0 %v1899_v6  ;;  %1223 = vmatprep.subr.bf16.mxu1 %v1900_v7  ;;  %v1977_v6 = vld [vmem:[%s2138_s11 + $0x394] ss:$8 sps:$4 sm:$0xff]   ;;  %v1972_v7 = vld [vmem:[%s2138_s11 + $0x190] ss:$8 sps:$4 sm:$0xff]  }
  0x5f   : > { %1325 = vmatprep.subr.bf16.mxu0 %v1902_v8  ;;  %v1975_v8 = vld [vmem:[%s2138_s11 + $0x390] ss:$8 sps:$4 sm:$0xff]  }
  0x61   : > { %1224 = vmatpush1.bf16.msra.mxu1 %v1904_v9  ;;  %v1980_v9 = vld [vmem:[%s2138_s11 + $0x1a4] ss:$8 sps:$4 sm:$0xff]  }
  0x62   : > { %1326 = vmatpush1.bf16.msra.mxu0 %v1905_v10  ;;  %1225 = vmatprep.subr.bf16.mxu1 %v1906_v11  ;;  %v1983_v10 = vld [vmem:[%s2138_s11 + $0x3a4] ss:$8 sps:$4 sm:$0xff]   ;;  %v1978_v11 = vld [vmem:[%s2138_s11 + $0x1a0] ss:$8 sps:$4 sm:$0xff]  }
  0x63   : > { %1327 = vmatprep.subr.bf16.mxu0 %v1908_v12  ;;  %v1981_v12 = vld [vmem:[%s2138_s11 + $0x3a0] ss:$8 sps:$4 sm:$0xff]  }
  0x65   : > { %1226 = vmatpush1.bf16.msra.mxu1 %v1910_v13  ;;  %v1986_v13 = vld [vmem:[%s2138_s11 + $0x1b4] ss:$8 sps:$4 sm:$0xff]  }
  0x66   : > { %1328 = vmatpush1.bf16.msra.mxu0 %v1911_v14  ;;  %1227 = vmatprep.subr.bf16.mxu1 %v1912_v15  ;;  %v1989_v14 = vld [vmem:[%s2138_s11 + $0x3b4] ss:$8 sps:$4 sm:$0xff]   ;;  %v1984_v15 = vld [vmem:[%s2138_s11 + $0x1b0] ss:$8 sps:$4 sm:$0xff]  }
  0x67   : > { %1329 = vmatprep.subr.bf16.mxu0 %v1914_v16  ;;  %v1987_v16 = vld [vmem:[%s2138_s11 + $0x3b0] ss:$8 sps:$4 sm:$0xff]  }
  0x69   : > { %1228 = vmatpush1.bf16.msra.mxu1 %v1916_v17  ;;  %v1992_v17 = vld [vmem:[%s2138_s11 + $0x1c4] ss:$8 sps:$4 sm:$0xff]  }
  0x6a   : > { %1330 = vmatpush1.bf16.msra.mxu0 %v1917_v18  ;;  %1248 = vmatprep.subr.bf16.mxu1 %v1920_v19  ;;  %v1995_v18 = vld [vmem:[%s2138_s11 + $0x3c4] ss:$8 sps:$4 sm:$0xff]   ;;  %v1990_v19 = vld [vmem:[%s2138_s11 + $0x1c0] ss:$8 sps:$4 sm:$0xff]  }
  0x6b   : > { %1350 = vmatprep.subr.bf16.mxu0 %v1923_v20  ;;  %v1993_v20 = vld [vmem:[%s2138_s11 + $0x3c0] ss:$8 sps:$4 sm:$0xff]  }
  0x6c   : > { %1230 = vmatmul.mubr.bf16.vlgmr.msra.gmra.mrb[0].mxu1 %v1610_v21  ;;  %v1999_v21 = vld [vmem:[%s2138_s11 + $0x1d4] ss:$8 sps:$4 sm:$0xff]  }
  0x6d   : > { %1332 = vmatmul.mubr.bf16.vlgmr.msra.gmra.mrb[0].mxu0 %v1614_v23  ;;  %1249 = vmatpush1.bf16.msra.mxu1 %v1918_v22  ;;  %v2002_v22 = vld [vmem:[%s2138_s11 + $0x3d4] ss:$8 sps:$4 sm:$0xff]   ;;  %v1997_v23 = vld [vmem:[%s2138_s11 + $0x1d0] ss:$8 sps:$4 sm:$0xff]  }
  0x6e   : > { %1351 = vmatpush1.bf16.msra.mxu0 %v1921_v24  ;;  %1250 = vmatprep.subr.bf16.mxu1 %v1926_v25  ;;  %v2000_v24 = vld [vmem:[%s2138_s11 + $0x3d0] ss:$8 sps:$4 sm:$0xff]   ;;  %v2007_v25 = vld [vmem:[%s2138_s11 + $0x1e4] ss:$8 sps:$4 sm:$0xff]  }
  0x6f   : > { %1352 = vmatprep.subr.bf16.mxu0 %v1929_v26  ;;  %1239 = vmatprep.mubr.bf16.mxu1 %v1619_v41  ;;  %v2011_v26 = vld [vmem:[%s2138_s11 + $0x3e4] ss:$8 sps:$4 sm:$0xff]  }
  0x70   : > { %1341 = vmatprep.mubr.bf16.mxu0 %v1623_v47 }
  0x71   : > { %1251 = vmatpush1.bf16.msra.mxu1 %v1924_v27  ;;  %v2005_v27 = vld [vmem:[%s2138_s11 + $0x1e0] ss:$8 sps:$4 sm:$0xff]  }
  0x72   : > { %1353 = vmatpush1.bf16.msra.mxu0 %v1927_v28  ;;  %1252 = vmatprep.subr.bf16.mxu1 %v1932_v29  ;;  %v2009_v28 = vld [vmem:[%s2138_s11 + $0x3e0] ss:$8 sps:$4 sm:$0xff]   ;;  %v2014_v29 = vld [vmem:[%s2138_s11 + $0x1f4] ss:$8 sps:$4 sm:$0xff]  }
  0x73   : > { %1354 = vmatprep.subr.bf16.mxu0 %v1935_v30  ;;  %v2017_v30 = vld [vmem:[%s2138_s11 + $0x3f4] ss:$8 sps:$4 sm:$0xff]  }
  0x74   : > { %1240 = vmatmul.mubr.bf16.gmra.mrb[4].mxu1 %v1618_v42 }
  0x75   : > { %1253 = vmatpush1.bf16.msra.mxu1 %v1930_v31  ;;  %1342 = vmatmul.mubr.bf16.gmra.mrb[4].mxu0 %v1622_v48  ;;  %v2012_v31 = vld [vmem:[%s2138_s11 + $0x1f0] ss:$8 sps:$4 sm:$0xff]  }
  0x76   : > { %1355 = vmatpush1.bf16.msra.mxu0 %v1933_v32  ;;  %1254 = vmatprep.subr.bf16.mxu1 %v1938_v33  ;;  %v2015_v32 = vld [vmem:[%s2138_s11 + $0x3f0] ss:$8 sps:$4 sm:$0xff]  }
  0x77   : > { %1356 = vmatprep.subr.bf16.mxu0 %v1941_v34  ;;  %1280 = vmatprep.mubr.bf16.mxu1 %v1613_v57  ;;  %v358_v33 = vld [vmem:[%s2140_s12 + $0x48] sm:$0xff]  ;;  %v360_v34 = vld [vmem:[%s2140_s12 + $0x58] sm:$0xff] }
  0x78   : > { %1382 = vmatprep.mubr.bf16.mxu0 %v1617_v62  ;;  %v1620_v39 = vcombine.low %v358_v33, %v358_v33 }
  0x79   : > { %1255 = vmatpush1.bf16.msra.mxu1 %v1936_v35  ;;  %v1612_v35 = vcombine.low %v2241_v54, %v2244_v55  ;;  %v344_v54 = vld [vmem:[#allocation2 + $0x8] sm:$0xff] }
  0x7a   : > { %1357 = vmatpush1.bf16.msra.mxu0 %v1939_v36  ;;  %1256 = vmatprep.subr.bf16.mxu1 %v1944_v37  ;;  %v1616_v36 = vcombine.low %v2250_v58, %v2253_v59  ;;  %v1621_v37 = vcombine.high %v358_v33, %v358_v33  ;;  %v345_v58 = vld [vmem:[#allocation2 + $0x10] sm:$0xff] }
  0x7b   : > { %1358 = vmatprep.subr.bf16.mxu0 %v1947_v38  ;;  %v1625_v38 = vcombine.high %v360_v34, %v360_v34 }
  0x7d   : > { %1257 = vmatpush1.bf16.msra.mxu1 %v1942_v40  ;;  %v1624_v40 = vcombine.low %v360_v34, %v360_v34 }
  0x7e   : > { %1359 = vmatpush1.bf16.msra.mxu0 %v1945_v43  ;;  %1258 = vmatprep.subr.bf16.mxu1 %v1950_v44 }
  0x7f   : > { %1360 = vmatprep.subr.bf16.mxu0 %v1953_v45 }
  0x81   : > { %1259 = vmatpush1.bf16.msra.mxu1 %v1948_v49 }
  0x82   : > { %1361 = vmatpush1.bf16.msra.mxu0 %v1951_v50  ;;  %1260 = vmatprep.subr.bf16.mxu1 %v1956_v51  ;;  %v343_v50 = vld [vmem:[#allocation2] sm:$0xff] }
  0x83   : > { %1362 = vmatprep.subr.bf16.mxu0 %v1959_v52 }
  0x85   : > { %1261 = vmatpush1.bf16.msra.mxu1 %v1954_v53 }
  0x86   : > { %1363 = vmatpush1.bf16.msra.mxu0 %v1957_v56  ;;  %1262 = vmatprep.subr.bf16.mxu1 %v1962_v60 }
  0x87   : > { %1364 = vmatprep.subr.bf16.mxu0 %v1965_v61 }
  0x89   : > { %1263 = vmatpush1.bf16.msra.mxu1 %v1960_v63  ;;  %v346_v63 = vld [vmem:[#allocation2 + $0x18] sm:$0xff] }
  0x8a   : > { %1365 = vmatpush1.bf16.msra.mxu0 %v1963_v0  ;;  %1264 = vmatprep.subr.bf16.mxu1 %v1968_v1 }
  0x8b   : > { %1366 = vmatprep.subr.bf16.mxu0 %v1971_v2 }
  0x8d   : > { %1265 = vmatpush1.bf16.msra.mxu1 %v1966_v3 }
  0x8e   : > { %1367 = vmatpush1.bf16.msra.mxu0 %v1969_v4  ;;  %1266 = vmatprep.subr.bf16.mxu1 %v1974_v5 }
  0x8f   : > { %1368 = vmatprep.subr.bf16.mxu0 %v1977_v6 }
  0x91   : > { %1267 = vmatpush1.bf16.msra.mxu1 %v1972_v7 }
  0x92   : > { %1369 = vmatpush1.bf16.msra.mxu0 %v1975_v8  ;;  %1268 = vmatprep.subr.bf16.mxu1 %v1980_v9 }
  0x93   : > { %1370 = vmatprep.subr.bf16.mxu0 %v1983_v10 }
  0x95   : > { %1269 = vmatpush1.bf16.msra.mxu1 %v1978_v11 }
  0x96   : > { %1371 = vmatpush1.bf16.msra.mxu0 %v1981_v12  ;;  %1270 = vmatprep.subr.bf16.mxu1 %v1986_v13 }
  0x97   : > { %1372 = vmatprep.subr.bf16.mxu0 %v1989_v14 }
  0x99   : > { %1271 = vmatpush1.bf16.msra.mxu1 %v1984_v15 }
  0x9a   : > { %1373 = vmatpush1.bf16.msra.mxu0 %v1987_v16  ;;  %1272 = vmatprep.subr.bf16.mxu1 %v1992_v17  ;;  %v347_v16 = vld [vmem:[#allocation2 + $0x20] sm:$0xff] }
  0x9b   : > { %1374 = vmatprep.subr.bf16.mxu0 %v1995_v18 }
  0x9d   : > { %1273 = vmatpush1.bf16.msra.mxu1 %v1990_v19  ;;  %v348_v19 = vld [vmem:[#allocation2 + $0x28] sm:$0xff] }
  0x9e   : > { %1375 = vmatpush1.bf16.msra.mxu0 %v1993_v20  ;;  %1274 = vmatprep.subr.bf16.mxu1 %v1999_v21 }
  0x9f   : > { %1376 = vmatprep.subr.bf16.mxu0 %v2002_v22 }
  0xa1   : > { %1275 = vmatpush1.bf16.msra.mxu1 %v1997_v23  ;;  %v1425_v23 = vlaneseq (!%p1754_p11) }
  0xa2   : > { %1377 = vmatpush1.bf16.msra.mxu0 %v2000_v24  ;;  %1276 = vmatprep.subr.bf16.mxu1 %v2007_v25  ;;  %v1423_v25 = vld [vmem:[%s2332_s2] sm:$0x3] (!%p1754_p11) }
  0xa3   : > { %1378 = vmatprep.subr.bf16.mxu0 %v2011_v26  ;;  %v1426_v24 = vshrl.u32 (!%p1754_p11), %v1425_v23, 7  ;;  %v1441_v26 = vld [vmem:[%s2333_s3] sm:$0x3] (!%p1754_p11) }
  0xa5   : > { %1277 = vmatpush1.bf16.msra.mxu1 %v2005_v27 }
  0xa6   : > { %1379 = vmatpush1.bf16.msra.mxu0 %v2009_v28  ;;  %1278 = vmatprep.subr.bf16.mxu1 %v2014_v29  ;;  %v1427_v28 = vsub.s32 (!%p1754_p11), 0, %v1426_v24  ;;  %v1431_v29 = vsub.s32 (!%p1754_p11), 1, %v1426_v24 }
  0xa7   : > { %1380 = vmatprep.subr.bf16.mxu0 %v2017_v30 }
  0xa8   : > { %v1428_v33 = vrot.slane (!%p1754_p11), %v1423_v25, %v1427_v28  ;;  %v1432_v34 = vrot.slane (!%p1754_p11), %v1423_v25, %v1431_v29 }
  0xa9   : > { %1279 = vmatpush1.bf16.msra.mxu1 %v2012_v31 }
  0xaa   : > { %1381 = vmatpush1.bf16.msra.mxu0 %v2015_v32 }
  0xac   : > { %1281 = vmatmul.mubr.bf16.vlgmr.msra.gmra.mrb[0].mxu1 %v1612_v35  ;;  %v1446_v35 = vrot.slane (!%p1754_p11), %v1441_v26, %v1427_v28 }
  0xad   : > { %1383 = vmatmul.mubr.bf16.vlgmr.msra.gmra.mrb[0].mxu0 %v1616_v36  ;;  %1290 = vmatprep.mubr.bf16.mxu1 %v1621_v37  ;;  %v1450_v36 = vrot.slane (!%p1754_p11), %v1441_v26, %v1431_v29 }
  0xae   : > { %1392 = vmatprep.mubr.bf16.mxu0 %v1625_v38 }
  0xb4   : > { %1291 = vmatmul.mubr.bf16.gmra.mrb[8].mxu1 %v1620_v39 }
  0xb5   : > { %1393 = vmatmul.mubr.bf16.gmra.mrb[8].mxu0 %v1624_v40 }
 0x147   : > { %v1241_v41 = vpop.f32.mrb[4].mxu1 }
 0x148   : > { %v1243_v42 = vpop.f32.mrb[5].mxu1  ;;  %v1343_v45 = vpop.f32.mrb[4].mxu0 }
 0x149   : > { %v1245_v43 = vpop.f32.mrb[6].mxu1  ;;  %v1345_v46 = vpop.f32.mrb[5].mxu0 }
 0x14a   : > { %v1246_v44 = vpop.f32.mrb[7].mxu1  ;;  %v1347_v47 = vpop.f32.mrb[6].mxu0 }
 0x14b   : > { %v1348_v48 = vpop.f32.mrb[7].mxu0 }
 0x17f   : > { %v1282_v49 = vpop.f32.mrb[0].mxu1 }
 0x180   : > { %v1384_v51 = vpop.f32.mrb[0].mxu0  ;;  %v1284_v53 = vpop.f32.mrb[1].mxu1 }
 0x181   : > { %v1767_v52 = vadd.f32 %v1384_v51, %v1282_v49  ;;  %v1386_v55 = vpop.f32.mrb[1].mxu0  ;;  %v1286_v57 = vpop.f32.mrb[2].mxu1 }
 0x182   : > { %v1768_v56 = vadd.f32 %v1386_v55, %v1284_v53  ;;  %v1388_v59 = vpop.f32.mrb[2].mxu0  ;;  %v1288_v62 = vpop.f32.mrb[3].mxu1 }
 0x183   : > { %v1401_v60 = vadd.f32 %v1767_v52, %v343_v50  ;;  %v1769_v61 = vadd.f32 %v1388_v59, %v1286_v57  ;;  %v1390_v0 = vpop.f32.mrb[3].mxu0 }
 0x184   : > { %v1402_v1 = vadd.f32 %v1768_v56, %v344_v54  ;;  %v1770_v2 = vadd.f32 %v1390_v0, %v1288_v62 }
 0x185   : > { %1407 = vst [vmem:[#allocation2] sm:$0xff] %v1401_v60  ;;  %v1403_v3 = vadd.f32 %v1769_v61, %v345_v58 }
 0x186   : > { %1408 = vst [vmem:[#allocation2 + $0x8] sm:$0xff] %v1402_v1  ;;  %v1404_v4 = vadd.f32 %v1770_v2, %v346_v63 }
 0x187   : > { %1409 = vst [vmem:[#allocation2 + $0x10] sm:$0xff] %v1403_v3  ;;  %v1292_v5 = vpop.f32.mrb[8].mxu1 }
 0x188   : > { %1410 = vst [vmem:[#allocation2 + $0x18] sm:$0xff] %v1404_v4  ;;  %v1394_v6 = vpop.f32.mrb[8].mxu0  ;;  %v1293_v7 = vadd.f32 %v1292_v5, %v1241_v41  ;;  %v1294_v8 = vpop.f32.mrb[9].mxu1 }
 0x189   : > { %v1396_v9 = vpop.f32.mrb[9].mxu0  ;;  %v1295_v10 = vadd.f32 %v1294_v8, %v1243_v42  ;;  %v1296_v11 = vpop.f32.mrb[10].mxu1 }
 0x18a   : > { %v1398_v12 = vpop.f32.mrb[10].mxu0  ;;  %v1344_v13 = vadd.f32 %v1343_v45, %v1293_v7  ;;  %v1297_v14 = vpop.f32.mrb[11].mxu1 }
 0x18b   : > { %v1399_v15 = vpop.f32.mrb[11].mxu0  ;;  %v1346_v17 = vadd.f32 %v1345_v46, %v1295_v10  ;;  %1416 = sbr.rel (%p1754_p11) target bundleno = 418 (0x1a2), region = 67 }
 0x18c   : > { %v1395_v18 = vadd.f32 %v1394_v6, %v1344_v13  ;;  %v1417_v27 = vld [vmem:[#allocation2] sm:$0xff] (!%p1754_p11) }
 0x18d   : > { %v1397_v20 = vadd.f32 %v1396_v9, %v1346_v17  ;;  %v1418_v30 = vld [vmem:[#allocation2 + $0x8] sm:$0xff] (!%p1754_p11)  ;;  %v1435_v39 = vmul.f32 (!%p1754_p11), %v1428_v33, %v1417_v27 }
 0x18e   : > { %v1405_v21 = vadd.f32 %v1395_v18, %v347_v16  ;;  %v1419_v31 = vld [vmem:[#allocation2 + $0x10] sm:$0xff] (!%p1754_p11)  ;;  %v1436_v40 = vmul.f32 (!%p1754_p11), %v1432_v34, %v1418_v30 }
 0x18f   : > { %v1406_v22 = vadd.f32 %v1397_v20, %v348_v19  ;;  %v1420_v32 = vld [vmem:[#allocation2 + $0x18] sm:$0xff] (!%p1754_p11)  ;;  %v1437_v41 = vmul.f32 (!%p1754_p11), %v1428_v33, %v1419_v31  ;;  %v1453_v45 = vadd.f32 (!%p1754_p11), %v1446_v35, %v1435_v39 }
 0x190   : > { %1411 = vst [vmem:[#allocation2 + $0x20] sm:$0xff] %v1405_v21  ;;  %v1438_v42 = vmul.f32 (!%p1754_p11), %v1432_v34, %v1420_v32  ;;  %v1454_v46 = vadd.f32 (!%p1754_p11), %v1450_v36, %v1436_v40 }
 0x191   : > { %1412 = vst [vmem:[#allocation2 + $0x28] sm:$0xff] %v1406_v22  ;;  %v1455_v47 = vadd.f32 (!%p1754_p11), %v1446_v35, %v1437_v41  ;;  %v1459_v51 = vmax.f32 (!%p1754_p11), %v1453_v45, 0.0 }
 0x192   : > { %v1456_v48 = vadd.f32 %v1450_v36, %v1438_v42  ;;  %v1460_v52 = vmax.f32 %v1454_v46, 0.0 }
 0x193   : > { %v1461_v53 = vmax.f32 %v1455_v47, 0.0 }
 0x194   : > { %v1462_v54 = vmax.f32 %v1456_v48, 0.0  ;;  %v1764_v57 = vpack.c.bf16 %v1460_v52, %v1459_v51 }
 0x196   : > { %v1765_v58 = vpack.c.bf16 %v1462_v54, %v1461_v53  ;;  %1485 = vst [vmem:[%s2334_s4] sm:$0xff] %v1764_v57 }
 0x197   : > { %v1421_v37 = vld [vmem:[#allocation2 + $0x20] sm:$0xff] }
 0x198   : > { %v1422_v38 = vld [vmem:[#allocation2 + $0x28] sm:$0xff]  ;;  %v1439_v43 = vmul.f32 %v1428_v33, %v1421_v37  ;;  %1486 = vst [vmem:[%s2334_s4 + $0x8] sm:$0xff] %v1765_v58 }
 0x199   : > { %v1440_v44 = vmul.f32 %v1432_v34, %v1422_v38 }
 0x19a   : > { %v1457_v49 = vadd.f32 %v1446_v35, %v1439_v43 }
 0x19b   : > { %v1458_v50 = vadd.f32 %v1450_v36, %v1440_v44 }
 0x19c   : > { %v1463_v55 = vmax.f32 %v1457_v49, 0.0 }
 0x19d   : > { %v1464_v56 = vmax.f32 %v1458_v50, 0.0 }
 0x19f   : > { %v1766_v59 = vpack.c.bf16 %v1464_v56, %v1463_v55 }
 0x1a1   : > { %1487 = vst [vmem:[%s2334_s4 + $0x10] sm:$0xff] %v1766_v59 }
 0x1a2 PF: > { %s14_s19 = sadd.s32 1, %s2060_s19   ;;  %s2335_s15 = smov %s2048_s16 }
 0x1a3   : > { %p11_p12 = scmp.ge.s32.totalorder %s14_s19, 10   ;;  %s2336_s16 = smov %s2123_s23 }
 0x1a4   : > { %s2337_s17 = smov %s2056_s18  ;;  %s2338_s18 = smov %s2340_s20 }
 0x1a5   :  { %13 = sbr.rel (!%p11_p12) target bundleno = 3 (0x3), region = 111 }

// kernel: feature_regression_forward.7
= control target key start
LH: loop header
LB: loop body
LE: loop exit
PB: predicated region body
PF: predicated region fallthrough
CT: control target
= control target key end

     0   :  { %s1420_s15 = smov 0   ;;  %s1422_s16 = smov 0   ;;  %s1560_s0 = inlined_call_operand.vmem [shape: bf16[24,2304], index: 0, kind: input, shape index: {}]   ;;  %s1561_s1 = inlined_call_operand.vmem [shape: bf16[2304,128], index: 1, kind: input, shape index: {}]   ;;  %s1562_s2 = inlined_call_operand.vmem [shape: f32[1,128], index: 2, kind: input, shape index: {}]   ;;  %s1563_s3 = inlined_call_operand.vmem [shape: f32[1,128], index: 3, kind: input, shape index: {}]   ;;  %s1564_s4 = inlined_call_operand.vmem [shape: bf16[24,128], index: 4, kind: output, shape index: {}]  }
   0x1   :  { %s1424_s17 = smov 0   ;;  %s1426_s18 = smov 0  }
   0x2   :  { %s1428_s19 = smov 0  }
   0x3 LB: > { %s23_s20 = sadd.s32 1, %s1388_s18  ;;  %p40_p1 = scmp.ne.s32.totalorder %s1380_s16, %s1376_s15  ;;  %s1392_s19 = sphi %s1428_s19, %s14_s19   ;;  %s1388_s18 = sphi %s1426_s18, %s1568_s18   ;;  %s1384_s17 = sphi %s1424_s17, %s1567_s17   ;;  %s1380_s16 = sphi %s1422_s16, %s1566_s16   ;;  %s1376_s15 = sphi %s1420_s15, %s1565_s15  }
   0x4   : > { %p24_p0 = scmp.ge.s32.totalorder %s23_s20, 3  ;;  %p41_p2 = scmp.eq.s32.totalorder %s1392_s19, 0 }
   0x5   : > { %s33_s22 = sadd.s32 1, %s1380_s16  ;;  %p1065_p5 = scmp.ge.s32.totalorder %s1392_s19, 3 }
   0x6   : > { %s1570_s20 = smov (%p24_p0, %s23_s20), 0  ;;  %p42_p3 = por %p41_p2, %p40_p1 }
   0x7   : > { %s30_s21 = ssub.s32 %s1388_s18, %s1570_s20  ;;  %184 = sbr.rel (%p1065_p5) target bundleno = 24 (0x18), region = 24 }
   0x8   : > { %p31_p4 = scmp.eq.s32.totalorder %s30_s21, 0 }
   0xa   : > { %s1455_s23 = scalar_select %p31_p4, %s1380_s16, %s33_s22  }
   0xe   : > { %187 = sbr.rel (!%p42_p3) target bundleno = 24 (0x18), region = 28  ;;  %s189_s24 = sand.u32 (%p42_p3), 1, %s1380_s16  }
   0xf   : > { %s1139_s25 = smul.u32 (%p42_p3), 24, %s1388_s18 }
  0x10   : > { %s1248_s26 = smul.u32 (%p42_p3), 72, %s189_s24 }
  0x11   : > { %s194_s29 = scalar_lea.vmem (%p42_p3), %s1560_s0, %s1139_s25 }
  0x12   : > { %v207_v0 = vld [vmem:[%s194_s29] sm:$0xff] (%p42_p3)  ;;  %v209_v1 = vld [vmem:[%s194_s29 + $0x8] sm:$0xff] (%p42_p3)  ;;  %v211_v2 = vld [vmem:[%s194_s29 + $0x10] sm:$0xff] (%p42_p3)  ;;  %s191_s30 = scalar_lea.vmem (%p42_p3), [#allocation3], %s1248_s26 }
  0x13   : > { %208 = vst [vmem:[%s191_s30] sm:$0xff] (%p42_p3), %v207_v0  ;;  %210 = vst [vmem:[%s191_s30 + $0x8] sm:$0xff] (%p42_p3), %v209_v1  ;;  %v213_v3 = vld [vmem:[%s194_s29 + $0x48] sm:$0xff] (%p42_p3)  ;;  %v215_v4 = vld [vmem:[%s194_s29 + $0x50] sm:$0xff] (%p42_p3) }
  0x14   : > { %212 = vst [vmem:[%s191_s30 + $0x10] sm:$0xff] (%p42_p3), %v211_v2  ;;  %v217_v5 = vld [vmem:[%s194_s29 + $0x58] sm:$0xff] (%p42_p3)  ;;  %214 = vst [vmem:[%s191_s30 + $0x18] sm:$0xff] (%p42_p3), %v213_v3  ;;  %v219_v6 = vld [vmem:[%s194_s29 + $0x90] sm:$0xff] (%p42_p3) }
  0x15   : > { %216 = vst [vmem:[%s191_s30 + $0x20] sm:$0xff] %v215_v4  ;;  %218 = vst [vmem:[%s191_s30 + $0x28] sm:$0xff] %v217_v5  ;;  %v221_v7 = vld [vmem:[%s194_s29 + $0x98] sm:$0xff]  ;;  %v223_v8 = vld [vmem:[%s194_s29 + $0xa0] sm:$0xff] }
  0x16   : > { %220 = vst [vmem:[%s191_s30 + $0x30] sm:$0xff] %v219_v6  ;;  %222 = vst [vmem:[%s191_s30 + $0x38] sm:$0xff] %v221_v7 }
  0x17   : > { %224 = vst [vmem:[%s191_s30 + $0x40] sm:$0xff] %v223_v8 }
  0x18 PF: > { %p1067_p6 = scmp.ge.s32.totalorder %s1392_s19, 1  ;;  %p241_p7 = scmp.lt.s32.totalorder %s1392_s19, 4 }
  0x1a   : > { %p242_p8 = pnand %p1067_p6, %p241_p7 }
  0x1b   : > { %s248_s5 = sand.u32 (!%p242_p8), 1, %s1376_s15   ;;  %s287_s6 = smul.u32 (!%p242_p8), 96, %s1384_s17 }
  0x1c   : > { %245 = sbr.rel (%p242_p8) target bundleno = 346 (0x15a), region = 55  ;;  %p1069_p10 = scmp.ne.s32.totalorder (!%p242_p8), %s1384_s17, 0 }
  0x1d   : > { %s1249_s7 = smul.u32 (!%p242_p8), 72, %s248_s5  ;;  %p288_p9 = scmp.lt.s32.totalorder (!%p242_p8), %s287_s6, 287 }
  0x1f   : > { %s1472_s12 = scalar_lea.vmem (!%p242_p8), [#allocation3], %s1249_s7 }
  0x23   : > { %s1572_s6 = smov (!%p288_p9, %s287_s6), 287  ;;  %310 = sbr.rel (%p1069_p10) target bundleno = 42 (0x2a), region = 63 }
  0x24   : > { %s1068_s8 = sshll.u32 %s1572_s6, 2  ;;  %v1394_v9 = vmov (!%p1069_p10), 0.0  }
  0x25   : > { %s1470_s11 = scalar_lea.vmem %s1561_s1, %s1068_s8  ;;  %311 = vst [vmem:[#allocation2] sm:$0xff] (!%p1069_p10), %v1394_v9  ;;  %312 = vst [vmem:[#allocation2 + $0x8] sm:$0xff] (!%p1069_p10), %v1394_v9 }
  0x26   : > { %313 = vst [vmem:[#allocation2 + $0x10] sm:$0xff] (!%p1069_p10), %v1394_v9 }
  0x2a PF: > { %v1291_v10 = vld [vmem:[%s1470_s11 + $0x40] sm:$0xff]   ;;  %v1295_v14 = vld [vmem:[%s1470_s11 + $0x48] sm:$0xff]   ;;  %v1299_v18 = vld [vmem:[%s1470_s11 + $0x50] sm:$0xff]   ;;  %p1130_p11 = scmp.ne.s32.totalorder %s1384_s17, 2 }
  0x2b   : > { %v1292_v11 = vld [vmem:[%s1470_s11 + $0xc0] sm:$0xff]   ;;  %1148 = vmatprep.subr.bf16.mxu0 %v1291_v10  ;;  %v1296_v15 = vld [vmem:[%s1470_s11 + $0xc8] sm:$0xff]   ;;  %v1300_v19 = vld [vmem:[%s1470_s11 + $0xd0] sm:$0xff]  }
  0x2c   : > { %v1293_v12 = vld [vmem:[%s1470_s11] sm:$0xff]   ;;  %1176 = vmatprep.subr.bf16.mxu1 %v1292_v11  ;;  %v1297_v16 = vld [vmem:[%s1470_s11 + $0x8] sm:$0xff]   ;;  %v1301_v20 = vld [vmem:[%s1470_s11 + $0x10] sm:$0xff]  }
  0x2d   : > { %v1294_v13 = vld [vmem:[%s1470_s11 + $0x80] sm:$0xff]   ;;  %1149 = vmatpush3.bf16.msra.mxu0 %v1293_v12  ;;  %v1298_v17 = vld [vmem:[%s1470_s11 + $0x88] sm:$0xff]   ;;  %v1302_v21 = vld [vmem:[%s1470_s11 + $0x90] sm:$0xff]  }
  0x2e   : > { %1177 = vmatpush3.bf16.msra.mxu1 %v1294_v13  ;;  %1150 = vmatprep.subr.bf16.mxu0 %v1295_v14  ;;  %v1303_v22 = vld [vmem:[%s1470_s11 + $0x58] sm:$0xff]   ;;  %v1307_v26 = vld [vmem:[%s1470_s11 + $0x60] sm:$0xff]   ;;  %v1311_v30 = vld [vmem:[%s1470_s11 + $0x68] sm:$0xff]  }
  0x2f   : > { %1178 = vmatprep.subr.bf16.mxu1 %v1296_v15  ;;  %v1304_v23 = vld [vmem:[%s1470_s11 + $0xd8] sm:$0xff]   ;;  %v1308_v27 = vld [vmem:[%s1470_s11 + $0xe0] sm:$0xff]   ;;  %v1312_v31 = vld [vmem:[%s1470_s11 + $0xe8] sm:$0xff]  }
  0x30   : > { %v1305_v24 = vld [vmem:[%s1470_s11 + $0x18] sm:$0xff]   ;;  %v1309_v28 = vld [vmem:[%s1470_s11 + $0x20] sm:$0xff]   ;;  %v1313_v32 = vld [vmem:[%s1470_s11 + $0x28] sm:$0xff]  }
  0x31   : > { %1151 = vmatpush3.bf16.msra.mxu0 %v1297_v16  ;;  %v1306_v25 = vld [vmem:[%s1470_s11 + $0x98] sm:$0xff]   ;;  %v1310_v29 = vld [vmem:[%s1470_s11 + $0xa0] sm:$0xff]   ;;  %v1314_v33 = vld [vmem:[%s1470_s11 + $0xa8] sm:$0xff]  }
  0x32   : > { %1179 = vmatpush3.bf16.msra.mxu1 %v1298_v17  ;;  %1152 = vmatprep.subr.bf16.mxu0 %v1299_v18  ;;  %v1315_v34 = vld [vmem:[%s1470_s11 + $0x70] sm:$0xff]   ;;  %v1319_v38 = vld [vmem:[%s1470_s11 + $0x78] sm:$0xff]   ;;  %v1329_v46 = vld [vmem:[%s1470_s11 + $0x140] sm:$0xff]  }
  0x33   : > { %1180 = vmatprep.subr.bf16.mxu1 %v1300_v19  ;;  %v1316_v35 = vld [vmem:[%s1470_s11 + $0xf0] sm:$0xff]   ;;  %v1320_v39 = vld [vmem:[%s1470_s11 + $0xf8] sm:$0xff]   ;;  %v1330_v47 = vld [vmem:[%s1470_s11 + $0x100] sm:$0xff]  }
  0x34   : > { %v1317_v36 = vld [vmem:[%s1470_s11 + $0x30] sm:$0xff]   ;;  %v1321_v40 = vld [vmem:[%s1470_s11 + $0x38] sm:$0xff]   ;;  %v1331_v48 = vld [vmem:[%s1470_s11 + $0x148] sm:$0xff]  }
  0x35   : > { %1153 = vmatpush3.bf16.msra.mxu0 %v1301_v20  ;;  %v1318_v37 = vld [vmem:[%s1470_s11 + $0xb0] sm:$0xff]   ;;  %v1322_v41 = vld [vmem:[%s1470_s11 + $0xb8] sm:$0xff]   ;;  %v1332_v49 = vld [vmem:[%s1470_s11 + $0x108] sm:$0xff]  }
  0x36   : > { %1181 = vmatpush3.bf16.msra.mxu1 %v1302_v21  ;;  %1154 = vmatprep.subr.bf16.mxu0 %v1303_v22  ;;  %v1323_v42 = vld [vmem:[%s1472_s12] ss:$24 sps:$4 sm:$0xff]   ;;  %v1325_v43 = vld [vmem:[%s1472_s12 + $0x4] ss:$24 sps:$4 sm:$0xff]   ;;  %v323_v53 = vld [vmem:[%s1472_s12 + $0x30] sm:$0xff] }
  0x37   : > { %1182 = vmatprep.subr.bf16.mxu1 %v1304_v23  ;;  %v1326_v44 = vld [vmem:[%s1472_s12 + $0x8] ss:$24 sps:$4 sm:$0xff]   ;;  %v1328_v45 = vld [vmem:[%s1472_s12 + $0xc] ss:$24 sps:$4 sm:$0xff]   ;;  %793 = vmatprep.mubr.bf16.mxu0 %v1325_v43  ;;  %v1333_v50 = vld [vmem:[%s1470_s11 + $0x150] sm:$0xff]   ;;  %v1077_v55 = vcombine.high %v323_v53, %v323_v53  ;;  %v1076_v56 = vcombine.low %v323_v53, %v323_v53 }
  0x38   : > { %841 = vmatprep.mubr.bf16.mxu1 %v1328_v45  ;;  %v1334_v51 = vld [vmem:[%s1470_s11 + $0x110] sm:$0xff]   ;;  %v1335_v52 = vld [vmem:[%s1470_s11 + $0x158] sm:$0xff]   ;;  %v1337_v57 = vld [vmem:[%s1470_s11 + $0x160] sm:$0xff]  }
  0x39   : > { %1155 = vmatpush3.bf16.msra.mxu0 %v1305_v24  ;;  %v1336_v54 = vld [vmem:[%s1470_s11 + $0x118] sm:$0xff]   ;;  %v1338_v61 = vld [vmem:[%s1470_s11 + $0x120] sm:$0xff]   ;;  %v1340_v62 = vld [vmem:[%s1470_s11 + $0x168] sm:$0xff]  }
  0x3a   : > { %1183 = vmatpush3.bf16.msra.mxu1 %v1306_v25  ;;  %1156 = vmatprep.subr.bf16.mxu0 %v1307_v26  ;;  %v324_v58 = vld [vmem:[%s1472_s12 + $0x38] sm:$0xff]  ;;  %v1351_v63 = vld [vmem:[%s1472_s12 + $0x14] ss:$24 sps:$4 sm:$0xff]   ;;  %v325_v0 = vld [vmem:[%s1472_s12 + $0x40] sm:$0xff] }
  0x3b   : > { %1184 = vmatprep.subr.bf16.mxu1 %v1308_v27  ;;  %v1079_v59 = vcombine.high %v324_v58, %v324_v58  ;;  %v1078_v60 = vcombine.low %v324_v58, %v324_v58  ;;  %v1081_v1 = vcombine.high %v325_v0, %v325_v0  ;;  %v1342_v2 = vld [vmem:[%s1470_s11 + $0x128] sm:$0xff]   ;;  %v1345_v3 = vld [vmem:[%s1470_s11 + $0x170] sm:$0xff]   ;;  %v1347_v5 = vld [vmem:[%s1470_s11 + $0x178] sm:$0xff]   ;;  %v1080_v8 = vcombine.low %v325_v0, %v325_v0 }
  0x3c   : > { %v1346_v4 = vld [vmem:[%s1470_s11 + $0x130] sm:$0xff]   ;;  %v1348_v6 = vld [vmem:[%s1470_s11 + $0x138] sm:$0xff]  }
  0x3d   : > { %1157 = vmatpush3.bf16.msra.mxu0 %v1309_v28  ;;  %v1349_v7 = vld [vmem:[%s1472_s12 + $0x10] ss:$24 sps:$4 sm:$0xff]  }
  0x3e   : > { %1185 = vmatpush3.bf16.msra.mxu1 %v1310_v29  ;;  %1158 = vmatprep.subr.bf16.mxu0 %v1311_v30  ;;  %v316_v45 = vld [vmem:[#allocation2 + $0x10] sm:$0xff] }
  0x3f   : > { %1186 = vmatprep.subr.bf16.mxu1 %v1312_v31 }
  0x41   : > { %1159 = vmatpush3.bf16.msra.mxu0 %v1313_v32 }
  0x42   : > { %1187 = vmatpush3.bf16.msra.mxu1 %v1314_v33  ;;  %1160 = vmatprep.subr.bf16.mxu0 %v1315_v34 }
  0x43   : > { %1188 = vmatprep.subr.bf16.mxu1 %v1316_v35 }
  0x45   : > { %1161 = vmatpush3.bf16.msra.mxu0 %v1317_v36 }
  0x46   : > { %1189 = vmatpush3.bf16.msra.mxu1 %v1318_v37  ;;  %1162 = vmatprep.subr.bf16.mxu0 %v1319_v38 }
  0x47   : > { %1190 = vmatprep.subr.bf16.mxu1 %v1320_v39 }
  0x49   : > { %1163 = vmatpush3.bf16.msra.mxu0 %v1321_v40  ;;  %v314_v40 = vld [vmem:[#allocation2] sm:$0xff] }
  0x4a   : > { %1191 = vmatpush3.bf16.msra.mxu1 %v1322_v41  ;;  %1204 = vmatprep.subr.bf16.mxu0 %v1329_v46 }
  0x4b   : > { %1232 = vmatprep.subr.bf16.mxu1 %v1329_v46 }
  0x4c   : > { %794 = vmatmul.mubr.bf16.vlgmr.msra.gmra.mrb[0].mxu0 %v1323_v42 }
  0x4d   : > { %842 = vmatmul.mubr.bf16.vlgmr.msra.gmra.mrb[0].mxu1 %v1326_v44  ;;  %1205 = vmatpush3.bf16.msra.mxu0 %v1330_v47 }
  0x4e   : > { %1240 = vmatpush3.bf16.msra.mxu1 %v1330_v47  ;;  %1206 = vmatprep.subr.bf16.mxu0 %v1331_v48 }
  0x4f   : > { %1233 = vmatprep.subr.bf16.mxu1 %v1331_v48  ;;  %801 = vmatprep.mubr.bf16.mxu0 %v1077_v55 }
  0x50   : > { %849 = vmatprep.mubr.bf16.mxu1 %v1079_v59  ;;  %v1132_v59 = vld [vmem:[%s1563_s3] ss:$0 sm:$0xff] (!%p1130_p11) }
  0x51   : > { %1207 = vmatpush3.bf16.msra.mxu0 %v1332_v49 }
  0x52   : > { %1241 = vmatpush3.bf16.msra.mxu1 %v1332_v49  ;;  %1208 = vmatprep.subr.bf16.mxu0 %v1333_v50  ;;  %v315_v49 = vld [vmem:[#allocation2 + $0x8] sm:$0xff] }
  0x53   : > { %1234 = vmatprep.subr.bf16.mxu1 %v1333_v50 }
  0x54   : > { %802 = vmatmul.mubr.bf16.gmra.mrb[4].mxu0 %v1076_v56  ;;  %v1131_v56 = vld [vmem:[%s1562_s2] ss:$0 sm:$0xff] (!%p1130_p11) }
  0x55   : > { %1209 = vmatpush3.bf16.msra.mxu0 %v1334_v51  ;;  %850 = vmatmul.mubr.bf16.gmra.mrb[4].mxu1 %v1078_v60 }
  0x56   : > { %1242 = vmatpush3.bf16.msra.mxu1 %v1334_v51  ;;  %1210 = vmatprep.subr.bf16.mxu0 %v1335_v52 }
  0x57   : > { %1235 = vmatprep.subr.bf16.mxu1 %v1335_v52  ;;  %889 = vmatprep.mubr.bf16.mxu0 %v1351_v63 }
  0x58   : > { %897 = vmatprep.mubr.bf16.mxu1 %v1081_v1 }
  0x59   : > { %1211 = vmatpush3.bf16.msra.mxu0 %v1336_v54 }
  0x5a   : > { %1243 = vmatpush3.bf16.msra.mxu1 %v1336_v54  ;;  %1212 = vmatprep.subr.bf16.mxu0 %v1337_v57 }
  0x5b   : > { %1236 = vmatprep.subr.bf16.mxu1 %v1337_v57 }
  0x5d   : > { %1213 = vmatpush3.bf16.msra.mxu0 %v1338_v61 }
  0x5e   : > { %1244 = vmatpush3.bf16.msra.mxu1 %v1338_v61  ;;  %1214 = vmatprep.subr.bf16.mxu0 %v1340_v62 }
  0x5f   : > { %1237 = vmatprep.subr.bf16.mxu1 %v1340_v62 }
  0x61   : > { %1215 = vmatpush3.bf16.msra.mxu0 %v1342_v2 }
  0x62   : > { %1245 = vmatpush3.bf16.msra.mxu1 %v1342_v2  ;;  %1216 = vmatprep.subr.bf16.mxu0 %v1345_v3 }
  0x63   : > { %1238 = vmatprep.subr.bf16.mxu1 %v1345_v3 }
  0x65   : > { %1217 = vmatpush3.bf16.msra.mxu0 %v1346_v4 }
  0x66   : > { %1246 = vmatpush3.bf16.msra.mxu1 %v1346_v4  ;;  %1218 = vmatprep.subr.bf16.mxu0 %v1347_v5 }
  0x67   : > { %1239 = vmatprep.subr.bf16.mxu1 %v1347_v5 }
  0x69   : > { %1219 = vmatpush3.bf16.msra.mxu0 %v1348_v6 }
  0x6a   : > { %1247 = vmatpush3.bf16.msra.mxu1 %v1348_v6 }
  0x6c   : > { %890 = vmatmul.mubr.bf16.vlgmr.msra.gmra.mrb[8].mxu0 %v1349_v7 }
  0x6d   : > { %898 = vmatmul.mubr.bf16.vlgmr.msra.gmra.mrb[8].mxu1 %v1080_v8 }
 0x11f   : > { %v1164_v9 = vpop.f32.mrb[0].mxu0 }
 0x120   : > { %v1192_v10 = vpop.f32.mrb[0].mxu1  ;;  %v1165_v11 = vpop.f32.mrb[1].mxu0 }
 0x121   : > { %v1166_v12 = vadd.f32 %v1165_v11, %v1164_v9  ;;  %v1193_v13 = vpop.f32.mrb[1].mxu1  ;;  %v1167_v14 = vpop.f32.mrb[2].mxu0 }
 0x122   : > { %v1194_v15 = vadd.f32 %v1193_v13, %v1192_v10  ;;  %v1195_v16 = vpop.f32.mrb[2].mxu1  ;;  %v1168_v17 = vpop.f32.mrb[3].mxu0 }
 0x123   : > { %v1169_v18 = vadd.f32 %v1168_v17, %v1167_v14  ;;  %v1196_v19 = vpop.f32.mrb[3].mxu1 }
 0x124   : > { %v844_v20 = vadd.f32 %v1194_v15, %v1166_v12  ;;  %v1197_v21 = vadd.f32 %v1196_v19, %v1195_v16 }
 0x126   : > { %v847_v22 = vadd.f32 %v1197_v21, %v1169_v18 }
 0x127   : > { %v1170_v23 = vpop.f32.mrb[4].mxu0 }
 0x128   : > { %v1171_v24 = vpop.f32.mrb[5].mxu0  ;;  %v1198_v27 = vpop.f32.mrb[4].mxu1 }
 0x129   : > { %v1172_v25 = vadd.f32 %v1171_v24, %v1170_v23  ;;  %v1173_v26 = vpop.f32.mrb[6].mxu0  ;;  %v1199_v29 = vpop.f32.mrb[5].mxu1 }
 0x12a   : > { %v1174_v28 = vpop.f32.mrb[7].mxu0  ;;  %v1200_v30 = vadd.f32 %v1199_v29, %v1198_v27  ;;  %v1201_v31 = vpop.f32.mrb[6].mxu1 }
 0x12b   : > { %v1202_v32 = vpop.f32.mrb[7].mxu1 }
 0x12c   : > { %v852_v33 = vadd.f32 %v1200_v30, %v1172_v25 }
 0x13f   : > { %v1220_v34 = vpop.f32.mrb[8].mxu0 }
 0x140   : > { %v1226_v35 = vpop.f32.mrb[8].mxu1  ;;  %v1221_v36 = vpop.f32.mrb[9].mxu0 }
 0x141   : > { %v1222_v37 = vadd.f32 %v1221_v36, %v1220_v34  ;;  %v1227_v38 = vpop.f32.mrb[9].mxu1  ;;  %v1223_v39 = vpop.f32.mrb[10].mxu0 }
 0x142   : > { %v1228_v41 = vadd.f32 %v1227_v38, %v1226_v35  ;;  %v1229_v42 = vpop.f32.mrb[10].mxu1  ;;  %v1224_v43 = vpop.f32.mrb[11].mxu0 }
 0x143   : > { %v892_v44 = vadd.f32 %v1222_v37, %v844_v20  ;;  %v1225_v46 = vadd.f32 %v1224_v43, %v1223_v39  ;;  %v1230_v47 = vpop.f32.mrb[11].mxu1  ;;  %914 = sbr.rel (%p1130_p11) target bundleno = 346 (0x15a), region = 67 }
 0x144   : > { %v900_v48 = vadd.f32 %v1228_v41, %v852_v33 }
 0x145   : > { %v905_v50 = vadd.f32 %v892_v44, %v314_v40  ;;  %v895_v51 = vadd.f32 %v1225_v46, %v847_v22 }
 0x146   : > { %v907_v52 = vadd.f32 %v900_v48, %v316_v45 }
 0x147   : > { %908 = vst [vmem:[#allocation2] sm:$0xff] %v905_v50  ;;  %v906_v53 = vadd.f32 %v895_v51, %v315_v49 }
 0x148   : > { %910 = vst [vmem:[#allocation2 + $0x10] sm:$0xff] %v907_v52 }
 0x149   : > { %909 = vst [vmem:[#allocation2 + $0x8] sm:$0xff] %v906_v53 }
 0x14e   : > { %v915_v54 = vld [vmem:[#allocation2] sm:$0xff] }
 0x14f   : > { %v925_v57 = vmul.f32 %v1131_v56, %v915_v54  ;;  %v917_v60 = vld [vmem:[#allocation2 + $0x10] sm:$0xff] }
 0x150   : > { %v916_v55 = vld [vmem:[#allocation2 + $0x8] sm:$0xff]  ;;  %v927_v61 = vmul.f32 %v1131_v56, %v917_v60 }
 0x151   : > { %v926_v58 = vmul.f32 %v1131_v56, %v916_v55  ;;  %v935_v62 = vadd.f32 %v1132_v59, %v925_v57 }
 0x152   : > { %v937_v0 = vadd.f32 %v1132_v59, %v927_v61 }
 0x153   : > { %v936_v63 = vadd.f32 %v1132_v59, %v926_v58  ;;  %v938_v1 = vmax.f32 %v935_v62, 0.0 }
 0x154   : > { %v940_v3 = vmax.f32 %v937_v0, 0.0 }
 0x155   : > { %v939_v2 = vmax.f32 %v936_v63, 0.0 }
 0x156   : > { %v1142_v5 = vpack.c.bf16 %v940_v3, %v940_v3 }
 0x157   : > { %v1146_v4 = vpack.c.bf16 %v939_v2, %v938_v1 }
 0x158   : > { %956 = vst [vmem:[%s1564_s4 + $0x8] sm:$0xf] %v1142_v5 }
 0x159   : > { %1147 = vst [vmem:[%s1564_s4] sm:$0xff] %v1146_v4  }
 0x15a PF: > { %s14_s19 = sadd.s32 1, %s1392_s19   ;;  %s1565_s15 = smov %s1380_s16 }
 0x15b   : > { %p11_p12 = scmp.ge.s32.totalorder %s14_s19, 5   ;;  %s1566_s16 = smov %s1455_s23 }
 0x15c   : > { %s1567_s17 = smov %s1388_s18  ;;  %s1568_s18 = smov %s1570_s20 }
 0x15d   :  { %13 = sbr.rel (!%p11_p12) target bundleno = 3 (0x3), region = 111 }

// kernel: feature_regression_forward.8
= control target key start
LH: loop header
LB: loop body
LE: loop exit
PB: predicated region body
PF: predicated region fallthrough
CT: control target
= control target key end

     0   :  { %s1060_s15 = smov 0   ;;  %s1062_s16 = smov 0   ;;  %s1178_s0 = inlined_call_operand.vmem [shape: bf16[24,1152], index: 0, kind: input, shape index: {}]   ;;  %s1179_s1 = inlined_call_operand.vmem [shape: bf16[1152,64], index: 1, kind: input, shape index: {}]   ;;  %s1180_s2 = inlined_call_operand.vmem [shape: f32[1,64], index: 2, kind: input, shape index: {}]   ;;  %s1181_s3 = inlined_call_operand.vmem [shape: f32[1,64], index: 3, kind: input, shape index: {}]   ;;  %s1182_s4 = inlined_call_operand.vmem [shape: bf16[24,64], index: 4, kind: output, shape index: {}]  }
   0x1   :  { %s1064_s17 = smov 0   ;;  %s1066_s18 = smov 0  }
   0x2   :  { %s1068_s19 = smov 0  }
   0x3 LB: > { %s23_s20 = sadd.s32 1, %s1028_s18  ;;  %p40_p1 = scmp.ne.s32.totalorder %s1020_s16, %s1016_s15  ;;  %s1032_s19 = sphi %s1068_s19, %s14_s19   ;;  %s1028_s18 = sphi %s1066_s18, %s1186_s18   ;;  %s1024_s17 = sphi %s1064_s17, %s1185_s17   ;;  %s1020_s16 = sphi %s1062_s16, %s1184_s16   ;;  %s1016_s15 = sphi %s1060_s15, %s1183_s15  }
   0x4   : > { %p24_p0 = scmp.ge.s32.totalorder %s23_s20, 3  ;;  %p41_p2 = scmp.eq.s32.totalorder %s1032_s19, 0 }
   0x5   : > { %s33_s22 = sadd.s32 1, %s1020_s16  ;;  %p808_p5 = scmp.ge.s32.totalorder %s1032_s19, 3 }
   0x6   : > { %s1188_s20 = smov (%p24_p0, %s23_s20), 0  ;;  %p42_p3 = por %p41_p2, %p40_p1 }
   0x7   : > { %s30_s21 = ssub.s32 %s1028_s18, %s1188_s20  ;;  %184 = sbr.rel (%p808_p5) target bundleno = 22 (0x16), region = 24 }
   0x8   : > { %p31_p4 = scmp.eq.s32.totalorder %s30_s21, 0 }
   0xa   : > { %s1095_s23 = scalar_select %p31_p4, %s1020_s16, %s33_s22  }
   0xe   : > { %187 = sbr.rel (!%p42_p3) target bundleno = 22 (0x16), region = 28  ;;  %s189_s24 = sand.u32 (%p42_p3), 1, %s1020_s16  }
   0xf   : > { %s858_s25 = smul.u32 (%p42_p3), 12, %s1028_s18 }
  0x10   : > { %s920_s26 = smul.u32 (%p42_p3), 36, %s189_s24 }
  0x11   : > { %s194_s29 = scalar_lea.vmem (%p42_p3), %s1178_s0, %s858_s25 }
  0x12   : > { %v209_v0 = vld [vmem:[%s194_s29] sm:$0xff] (%p42_p3)  ;;  %v213_v2 = vld [vmem:[%s194_s29 + $0x48] sm:$0xff] (%p42_p3)  ;;  %s191_s30 = scalar_lea.vmem (%p42_p3), [#allocation3], %s920_s26  ;;  %v814_v5 = vld [vmem:[%s194_s29 + $0x50] sm:$0xf] (%p42_p3) }
  0x13   : > { %v211_v1 = vld [vmem:[%s194_s29 + $0x24] sm:$0xff] (%p42_p3)  ;;  %210 = vst [vmem:[%s191_s30] sm:$0xff] (%p42_p3), %v209_v0  ;;  %214 = vst [vmem:[%s191_s30 + $0x18] sm:$0xff] (%p42_p3), %v213_v2  ;;  %v812_v4 = vld [vmem:[%s194_s29 + $0x2c] sm:$0xf] (%p42_p3) }
  0x14   : > { %212 = vst [vmem:[%s191_s30 + $0xc] sm:$0xff] (%p42_p3), %v211_v1  ;;  %v810_v3 = vld [vmem:[%s194_s29 + $0x8] sm:$0xf] (%p42_p3)  ;;  %813 = vst [vmem:[%s191_s30 + $0x14] sm:$0xf] (%p42_p3), %v812_v4 }
  0x15   : > { %811 = vst [vmem:[%s191_s30 + $0x8] sm:$0xf] %v810_v3  ;;  %815 = vst [vmem:[%s191_s30 + $0x20] sm:$0xf] %v814_v5 }
  0x16 PF: > { %p816_p6 = scmp.ge.s32.totalorder %s1032_s19, 1  ;;  %p244_p7 = scmp.lt.s32.totalorder %s1032_s19, 4 }
  0x18   : > { %p245_p8 = pnand %p816_p6, %p244_p7 }
  0x19   : > { %s251_s5 = sand.u32 (!%p245_p8), 1, %s1016_s15   ;;  %s290_s6 = smul.u32 (!%p245_p8), 48, %s1024_s17 }
  0x1a   : > { %248 = sbr.rel (%p245_p8) target bundleno = 317 (0x13d), region = 58  ;;  %p818_p10 = scmp.ne.s32.totalorder (!%p245_p8), %s1024_s17, 0 }
  0x1b   : > { %s921_s7 = smul.u32 (!%p245_p8), 36, %s251_s5  ;;  %p291_p9 = scmp.lt.s32.totalorder (!%p245_p8), %s290_s6, 143 }
  0x1d   : > { %s1112_s12 = scalar_lea.vmem (!%p245_p8), [#allocation3], %s921_s7 }
  0x21   : > { %s1190_s6 = smov (!%p291_p9, %s290_s6), 143  ;;  %313 = sbr.rel (%p818_p10) target bundleno = 40 (0x28), region = 66 }
  0x22   : > { %s817_s8 = sshll.u32 %s1190_s6, 2  ;;  %vm314_vm0 = vcmask (!%p818_p10), 523264   ;;  %v1034_v6 = vmov (!%p818_p10), 0.0  }
  0x23   : > { %s1110_s11 = scalar_lea.vmem %s1179_s1, %s817_s8  ;;  %315 = vst.msk [vmem:[#allocation2] sm:$0xff] (!%p818_p10), %vm314_vm0, %v1034_v6  ;;  %316 = vst.msk [vmem:[#allocation2 + $0x8] sm:$0xff] (!%p818_p10), %vm314_vm0, %v1034_v6 }
  0x24   : > { %317 = vst.msk [vmem:[#allocation2 + $0x10] sm:$0xff] (!%p818_p10), %vm314_vm0, %v1034_v6 }
  0x28 PF: > { %v963_v7 = vld [vmem:[%s1110_s11 + $0x40] sm:$0xff]   ;;  %v966_v10 = vld [vmem:[%s1110_s11 + $0x48] sm:$0xff]   ;;  %v969_v13 = vld [vmem:[%s1110_s11 + $0x50] sm:$0xff]   ;;  %vm645_vm1 = vcmask 523264   ;;  %p849_p11 = scmp.ne.s32.totalorder %s1024_s17, 2 }
  0x29   : > { %v964_v8 = vld [vmem:[%s1110_s11] sm:$0xff]   ;;  %862 = vmatprep.subr.bf16.mxu0 %v963_v7  ;;  %v967_v11 = vld [vmem:[%s1110_s11 + $0x8] sm:$0xff]   ;;  %v970_v14 = vld [vmem:[%s1110_s11 + $0x10] sm:$0xff]   ;;  %vm692_vm2 = vcmask (!%p849_p11), 519168  }
  0x2a   : > { %v965_v9 = vld [vmem:[%s1110_s11 + $0x80] sm:$0xff]   ;;  %863 = vmatpush3.bf16.msra.mxu0 %v964_v8  ;;  %v968_v12 = vld [vmem:[%s1110_s11 + $0x88] sm:$0xff]   ;;  %v971_v15 = vld [vmem:[%s1110_s11 + $0x90] sm:$0xff]  }
  0x2b   : > { %900 = vmatprep.subr.bf16.mxu1 %v965_v9  ;;  %864 = vmatprep.subr.bf16.mxu0 %v966_v10  ;;  %v972_v16 = vld [vmem:[%s1110_s11 + $0x58] sm:$0xff]   ;;  %v975_v19 = vld [vmem:[%s1110_s11 + $0x60] sm:$0xff]   ;;  %v978_v22 = vld [vmem:[%s1110_s11 + $0x68] sm:$0xff]  }
  0x2c   : > { %901 = vmatpush3.bf16.msra.mxu1 %v965_v9  ;;  %v973_v17 = vld [vmem:[%s1110_s11 + $0x18] sm:$0xff]   ;;  %v977_v20 = vld [vmem:[%s1110_s11 + $0xa0] sm:$0xff]   ;;  %v980_v23 = vld [vmem:[%s1110_s11 + $0xa8] sm:$0xff]  }
  0x2d   : > { %902 = vmatprep.subr.bf16.mxu1 %v968_v12  ;;  %v974_v18 = vld [vmem:[%s1110_s11 + $0x98] sm:$0xff]   ;;  %v976_v21 = vld [vmem:[%s1110_s11 + $0x20] sm:$0xff]   ;;  %v979_v24 = vld [vmem:[%s1110_s11 + $0x28] sm:$0xff]  }
  0x2e   : > { %865 = vmatpush3.bf16.msra.mxu0 %v967_v11  ;;  %v981_v25 = vld [vmem:[%s1110_s11 + $0x70] sm:$0xff]   ;;  %v984_v28 = vld [vmem:[%s1110_s11 + $0x78] sm:$0xff]   ;;  %v318_v44 = vld [vmem:[#allocation2] sm:$0xff] }
  0x2f   : > { %866 = vmatprep.subr.bf16.mxu0 %v969_v13  ;;  %v983_v26 = vld [vmem:[%s1110_s11 + $0xb0] sm:$0xff]   ;;  %v989_v29 = vld [vmem:[%s1112_s12 + $0x4] ss:$12 sps:$4 sm:$0xff]   ;;  %v987_v34 = vld [vmem:[%s1112_s12] ss:$12 sps:$4 sm:$0xff]  }
  0x30   : > { %903 = vmatpush3.bf16.msra.mxu1 %v968_v12  ;;  %v982_v27 = vld [vmem:[%s1110_s11 + $0x30] sm:$0xff]   ;;  %v986_v30 = vld [vmem:[%s1110_s11 + $0xb8] sm:$0xff]   ;;  %578 = vmatprep.mubr.bf16.mxu0 %v989_v29  ;;  %v319_v49 = vld [vmem:[#allocation2 + $0x8] sm:$0xff] }
  0x31   : > { %904 = vmatprep.subr.bf16.mxu1 %v971_v15  ;;  %v990_v31 = vld [vmem:[%s1112_s12 + $0x8] ss:$12 sps:$4 sm:$0xff]   ;;  %v985_v32 = vld [vmem:[%s1110_s11 + $0x38] sm:$0xff]  }
  0x32   : > { %867 = vmatpush3.bf16.msra.mxu0 %v970_v14  ;;  %916 = vmatprep.mubr.bf16.mxu1 %v990_v31  ;;  %v325_v33 = vld [vmem:[%s1112_s12 + $0x18] sm:$0xff]  ;;  %v991_v36 = vld [vmem:[%s1112_s12 + $0x20] ss:$0 sps:$4 sm:$0xff]   ;;  %v850_v63 = vld [vmem:[%s1180_s2] ss:$0 sm:$0xff] (!%p849_p11) }
  0x33   : > { %868 = vmatprep.subr.bf16.mxu0 %v972_v16  ;;  %v823_v35 = vcombine.high %v325_v33, %v325_v33  ;;  %v822_v37 = vcombine.low %v325_v33, %v325_v33  ;;  %v320_v58 = vld [vmem:[#allocation2 + $0x10] sm:$0xff]  ;;  %v851_v0 = vld [vmem:[%s1181_s3] ss:$0 sm:$0xff] (!%p849_p11) }
  0x34   : > { %905 = vmatpush3.bf16.msra.mxu1 %v971_v15 }
  0x35   : > { %906 = vmatprep.subr.bf16.mxu1 %v974_v18 }
  0x36   : > { %869 = vmatpush3.bf16.msra.mxu0 %v973_v17 }
  0x37   : > { %870 = vmatprep.subr.bf16.mxu0 %v975_v19 }
  0x38   : > { %907 = vmatpush3.bf16.msra.mxu1 %v974_v18 }
  0x39   : > { %908 = vmatprep.subr.bf16.mxu1 %v977_v20 }
  0x3a   : > { %871 = vmatpush3.bf16.msra.mxu0 %v976_v21 }
  0x3b   : > { %872 = vmatprep.subr.bf16.mxu0 %v978_v22 }
  0x3c   : > { %909 = vmatpush3.bf16.msra.mxu1 %v977_v20 }
  0x3d   : > { %910 = vmatprep.subr.bf16.mxu1 %v980_v23 }
  0x3e   : > { %873 = vmatpush3.bf16.msra.mxu0 %v979_v24 }
  0x3f   : > { %874 = vmatprep.subr.bf16.mxu0 %v981_v25 }
  0x40   : > { %911 = vmatpush3.bf16.msra.mxu1 %v980_v23 }
  0x41   : > { %912 = vmatprep.subr.bf16.mxu1 %v983_v26 }
  0x42   : > { %875 = vmatpush3.bf16.msra.mxu0 %v982_v27 }
  0x43   : > { %876 = vmatprep.subr.bf16.mxu0 %v984_v28 }
  0x44   : > { %913 = vmatpush3.bf16.msra.mxu1 %v983_v26 }
  0x45   : > { %914 = vmatprep.subr.bf16.mxu1 %v986_v30 }
  0x46   : > { %877 = vmatpush3.bf16.msra.mxu0 %v985_v32 }
  0x48   : > { %915 = vmatpush3.bf16.msra.mxu1 %v986_v30 }
  0x49   : > { %579 = vmatmul.mubr.bf16.vlgmr.msra.gmra.mrb[0].mxu0 %v987_v34 }
  0x4a   : > { %586 = vmatprep.mubr.bf16.mxu0 %v823_v35 }
  0x4b   : > { %917 = vmatmul.mubr.bf16.vlgmr.msra.gmra.mrb[0].mxu1 %v991_v36 }
  0x51   : > { %587 = vmatmul.mubr.bf16.gmra.mrb[4].mxu0 %v822_v37 }
 0x11c   : > { %v878_v38 = vpop.f32.mrb[0].mxu0 }
 0x11d   : > { %v879_v39 = vpop.f32.mrb[1].mxu0 }
 0x11e   : > { %v880_v40 = vadd.f32 %v879_v39, %v878_v38  ;;  %v881_v41 = vpop.f32.mrb[2].mxu0  ;;  %v918_v42 = vpop.f32.mrb[0].mxu1 }
 0x11f   : > { %v882_v43 = vpop.f32.mrb[3].mxu0  ;;  %v628_v45 = vpop.f32.mrb[1].mxu1 }
 0x120   : > { %v883_v46 = vadd.f32 %v882_v43, %v881_v41  ;;  %v629_v47 = vadd.f32 %v880_v40, %v628_v45  ;;  %v919_v48 = vpop.f32.mrb[2].mxu1 }
 0x121   : > { %v631_v50 = vpop.f32.mrb[3].mxu1 }
 0x122   : > { %v642_v51 = vadd.f32 %v629_v47, %v318_v44  ;;  %v632_v52 = vadd.f32 %v883_v46, %v631_v50 }
 0x124   : > { %646 = vst.msk [vmem:[#allocation2] sm:$0xff] %vm645_vm1, %v642_v51  ;;  %v643_v53 = vadd.f32 %v632_v52, %v319_v49  ;;  %v884_v54 = vpop.f32.mrb[4].mxu0 }
 0x125   : > { %v885_v55 = vpop.f32.mrb[5].mxu0 }
 0x126   : > { %647 = vst.msk [vmem:[#allocation2 + $0x8] sm:$0xff] %vm645_vm1, %v643_v53  ;;  %v886_v56 = vadd.f32 %v885_v55, %v884_v54  ;;  %v887_v57 = vpop.f32.mrb[6].mxu0  ;;  %652 = sbr.rel (%p849_p11) target bundleno = 317 (0x13d), region = 70 }
 0x127   : > { %v888_v59 = vpop.f32.mrb[7].mxu0 }
 0x128   : > { %v637_v60 = vadd.f32 %v918_v42, %v886_v56 }
 0x12a   : > { %v644_v61 = vadd.f32 %v637_v60, %v320_v58 }
 0x12b   : > { %v653_v62 = vld [vmem:[#allocation2] sm:$0xff] (!%p849_p11) }
 0x12c   : > { %648 = vst.msk [vmem:[#allocation2 + $0x10] sm:$0xff] %vm645_vm1, %v644_v61  ;;  %v663_v1 = vmul.f32 (!%p849_p11), %v850_v63, %v653_v62 }
 0x12d   : > { %v654_v2 = vld [vmem:[#allocation2 + $0x8] sm:$0xff] }
 0x12e   : > { %v664_v4 = vmul.f32 %v850_v63, %v654_v2  ;;  %v673_v6 = vadd.f32 %v851_v0, %v663_v1 }
 0x130   : > { %v674_v7 = vadd.f32 %v851_v0, %v664_v4  ;;  %v676_v9 = vmax.f32 %v673_v6, 0.0 }
 0x132   : > { %v677_v10 = vmax.f32 %v674_v7, 0.0  ;;  %v859_v12 = vpack.c.bf16 %v676_v9, %v676_v9 }
 0x133   : > { %v655_v3 = vld [vmem:[#allocation2 + $0x10] sm:$0xff] }
 0x134   : > { %v665_v5 = vmul.f32 %v850_v63, %v655_v3  ;;  %v860_v13 = vpack.c.bf16 %v677_v10, %v677_v10  ;;  %693 = vst.msk [vmem:[%s1182_s4] sm:$0xf] %vm692_vm2, %v859_v12 }
 0x136   : > { %v675_v8 = vadd.f32 %v851_v0, %v665_v5  ;;  %694 = vst.msk [vmem:[%s1182_s4 + $0x4] sm:$0xf] %vm692_vm2, %v860_v13 }
 0x138   : > { %v678_v11 = vmax.f32 %v675_v8, 0.0 }
 0x13a   : > { %v861_v14 = vpack.c.bf16 %v678_v11, %v678_v11 }
 0x13c   : > { %695 = vst.msk [vmem:[%s1182_s4 + $0x8] sm:$0xf] %vm692_vm2, %v861_v14 }
 0x13d PF: > { %s14_s19 = sadd.s32 1, %s1032_s19   ;;  %s1183_s15 = smov %s1020_s16 }
 0x13e   : > { %p11_p12 = scmp.ge.s32.totalorder %s14_s19, 5   ;;  %s1184_s16 = smov %s1095_s23 }
 0x13f   : > { %s1185_s17 = smov %s1028_s18  ;;  %s1186_s18 = smov %s1188_s20 }
 0x140   :  { %13 = sbr.rel (!%p11_p12) target bundleno = 3 (0x3), region = 120 }

// kernel: feature_regression_forward.9
= control target key start
LH: loop header
LB: loop body
LE: loop exit
PB: predicated region body
PF: predicated region fallthrough
CT: control target
= control target key end

     0   :  { %v124_v30 = vlaneseq  ;;  %v804_v33 = vmov 1966171168   ;;  %s989_s0 = inlined_call_operand.vmem [shape: bf16[2,768], index: 0, kind: input, shape index: {}]   ;;  %s990_s1 = inlined_call_operand.vmem [shape: bf16[768,128], index: 1, kind: input, shape index: {}]   ;;  %s991_s2 = inlined_call_operand.vmem [shape: f32[1,128], index: 2, kind: input, shape index: {}]   ;;  %s992_s3 = inlined_call_operand.hbm [shape: f32[2,128], index: 3, kind: output, shape index: {}]  }
   0x1   :  { %v729_v0 = vld [vmem:[%s990_s1 + $0x40] sm:$0xff]   ;;  %v733_v4 = vld [vmem:[%s990_s1 + $0x48] sm:$0xff]   ;;  %v737_v8 = vld [vmem:[%s990_s1 + $0x50] sm:$0xff]   ;;  %v122_v34 = vunpack.c.l.s4 %v804_v33 }
   0x2   :  { %v730_v1 = vld [vmem:[%s990_s1 + $0xc0] sm:$0xff]   ;;  %660 = vmatprep.subr.bf16.mxu0 %v729_v0  ;;  %v734_v5 = vld [vmem:[%s990_s1 + $0xc8] sm:$0xff]   ;;  %v738_v9 = vld [vmem:[%s990_s1 + $0xd0] sm:$0xff]   ;;  %v125_v35 = vshrl.u32 %v124_v30, 7 }
   0x3   :  { %v731_v2 = vld [vmem:[%s990_s1] sm:$0xff]   ;;  %682 = vmatprep.subr.bf16.mxu1 %v730_v1  ;;  %v735_v6 = vld [vmem:[%s990_s1 + $0x8] sm:$0xff]   ;;  %v739_v10 = vld [vmem:[%s990_s1 + $0x10] sm:$0xff]   ;;  %v123_v39 = vunpack.c.0.s8 %v122_v34 }
   0x4   :  { %v732_v3 = vld [vmem:[%s990_s1 + $0x80] sm:$0xff]   ;;  %661 = vmatpush3.bf16.msra.mxu0 %v731_v2  ;;  %v736_v7 = vld [vmem:[%s990_s1 + $0x88] sm:$0xff]   ;;  %v740_v11 = vld [vmem:[%s990_s1 + $0x90] sm:$0xff]  }
   0x5   :  { %683 = vmatpush3.bf16.msra.mxu1 %v732_v3  ;;  %662 = vmatprep.subr.bf16.mxu0 %v733_v4  ;;  %v741_v12 = vld [vmem:[%s990_s1 + $0x58] sm:$0xff]   ;;  %v745_v16 = vld [vmem:[%s990_s1 + $0x60] sm:$0xff]   ;;  %v749_v20 = vld [vmem:[%s990_s1 + $0x68] sm:$0xff]   ;;  %v126_v40 = vsub.s32 %v123_v39, %v125_v35 }
   0x6   :  { %684 = vmatprep.subr.bf16.mxu1 %v734_v5  ;;  %v742_v13 = vld [vmem:[%s990_s1 + $0xd8] sm:$0xff]   ;;  %v746_v17 = vld [vmem:[%s990_s1 + $0xe0] sm:$0xff]   ;;  %v750_v21 = vld [vmem:[%s990_s1 + $0xe8] sm:$0xff]  }
   0x7   :  { %v743_v14 = vld [vmem:[%s990_s1 + $0x18] sm:$0xff]   ;;  %v747_v18 = vld [vmem:[%s990_s1 + $0x20] sm:$0xff]   ;;  %v751_v22 = vld [vmem:[%s990_s1 + $0x28] sm:$0xff]  }
   0x8   :  { %663 = vmatpush3.bf16.msra.mxu0 %v735_v6  ;;  %v744_v15 = vld [vmem:[%s990_s1 + $0x98] sm:$0xff]   ;;  %v748_v19 = vld [vmem:[%s990_s1 + $0xa0] sm:$0xff]   ;;  %v752_v23 = vld [vmem:[%s990_s1 + $0xa8] sm:$0xff]  }
   0x9   :  { %685 = vmatpush3.bf16.msra.mxu1 %v736_v7  ;;  %664 = vmatprep.subr.bf16.mxu0 %v737_v8  ;;  %v753_v24 = vld [vmem:[%s990_s1 + $0x70] sm:$0xff]   ;;  %v757_v28 = vld [vmem:[%s990_s1 + $0x78] sm:$0xff]   ;;  %v762_v36 = vld [vmem:[%s990_s1 + $0x140] sm:$0xff]  }
   0xa   :  { %686 = vmatprep.subr.bf16.mxu1 %v738_v9  ;;  %v754_v25 = vld [vmem:[%s990_s1 + $0xf0] sm:$0xff]   ;;  %v758_v29 = vld [vmem:[%s990_s1 + $0xf8] sm:$0xff]   ;;  %v22_v37 = vld [vmem:[%s989_s0] sm:$0x3f] }
   0xb   :  { %v755_v26 = vld [vmem:[%s990_s1 + $0x30] sm:$0xff]   ;;  %v759_v31 = vld [vmem:[%s990_s1 + $0x38] sm:$0xff]   ;;  %v120_v38 = vcombine.high %v22_v37, %v22_v37  ;;  %v127_v41 = vrot.slane %v22_v37, %v126_v40  ;;  %v763_v47 = vld [vmem:[%s990_s1 + $0x100] sm:$0xff]  }
   0xc   :  { %665 = vmatpush3.bf16.msra.mxu0 %v739_v10  ;;  %v756_v27 = vld [vmem:[%s990_s1 + $0xb0] sm:$0xff]   ;;  %v760_v32 = vld [vmem:[%s990_s1 + $0xb8] sm:$0xff]   ;;  %v764_v49 = vld [vmem:[%s990_s1 + $0x148] sm:$0xff]  }
   0xd   :  { %687 = vmatpush3.bf16.msra.mxu1 %v740_v11  ;;  %666 = vmatprep.subr.bf16.mxu0 %v741_v12  ;;  %v134_v42 = vrot.slane %v120_v38, %v126_v40  ;;  %v135_v43 = vcombine.high %v127_v41, %v127_v41  ;;  %v143_v44 = vrot.slane %v127_v41, %v126_v40  ;;  %v765_v52 = vld [vmem:[%s990_s1 + $0x108] sm:$0xff]   ;;  %v766_v53 = vld [vmem:[%s990_s1 + $0x150] sm:$0xff]  }
   0xe   :  { %688 = vmatprep.subr.bf16.mxu1 %v742_v13 }
   0xf   :  { %v136_v45 = vcombine.high %v134_v42, %v134_v42  ;;  %v157_v46 = vrot.slane %v135_v43, %v126_v40  ;;  %v165_v48 = vcombine.high %v143_v44, %v143_v44 }
  0x10   :  { %667 = vmatpush3.bf16.msra.mxu0 %v743_v14 }
  0x11   :  { %689 = vmatpush3.bf16.msra.mxu1 %v744_v15  ;;  %668 = vmatprep.subr.bf16.mxu0 %v745_v16  ;;  %v166_v50 = vcombine.high %v157_v46, %v157_v46  ;;  %v164_v51 = vrot.slane %v136_v45, %v126_v40 }
  0x12   :  { %690 = vmatprep.subr.bf16.mxu1 %v746_v17  ;;  %493 = vmatprep.mubr.bf16.mxu0 %v157_v46 }
  0x13   :  { %533 = vmatprep.mubr.bf16.mxu1 %v166_v50 }
  0x14   :  { %669 = vmatpush3.bf16.msra.mxu0 %v747_v18 }
  0x15   :  { %691 = vmatpush3.bf16.msra.mxu1 %v748_v19  ;;  %670 = vmatprep.subr.bf16.mxu0 %v749_v20 }
  0x16   :  { %692 = vmatprep.subr.bf16.mxu1 %v750_v21 }
  0x18   :  { %671 = vmatpush3.bf16.msra.mxu0 %v751_v22 }
  0x19   :  { %693 = vmatpush3.bf16.msra.mxu1 %v752_v23  ;;  %672 = vmatprep.subr.bf16.mxu0 %v753_v24 }
  0x1a   :  { %694 = vmatprep.subr.bf16.mxu1 %v754_v25 }
  0x1c   :  { %673 = vmatpush3.bf16.msra.mxu0 %v755_v26 }
  0x1d   :  { %695 = vmatpush3.bf16.msra.mxu1 %v756_v27  ;;  %674 = vmatprep.subr.bf16.mxu0 %v757_v28 }
  0x1e   :  { %696 = vmatprep.subr.bf16.mxu1 %v758_v29 }
  0x20   :  { %675 = vmatpush3.bf16.msra.mxu0 %v759_v31 }
  0x21   :  { %697 = vmatpush3.bf16.msra.mxu1 %v760_v32  ;;  %704 = vmatprep.subr.bf16.mxu0 %v762_v36 }
  0x23   :  { %494 = vmatmul.mubr.bf16.vlgmr.msra.gmra.mrb[0].mxu0 %v143_v44 }
  0x24   :  { %705 = vmatpush3.bf16.msra.mxu0 %v763_v47  ;;  %534 = vmatmul.mubr.bf16.vlgmr.msra.gmra.mrb[0].mxu1 %v165_v48 }
  0x25   :  { %706 = vmatprep.subr.bf16.mxu0 %v764_v49 }
  0x26   :  { %8 = vsyncpa [#allocation4], 0  ;;  %573 = vmatprep.mubr.bf16.mxu0 %v164_v51  ;;  %v767_v54 = vld [vmem:[%s990_s1 + $0x110] sm:$0xff]   ;;  %v768_v55 = vld [vmem:[%s990_s1 + $0x158] sm:$0xff]   ;;  %v150_v1 = vrot.slane %v134_v42, %v126_v40  ;;  %v805_v2 = vmov 0.0   ;;  %s806_s29 = smov [#allocation3]  }
  0x27   :  { %v769_v56 = vld [vmem:[%s990_s1 + $0x118] sm:$0xff]   ;;  %v770_v57 = vld [vmem:[%s990_s1 + $0x160] sm:$0xff]   ;;  %v772_v59 = vld [vmem:[%s990_s1 + $0x168] sm:$0xff]   ;;  %20 = vst [vmem:[#allocation2] sm:$0x3] %v805_v2  ;;  %s603_s0 = sshll.u32 %s806_s29, 4  ;;  %s604_s0 = int_to_ptr.vmem [resolvable:$true] %s603_s0 }
  0x28   :  { %707 = vmatpush3.bf16.msra.mxu0 %v765_v52  ;;  %v771_v58 = vld [vmem:[%s990_s1 + $0x120] sm:$0xff]   ;;  %v773_v60 = vld [vmem:[%s990_s1 + $0x128] sm:$0xff]   ;;  %v774_v61 = vld [vmem:[%s990_s1 + $0x170] sm:$0xff]   ;;  %s780_s30 = scalar_lea.vmem %s604_s0, 32  ;;  %p785_p1 = scmp.lt.s32.totalorder %s604_s0, %s604_s0 }
  0x29   :  { %708 = vmatprep.subr.bf16.mxu0 %v766_v53  ;;  %v775_v62 = vld [vmem:[%s990_s1 + $0x130] sm:$0xff]   ;;  %v776_v63 = vld [vmem:[%s990_s1 + $0x178] sm:$0xff]   ;;  %v659_v22 = vld [vmem:[%s991_s2] ss:$0 sm:$0xff]  ;;  %p781_p0 = scmp.ne.s32.totalorder %s604_s0, %s780_s30  ;;  %p786_p2 = scmp.lt.s32.totalorder %s780_s30, %s780_s30 }
  0x2a   :  { %v777_v0 = vld [vmem:[%s990_s1 + $0x138] sm:$0xff]  }
  0x2b   :  { %p787_p3 = por %p786_p2, %p785_p1 }
  0x2c   :  { %709 = vmatpush3.bf16.msra.mxu0 %v767_v54 }
  0x2d   :  { %710 = vmatprep.subr.bf16.mxu0 %v768_v55  ;;  %p788_p4 = pnand %p787_p3, %p781_p0 }
  0x2e   :  { %v21_v18 = vld [vmem:[#allocation2] sm:$0x3] }
  0x30   :  { %711 = vmatpush3.bf16.msra.mxu0 %v769_v56 }
  0x31   :  { %712 = vmatprep.subr.bf16.mxu0 %v770_v57 }
  0x34   :  { %713 = vmatpush3.bf16.msra.mxu0 %v771_v58 }
  0x35   :  { %714 = vmatprep.subr.bf16.mxu0 %v772_v59 }
  0x38   :  { %715 = vmatpush3.bf16.msra.mxu0 %v773_v60 }
  0x39   :  { %716 = vmatprep.subr.bf16.mxu0 %v774_v61 }
  0x3c   :  { %717 = vmatpush3.bf16.msra.mxu0 %v775_v62 }
  0x3d   :  { %718 = vmatprep.subr.bf16.mxu0 %v776_v63 }
  0x40   :  { %719 = vmatpush3.bf16.msra.mxu0 %v777_v0 }
  0x43   :  { %574 = vmatmul.mubr.bf16.vlgmr.msra.gmra.mrb[4].mxu0 %v150_v1 }
  0xf6   :  { %v676_v3 = vpop.f32.mrb[0].mxu0 }
  0xf7   :  { %v677_v4 = vpop.f32.mrb[1].mxu0  ;;  %v698_v5 = vpop.f32.mrb[0].mxu1 }
  0xf8   :  { %v678_v6 = vadd.f32 %v677_v4, %v676_v3  ;;  %v679_v7 = vpop.f32.mrb[2].mxu0  ;;  %v699_v8 = vpop.f32.mrb[1].mxu1 }
  0xf9   :  { %v680_v9 = vpop.f32.mrb[3].mxu0  ;;  %v700_v10 = vadd.f32 %v699_v8, %v698_v5  ;;  %v701_v11 = vpop.f32.mrb[2].mxu1 }
  0xfa   :  { %v702_v12 = vpop.f32.mrb[3].mxu1 }
  0xfb   :  { %v536_v13 = vadd.f32 %v700_v10, %v678_v6 }
 0x116   :  { %v720_v14 = vpop.f32.mrb[4].mxu0 }
 0x117   :  { %v721_v15 = vpop.f32.mrb[5].mxu0 }
 0x118   :  { %v722_v16 = vadd.f32 %v721_v15, %v720_v14  ;;  %v723_v17 = vpop.f32.mrb[6].mxu0 }
 0x119   :  { %v724_v19 = vpop.f32.mrb[7].mxu0 }
 0x11a   :  { %v576_v20 = vadd.f32 %v722_v16, %v536_v13 }
 0x11c   :  { %v581_v21 = vadd.f32 %v576_v20, %v21_v18 }
 0x11e   :  { %582 = vst [vmem:[#allocation2] sm:$0x3] %v581_v21 }
 0x125   :  { %v586_v23 = vld [vmem:[#allocation2] sm:$0x3] }
 0x126   :  { %v594_v24 = vadd.f32 %v659_v22, %v586_v23 }
 0x128   :  { %778 = vtanh.f32 %v594_v24 }
 0x132   :  { %v779_v25 = vpop.eup %778 }
 0x133   :  { %596 = vst [vmem:[#allocation3] sm:$0x3] %v779_v25 }
 0x134   :  { %791 = shalt.err (!%p788_p4)
}
 0x135   :  { %s792_s6 = scalar_lea.hbm %s992_s3, 32 }
 0x136   :  { %p793_p5 = scmp.ne.s32.totalorder %s992_s3, %s792_s6  ;;  %p796_p6 = scmp.lt.u32.totalorder %s792_s6, %s992_s3 }
 0x138   :  { %p798_p7 = pnand %p796_p6, %p793_p5 }
 0x13a   :  { %801 = shalt.err (!%p798_p7)
}
 0x13b   :  { %606 = dma.vmem_to_hbm [thread:$0]  %s604_s0, 32, %s992_s3, [#allocation4]  }
 0x13c   :  { %802 = dma.done.wait [#allocation4], 32  }
 0x13d   :  { %803 = vsyncadd [#allocation4], 4294967264 }
 0x13e   :  { %610 = vsyncpa [#allocation4], 1 }

</bundles_post_ra>
